<compile_context>
chip_gen: v6e
topology: v6e:2x2x1
jax: 0.10.0
libtpu: 0.0.40
codegen_flags: <defaults>
</compile_context>

<pallas_src>
import functools

import jax
import jax.numpy as jnp
from jax import lax
from jax.experimental import pallas as pl
from jax.experimental.pallas import tpu as pltpu

G = 128  # lane-aligned gate block width (each of r, z, gi_n, gh_n padded to G)


def _base_rnn_kernel(x_ref, wi40_ref, wi4r_ref, wh4_ref, b4_ref, o_ref, *,
                     bp, seq_len, n_layers, hidden):
    """Fused multi-layer GRU forward with a wavefront (diagonal) schedule.

    x_ref    : (L, bp, D)              time-major input, batch padded to bp, bf16
    wi40_ref : (D, 4G)                 layer-0 input weights  [r | z | gi_n | 0]  bf16
    wi4r_ref : (n_layers-1, H, 4G)     input weights, layers 1..n-1               bf16
    wh4_ref  : (n_layers, H, 4G)       hidden weights         [r | z | 0 | gh_n]  bf16
    b4_ref   : (n_layers, 1, 4G)       biases [b_ir+b_hr | b_iz+b_hz | b_in | b_hn] f32
    o_ref    : (L, bp, H)              output sequence of the last layer          f32
    """

    def cell(in_t, h_prev, wi, wh, b):
        # in_t: (bp, D_in); h_prev: (bp, H) f32; wi/wh bf16; b (1, 4G) f32.
        g = (jnp.dot(in_t.astype(jnp.bfloat16), wi,
                     preferred_element_type=jnp.float32)
             + jnp.dot(h_prev.astype(jnp.bfloat16), wh,
                       preferred_element_type=jnp.float32)
             + b)
        # Combined r|z gate: logistic written in its single-tanh EUP form.
        rz = 0.5 + 0.5 * jnp.tanh(0.5 * g[:, :2 * G])
        r = rz[:, :G]
        z = rz[:, G:2 * G]
        n = jnp.tanh(g[:, 2 * G:3 * G] + r * g[:, 3 * G:4 * G])
        # Blend at natural hidden width (slices start at lane 0 -> no rotates).
        zh = z[:, :hidden]
        return (1.0 - zh) * n[:, :hidden] + zh * h_prev

    # Wavefront carry: h[l] == hidden state of layer l at its current timestep.
    h = [jnp.zeros((bp, hidden), jnp.float32) for _ in range(n_layers)]

    for s in range(seq_len + n_layers - 1):          # static wavefront unroll
        h_snap = list(h)                             # all layers read pre-step state
        for layer in range(n_layers):
            t = s - layer
            if 0 <= t < seq_len:                     # layer active at this wavefront step
                if layer == 0:
                    in_t = x_ref[t]                  # (bp, D)
                    wi = wi40_ref[...]
                else:
                    in_t = h_snap[layer - 1]         # prev layer's output at time t
                    wi = wi4r_ref[layer - 1]
                h_new = cell(in_t, h_snap[layer], wi, wh4_ref[layer], b4_ref[layer])
                h[layer] = h_new
                if layer == n_layers - 1:            # last layer: store directly
                    o_ref[t] = h_new.astype(o_ref.dtype)


def _fused_gru(x_lbd, params, *, bp, seq_len, n_layers, hidden):
    kernel = functools.partial(_base_rnn_kernel, bp=bp, seq_len=seq_len,
                               n_layers=n_layers, hidden=hidden)
    vmem = pl.BlockSpec(memory_space=pltpu.MemorySpace.VMEM)
    return pl.pallas_call(
        kernel,
        out_shape=jax.ShapeDtypeStruct((seq_len, bp, hidden), jnp.float32),
        in_specs=[vmem] * 5,
        out_specs=vmem,
    )(x_lbd, params["wi40"], params["wi4_rest"], params["wh4"], params["b4"])


@jax.jit
def base_rnn_forward(x_bld, params):
    """BaseRNN.forward for visual_input=False, batch_first=True.

    x_bld: (B, L, in_dim) float32.  Returns (B, L, out_dim): the full GRU
    output sequence of the last layer (== self._gru(x)[0]).
    """
    B, L, D = x_bld.shape
    n_layers, H, _ = params["wh4"].shape
    bp = max(8, ((B + 7) // 8) * 8)                  # pad batch to full sublanes
    x_lbd = jnp.transpose(x_bld, (1, 0, 2))          # (L, B, D) time-major
    x_pad = jnp.pad(x_lbd, ((0, 0), (0, bp - B), (0, 0))).astype(jnp.bfloat16)
    out = _fused_gru(x_pad, params, bp=bp, seq_len=L,
                     n_layers=n_layers, hidden=H)    # (L, bp, H)
    return jnp.transpose(out[:, :B, :], (1, 0, 2))   # (B, L, out_dim)


def init_base_rnn_params(key, in_dim, out_dim, n_layers=3):
    """Synthetic nn.GRU parameters: per layer (wih (D_l,3H), whh (H,3H),
    bih (3H,), bhh (3H,)), gate order [r | z | n], stored transposed for x@W."""
    H = out_dim
    bound = 1.0 / float(out_dim) ** 0.5
    raw = []
    for layer in range(n_layers):
        d_in = in_dim if layer == 0 else out_dim
        key, k1, k2, k3, k4 = jax.random.split(key, 5)
        raw.append((
            jax.random.uniform(k1, (d_in, 3 * H), jnp.float32, -bound, bound),
            jax.random.uniform(k2, (H, 3 * H), jnp.float32, -bound, bound),
            jax.random.uniform(k3, (3 * H,), jnp.float32, -bound, bound),
            jax.random.uniform(k4, (3 * H,), jnp.float32, -bound, bound),
        ))
    return raw


def prepare_params(raw_params):
    """Pack weights into 128-lane-aligned 4-block layout [r|z|gi_n|gh_n],
    fold biases, and cast matmul operands to bf16."""
    n_layers = len(raw_params)
    H = raw_params[0][1].shape[0]

    def pack_wi(wih):                                # (K, 3H) -> (K, 4G) bf16
        K = wih.shape[0]
        w4 = jnp.zeros((K, 4 * G), jnp.float32)
        w4 = w4.at[:, 0 * G:0 * G + H].set(wih[:, 0:H])           # r
        w4 = w4.at[:, 1 * G:1 * G + H].set(wih[:, H:2 * H])       # z
        w4 = w4.at[:, 2 * G:2 * G + H].set(wih[:, 2 * H:3 * H])   # gi_n
        return w4.astype(jnp.bfloat16)

    def pack_wh(whh):                                # (H, 3H) -> (H, 4G) bf16
        w4 = jnp.zeros((H, 4 * G), jnp.float32)
        w4 = w4.at[:, 0 * G:0 * G + H].set(whh[:, 0:H])           # r
        w4 = w4.at[:, 1 * G:1 * G + H].set(whh[:, H:2 * H])       # z
        w4 = w4.at[:, 3 * G:3 * G + H].set(whh[:, 2 * H:3 * H])   # gh_n
        return w4.astype(jnp.bfloat16)

    def pack_bias(bih, bhh):                         # -> (1, 4G) f32
        b4 = jnp.zeros((1, 4 * G), jnp.float32)
        b4 = b4.at[0, 0 * G:0 * G + H].set(bih[0:H] + bhh[0:H])           # r
        b4 = b4.at[0, 1 * G:1 * G + H].set(bih[H:2 * H] + bhh[H:2 * H])   # z
        b4 = b4.at[0, 2 * G:2 * G + H].set(bih[2 * H:3 * H])              # b_in
        b4 = b4.at[0, 3 * G:3 * G + H].set(bhh[2 * H:3 * H])              # b_hn
        return b4

    params = {
        "wi40": pack_wi(raw_params[0][0]),
        "wh4": jnp.stack([pack_wh(p[1]) for p in raw_params]),
        "b4": jnp.stack([pack_bias(p[2], p[3]) for p in raw_params]),
    }
    if n_layers > 1:
        params["wi4_rest"] = jnp.stack([pack_wi(p[0]) for p in raw_params[1:]])
    else:
        # Dummy (never read when n_layers == 1) so the kernel signature is fixed.
        params["wi4_rest"] = jnp.zeros((1, H, 4 * G), jnp.bfloat16)
    return params


def _reference_gru(x_bld, raw_params):
    """Pure-JAX f32 lax.scan reference (PyTorch GRU semantics)."""
    h_seq = jnp.transpose(x_bld, (1, 0, 2))          # (L, B, D)
    B = h_seq.shape[1]
    for wih, whh, bih, bhh in raw_params:
        H = whh.shape[0]

        def step(h_prev, x_t, wih=wih, whh=whh, bih=bih, bhh=bhh, H=H):
            gi = x_t @ wih + bih
            gh = h_prev @ whh + bhh
            r = jax.nn.sigmoid(gi[:, :H] + gh[:, :H])
            z = jax.nn.sigmoid(gi[:, H:2 * H] + gh[:, H:2 * H])
            n = jnp.tanh(gi[:, 2 * H:] + r * gh[:, 2 * H:])
            h_new = (1.0 - z) * n + z * h_prev
            return h_new, h_new

        _, h_seq = lax.scan(step, jnp.zeros((B, H), jnp.float32), h_seq)
    return jnp.transpose(h_seq, (1, 0, 2))


if __name__ == "__main__":
    # Small shapes consistent with the module: batch=2, seq=8, in_dim=32, hidden=32.
    B, L, IN_DIM, OUT_DIM, N_LAYERS = 2, 8, 32, 32, 3

    key = jax.random.PRNGKey(0)
    key, kx = jax.random.split(key)
    x = jax.random.normal(kx, (B, L, IN_DIM), jnp.float32)

    raw_params = init_base_rnn_params(key, IN_DIM, OUT_DIM, n_layers=N_LAYERS)
    params = prepare_params(raw_params)

    out = jax.block_until_ready(base_rnn_forward(x, params))
    ref = jax.block_until_ready(_reference_gru(x, raw_params))

    assert out.shape == (B, L, OUT_DIM), out.shape
    # Tolerance loosened because matmul operands are bf16 (f32 reference).
    assert jnp.allclose(out, ref, rtol=3e-2, atol=3e-2), (
        "mismatch vs reference, max abs err = %g"
        % float(jnp.max(jnp.abs(out - ref))))

    print("KERNEL_OK")
</pallas_src>

<mosaic_0001>
module attributes {stable_mosaic.version = 11 : i64} {
  func.func @_base_rnn_kernel(%arg0: memref<8x8x32xbf16, #tpu.memory_space<vmem>>, %arg1: memref<32x512xbf16, #tpu.memory_space<vmem>>, %arg2: memref<2x32x512xbf16, #tpu.memory_space<vmem>>, %arg3: memref<3x32x512xbf16, #tpu.memory_space<vmem>>, %arg4: memref<3x1x512xf32, #tpu.memory_space<vmem>>, %arg5: memref<8x8x32xf32, #tpu.memory_space<vmem>>) attributes {dimension_semantics = [], scalar_prefetch = 0 : i64, scratch_operands = 0 : i64, tpu.core_type = #tpu.core_type<tc>} {
    %cst = arith.constant 0.000000e+00 : f32
    %0 = vector.broadcast %cst : f32 to vector<8x32xf32>
    %cst_0 = arith.constant 0.000000e+00 : f32
    %1 = vector.broadcast %cst_0 : f32 to vector<8x32xf32>
    %cst_1 = arith.constant 0.000000e+00 : f32
    %2 = vector.broadcast %cst_1 : f32 to vector<8x32xf32>
    %c0 = arith.constant 0 : index
    %c0_2 = arith.constant 0 : index
    %c0_3 = arith.constant 0 : index
    %3 = vector.load %arg0[%c0, %c0_2, %c0_3] : memref<8x8x32xbf16, #tpu.memory_space<vmem>>, vector<1x8x32xbf16>
    %4 = vector.shape_cast %3 : vector<1x8x32xbf16> to vector<8x32xbf16>
    %c0_4 = arith.constant 0 : index
    %c0_5 = arith.constant 0 : index
    %5 = vector.load %arg1[%c0_4, %c0_5] : memref<32x512xbf16, #tpu.memory_space<vmem>>, vector<32x512xbf16>
    %c0_6 = arith.constant 0 : index
    %c0_7 = arith.constant 0 : index
    %c0_8 = arith.constant 0 : index
    %6 = vector.load %arg3[%c0_6, %c0_7, %c0_8] : memref<3x32x512xbf16, #tpu.memory_space<vmem>>, vector<1x32x512xbf16>
    %7 = vector.shape_cast %6 : vector<1x32x512xbf16> to vector<32x512xbf16>
    %c0_9 = arith.constant 0 : index
    %c0_10 = arith.constant 0 : index
    %c0_11 = arith.constant 0 : index
    %8 = vector.load %arg4[%c0_9, %c0_10, %c0_11] : memref<3x1x512xf32, #tpu.memory_space<vmem>>, vector<1x1x512xf32>
    %9 = vector.shape_cast %8 : vector<1x1x512xf32> to vector<1x512xf32>
    %cst_12 = arith.constant dense<0.000000e+00> : vector<8x512xf32>
    %10 = tpu.matmul %4, %5, %cst_12 {dimension_numbers = #tpu.dot_dimension_numbers<[1], [0], [0], [1], [0, 0, 1, 1], [], []>} : vector<8x32xbf16>, vector<32x512xbf16>, vector<8x512xf32> -> vector<8x512xf32>
    %11 = arith.truncf %0 : vector<8x32xf32> to vector<8x32xbf16>
    %cst_13 = arith.constant dense<0.000000e+00> : vector<8x512xf32>
    %12 = tpu.matmul %11, %7, %cst_13 {dimension_numbers = #tpu.dot_dimension_numbers<[1], [0], [0], [1], [0, 0, 1, 1], [], []>} : vector<8x32xbf16>, vector<32x512xbf16>, vector<8x512xf32> -> vector<8x512xf32>
    %13 = arith.addf %10, %12 : vector<8x512xf32>
    %14 = vector.broadcast %9 : vector<1x512xf32> to vector<8x512xf32>
    %15 = arith.addf %13, %14 : vector<8x512xf32>
    %16 = vector.extract_strided_slice %15 {offsets = [0, 0], sizes = [8, 256], strides = [1, 1]} : vector<8x512xf32> to vector<8x256xf32>
    %cst_14 = arith.constant 5.000000e-01 : f32
    %17 = vector.broadcast %cst_14 : f32 to vector<8x256xf32>
    %18 = arith.mulf %17, %16 : vector<8x256xf32>
    %19 = math.tanh %18 : vector<8x256xf32>
    %cst_15 = arith.constant 5.000000e-01 : f32
    %20 = vector.broadcast %cst_15 : f32 to vector<8x256xf32>
    %21 = arith.mulf %20, %19 : vector<8x256xf32>
    %cst_16 = arith.constant 5.000000e-01 : f32
    %22 = vector.broadcast %cst_16 : f32 to vector<8x256xf32>
    %23 = arith.addf %22, %21 : vector<8x256xf32>
    %24 = vector.extract_strided_slice %23 {offsets = [0, 0], sizes = [8, 128], strides = [1, 1]} : vector<8x256xf32> to vector<8x128xf32>
    %25 = vector.extract_strided_slice %23 {offsets = [0, 128], sizes = [8, 128], strides = [1, 1]} : vector<8x256xf32> to vector<8x128xf32>
    %26 = vector.extract_strided_slice %15 {offsets = [0, 256], sizes = [8, 128], strides = [1, 1]} : vector<8x512xf32> to vector<8x128xf32>
    %27 = vector.extract_strided_slice %15 {offsets = [0, 384], sizes = [8, 128], strides = [1, 1]} : vector<8x512xf32> to vector<8x128xf32>
    %28 = arith.mulf %24, %27 : vector<8x128xf32>
    %29 = arith.addf %26, %28 : vector<8x128xf32>
    %30 = math.tanh %29 : vector<8x128xf32>
    %31 = vector.extract_strided_slice %25 {offsets = [0, 0], sizes = [8, 32], strides = [1, 1]} : vector<8x128xf32> to vector<8x32xf32>
    %cst_17 = arith.constant 1.000000e+00 : f32
    %32 = vector.broadcast %cst_17 : f32 to vector<8x32xf32>
    %33 = arith.subf %32, %31 : vector<8x32xf32>
    %34 = vector.extract_strided_slice %30 {offsets = [0, 0], sizes = [8, 32], strides = [1, 1]} : vector<8x128xf32> to vector<8x32xf32>
    %35 = arith.mulf %33, %34 : vector<8x32xf32>
    %36 = arith.mulf %31, %0 : vector<8x32xf32>
    %37 = arith.addf %35, %36 : vector<8x32xf32>
    %c1 = arith.constant 1 : index
    %c0_18 = arith.constant 0 : index
    %c0_19 = arith.constant 0 : index
    %38 = vector.load %arg0[%c1, %c0_18, %c0_19] : memref<8x8x32xbf16, #tpu.memory_space<vmem>>, vector<1x8x32xbf16>
    %39 = vector.shape_cast %38 : vector<1x8x32xbf16> to vector<8x32xbf16>
    %c0_20 = arith.constant 0 : index
    %c0_21 = arith.constant 0 : index
    %40 = vector.load %arg1[%c0_20, %c0_21] : memref<32x512xbf16, #tpu.memory_space<vmem>>, vector<32x512xbf16>
    %c0_22 = arith.constant 0 : index
    %c0_23 = arith.constant 0 : index
    %c0_24 = arith.constant 0 : index
    %41 = vector.load %arg3[%c0_22, %c0_23, %c0_24] : memref<3x32x512xbf16, #tpu.memory_space<vmem>>, vector<1x32x512xbf16>
    %42 = vector.shape_cast %41 : vector<1x32x512xbf16> to vector<32x512xbf16>
    %c0_25 = arith.constant 0 : index
    %c0_26 = arith.constant 0 : index
    %c0_27 = arith.constant 0 : index
    %43 = vector.load %arg4[%c0_25, %c0_26, %c0_27] : memref<3x1x512xf32, #tpu.memory_space<vmem>>, vector<1x1x512xf32>
    %44 = vector.shape_cast %43 : vector<1x1x512xf32> to vector<1x512xf32>
    %cst_28 = arith.constant dense<0.000000e+00> : vector<8x512xf32>
    %45 = tpu.matmul %39, %40, %cst_28 {dimension_numbers = #tpu.dot_dimension_numbers<[1], [0], [0], [1], [0, 0, 1, 1], [], []>} : vector<8x32xbf16>, vector<32x512xbf16>, vector<8x512xf32> -> vector<8x512xf32>
    %46 = arith.truncf %37 : vector<8x32xf32> to vector<8x32xbf16>
    %cst_29 = arith.constant dense<0.000000e+00> : vector<8x512xf32>
    %47 = tpu.matmul %46, %42, %cst_29 {dimension_numbers = #tpu.dot_dimension_numbers<[1], [0], [0], [1], [0, 0, 1, 1], [], []>} : vector<8x32xbf16>, vector<32x512xbf16>, vector<8x512xf32> -> vector<8x512xf32>
    %48 = arith.addf %45, %47 : vector<8x512xf32>
    %49 = vector.broadcast %44 : vector<1x512xf32> to vector<8x512xf32>
    %50 = arith.addf %48, %49 : vector<8x512xf32>
    %51 = vector.extract_strided_slice %50 {offsets = [0, 0], sizes = [8, 256], strides = [1, 1]} : vector<8x512xf32> to vector<8x256xf32>
    %cst_30 = arith.constant 5.000000e-01 : f32
    %52 = vector.broadcast %cst_30 : f32 to vector<8x256xf32>
    %53 = arith.mulf %52, %51 : vector<8x256xf32>
    %54 = math.tanh %53 : vector<8x256xf32>
    %cst_31 = arith.constant 5.000000e-01 : f32
    %55 = vector.broadcast %cst_31 : f32 to vector<8x256xf32>
    %56 = arith.mulf %55, %54 : vector<8x256xf32>
    %cst_32 = arith.constant 5.000000e-01 : f32
    %57 = vector.broadcast %cst_32 : f32 to vector<8x256xf32>
    %58 = arith.addf %57, %56 : vector<8x256xf32>
    %59 = vector.extract_strided_slice %58 {offsets = [0, 0], sizes = [8, 128], strides = [1, 1]} : vector<8x256xf32> to vector<8x128xf32>
    %60 = vector.extract_strided_slice %58 {offsets = [0, 128], sizes = [8, 128], strides = [1, 1]} : vector<8x256xf32> to vector<8x128xf32>
    %61 = vector.extract_strided_slice %50 {offsets = [0, 256], sizes = [8, 128], strides = [1, 1]} : vector<8x512xf32> to vector<8x128xf32>
    %62 = vector.extract_strided_slice %50 {offsets = [0, 384], sizes = [8, 128], strides = [1, 1]} : vector<8x512xf32> to vector<8x128xf32>
    %63 = arith.mulf %59, %62 : vector<8x128xf32>
    %64 = arith.addf %61, %63 : vector<8x128xf32>
    %65 = math.tanh %64 : vector<8x128xf32>
    %66 = vector.extract_strided_slice %60 {offsets = [0, 0], sizes = [8, 32], strides = [1, 1]} : vector<8x128xf32> to vector<8x32xf32>
    %cst_33 = arith.constant 1.000000e+00 : f32
    %67 = vector.broadcast %cst_33 : f32 to vector<8x32xf32>
    %68 = arith.subf %67, %66 : vector<8x32xf32>
    %69 = vector.extract_strided_slice %65 {offsets = [0, 0], sizes = [8, 32], strides = [1, 1]} : vector<8x128xf32> to vector<8x32xf32>
    %70 = arith.mulf %68, %69 : vector<8x32xf32>
    %71 = arith.mulf %66, %37 : vector<8x32xf32>
    %72 = arith.addf %70, %71 : vector<8x32xf32>
    %c0_34 = arith.constant 0 : index
    %c0_35 = arith.constant 0 : index
    %c0_36 = arith.constant 0 : index
    %73 = vector.load %arg2[%c0_34, %c0_35, %c0_36] : memref<2x32x512xbf16, #tpu.memory_space<vmem>>, vector<1x32x512xbf16>
    %74 = vector.shape_cast %73 : vector<1x32x512xbf16> to vector<32x512xbf16>
    %c1_37 = arith.constant 1 : index
    %c0_38 = arith.constant 0 : index
    %c0_39 = arith.constant 0 : index
    %75 = vector.load %arg3[%c1_37, %c0_38, %c0_39] : memref<3x32x512xbf16, #tpu.memory_space<vmem>>, vector<1x32x512xbf16>
    %76 = vector.shape_cast %75 : vector<1x32x512xbf16> to vector<32x512xbf16>
    %c1_40 = arith.constant 1 : index
    %c0_41 = arith.constant 0 : index
    %c0_42 = arith.constant 0 : index
    %77 = vector.load %arg4[%c1_40, %c0_41, %c0_42] : memref<3x1x512xf32, #tpu.memory_space<vmem>>, vector<1x1x512xf32>
    %78 = vector.shape_cast %77 : vector<1x1x512xf32> to vector<1x512xf32>
    %79 = arith.truncf %37 : vector<8x32xf32> to vector<8x32xbf16>
    %cst_43 = arith.constant dense<0.000000e+00> : vector<8x512xf32>
    %80 = tpu.matmul %79, %74, %cst_43 {dimension_numbers = #tpu.dot_dimension_numbers<[1], [0], [0], [1], [0, 0, 1, 1], [], []>} : vector<8x32xbf16>, vector<32x512xbf16>, vector<8x512xf32> -> vector<8x512xf32>
    %81 = arith.truncf %1 : vector<8x32xf32> to vector<8x32xbf16>
    %cst_44 = arith.constant dense<0.000000e+00> : vector<8x512xf32>
    %82 = tpu.matmul %81, %76, %cst_44 {dimension_numbers = #tpu.dot_dimension_numbers<[1], [0], [0], [1], [0, 0, 1, 1], [], []>} : vector<8x32xbf16>, vector<32x512xbf16>, vector<8x512xf32> -> vector<8x512xf32>
    %83 = arith.addf %80, %82 : vector<8x512xf32>
    %84 = vector.broadcast %78 : vector<1x512xf32> to vector<8x512xf32>
    %85 = arith.addf %83, %84 : vector<8x512xf32>
    %86 = vector.extract_strided_slice %85 {offsets = [0, 0], sizes = [8, 256], strides = [1, 1]} : vector<8x512xf32> to vector<8x256xf32>
    %cst_45 = arith.constant 5.000000e-01 : f32
    %87 = vector.broadcast %cst_45 : f32 to vector<8x256xf32>
    %88 = arith.mulf %87, %86 : vector<8x256xf32>
    %89 = math.tanh %88 : vector<8x256xf32>
    %cst_46 = arith.constant 5.000000e-01 : f32
    %90 = vector.broadcast %cst_46 : f32 to vector<8x256xf32>
    %91 = arith.mulf %90, %89 : vector<8x256xf32>
    %cst_47 = arith.constant 5.000000e-01 : f32
    %92 = vector.broadcast %cst_47 : f32 to vector<8x256xf32>
    %93 = arith.addf %92, %91 : vector<8x256xf32>
    %94 = vector.extract_strided_slice %93 {offsets = [0, 0], sizes = [8, 128], strides = [1, 1]} : vector<8x256xf32> to vector<8x128xf32>
    %95 = vector.extract_strided_slice %93 {offsets = [0, 128], sizes = [8, 128], strides = [1, 1]} : vector<8x256xf32> to vector<8x128xf32>
    %96 = vector.extract_strided_slice %85 {offsets = [0, 256], sizes = [8, 128], strides = [1, 1]} : vector<8x512xf32> to vector<8x128xf32>
    %97 = vector.extract_strided_slice %85 {offsets = [0, 384], sizes = [8, 128], strides = [1, 1]} : vector<8x512xf32> to vector<8x128xf32>
    %98 = arith.mulf %94, %97 : vector<8x128xf32>
    %99 = arith.addf %96, %98 : vector<8x128xf32>
    %100 = math.tanh %99 : vector<8x128xf32>
    %101 = vector.extract_strided_slice %95 {offsets = [0, 0], sizes = [8, 32], strides = [1, 1]} : vector<8x128xf32> to vector<8x32xf32>
    %cst_48 = arith.constant 1.000000e+00 : f32
    %102 = vector.broadcast %cst_48 : f32 to vector<8x32xf32>
    %103 = arith.subf %102, %101 : vector<8x32xf32>
    %104 = vector.extract_strided_slice %100 {offsets = [0, 0], sizes = [8, 32], strides = [1, 1]} : vector<8x128xf32> to vector<8x32xf32>
    %105 = arith.mulf %103, %104 : vector<8x32xf32>
    %106 = arith.mulf %101, %1 : vector<8x32xf32>
    %107 = arith.addf %105, %106 : vector<8x32xf32>
    %c2 = arith.constant 2 : index
    %c0_49 = arith.constant 0 : index
    %c0_50 = arith.constant 0 : index
    %108 = vector.load %arg0[%c2, %c0_49, %c0_50] : memref<8x8x32xbf16, #tpu.memory_space<vmem>>, vector<1x8x32xbf16>
    %109 = vector.shape_cast %108 : vector<1x8x32xbf16> to vector<8x32xbf16>
    %c0_51 = arith.constant 0 : index
    %c0_52 = arith.constant 0 : index
    %110 = vector.load %arg1[%c0_51, %c0_52] : memref<32x512xbf16, #tpu.memory_space<vmem>>, vector<32x512xbf16>
    %c0_53 = arith.constant 0 : index
    %c0_54 = arith.constant 0 : index
    %c0_55 = arith.constant 0 : index
    %111 = vector.load %arg3[%c0_53, %c0_54, %c0_55] : memref<3x32x512xbf16, #tpu.memory_space<vmem>>, vector<1x32x512xbf16>
    %112 = vector.shape_cast %111 : vector<1x32x512xbf16> to vector<32x512xbf16>
    %c0_56 = arith.constant 0 : index
    %c0_57 = arith.constant 0 : index
    %c0_58 = arith.constant 0 : index
    %113 = vector.load %arg4[%c0_56, %c0_57, %c0_58] : memref<3x1x512xf32, #tpu.memory_space<vmem>>, vector<1x1x512xf32>
    %114 = vector.shape_cast %113 : vector<1x1x512xf32> to vector<1x512xf32>
    %cst_59 = arith.constant dense<0.000000e+00> : vector<8x512xf32>
    %115 = tpu.matmul %109, %110, %cst_59 {dimension_numbers = #tpu.dot_dimension_numbers<[1], [0], [0], [1], [0, 0, 1, 1], [], []>} : vector<8x32xbf16>, vector<32x512xbf16>, vector<8x512xf32> -> vector<8x512xf32>
    %116 = arith.truncf %72 : vector<8x32xf32> to vector<8x32xbf16>
    %cst_60 = arith.constant dense<0.000000e+00> : vector<8x512xf32>
    %117 = tpu.matmul %116, %112, %cst_60 {dimension_numbers = #tpu.dot_dimension_numbers<[1], [0], [0], [1], [0, 0, 1, 1], [], []>} : vector<8x32xbf16>, vector<32x512xbf16>, vector<8x512xf32> -> vector<8x512xf32>
    %118 = arith.addf %115, %117 : vector<8x512xf32>
    %119 = vector.broadcast %114 : vector<1x512xf32> to vector<8x512xf32>
    %120 = arith.addf %118, %119 : vector<8x512xf32>
    %121 = vector.extract_strided_slice %120 {offsets = [0, 0], sizes = [8, 256], strides = [1, 1]} : vector<8x512xf32> to vector<8x256xf32>
    %cst_61 = arith.constant 5.000000e-01 : f32
    %122 = vector.broadcast %cst_61 : f32 to vector<8x256xf32>
    %123 = arith.mulf %122, %121 : vector<8x256xf32>
    %124 = math.tanh %123 : vector<8x256xf32>
    %cst_62 = arith.constant 5.000000e-01 : f32
    %125 = vector.broadcast %cst_62 : f32 to vector<8x256xf32>
    %126 = arith.mulf %125, %124 : vector<8x256xf32>
    %cst_63 = arith.constant 5.000000e-01 : f32
    %127 = vector.broadcast %cst_63 : f32 to vector<8x256xf32>
    %128 = arith.addf %127, %126 : vector<8x256xf32>
    %129 = vector.extract_strided_slice %128 {offsets = [0, 0], sizes = [8, 128], strides = [1, 1]} : vector<8x256xf32> to vector<8x128xf32>
    %130 = vector.extract_strided_slice %128 {offsets = [0, 128], sizes = [8, 128], strides = [1, 1]} : vector<8x256xf32> to vector<8x128xf32>
    %131 = vector.extract_strided_slice %120 {offsets = [0, 256], sizes = [8, 128], strides = [1, 1]} : vector<8x512xf32> to vector<8x128xf32>
    %132 = vector.extract_strided_slice %120 {offsets = [0, 384], sizes = [8, 128], strides = [1, 1]} : vector<8x512xf32> to vector<8x128xf32>
    %133 = arith.mulf %129, %132 : vector<8x128xf32>
    %134 = arith.addf %131, %133 : vector<8x128xf32>
    %135 = math.tanh %134 : vector<8x128xf32>
    %136 = vector.extract_strided_slice %130 {offsets = [0, 0], sizes = [8, 32], strides = [1, 1]} : vector<8x128xf32> to vector<8x32xf32>
    %cst_64 = arith.constant 1.000000e+00 : f32
    %137 = vector.broadcast %cst_64 : f32 to vector<8x32xf32>
    %138 = arith.subf %137, %136 : vector<8x32xf32>
    %139 = vector.extract_strided_slice %135 {offsets = [0, 0], sizes = [8, 32], strides = [1, 1]} : vector<8x128xf32> to vector<8x32xf32>
    %140 = arith.mulf %138, %139 : vector<8x32xf32>
    %141 = arith.mulf %136, %72 : vector<8x32xf32>
    %142 = arith.addf %140, %141 : vector<8x32xf32>
    %c0_65 = arith.constant 0 : index
    %c0_66 = arith.constant 0 : index
    %c0_67 = arith.constant 0 : index
    %143 = vector.load %arg2[%c0_65, %c0_66, %c0_67] : memref<2x32x512xbf16, #tpu.memory_space<vmem>>, vector<1x32x512xbf16>
    %144 = vector.shape_cast %143 : vector<1x32x512xbf16> to vector<32x512xbf16>
    %c1_68 = arith.constant 1 : index
    %c0_69 = arith.constant 0 : index
    %c0_70 = arith.constant 0 : index
    %145 = vector.load %arg3[%c1_68, %c0_69, %c0_70] : memref<3x32x512xbf16, #tpu.memory_space<vmem>>, vector<1x32x512xbf16>
    %146 = vector.shape_cast %145 : vector<1x32x512xbf16> to vector<32x512xbf16>
    %c1_71 = arith.constant 1 : index
    %c0_72 = arith.constant 0 : index
    %c0_73 = arith.constant 0 : index
    %147 = vector.load %arg4[%c1_71, %c0_72, %c0_73] : memref<3x1x512xf32, #tpu.memory_space<vmem>>, vector<1x1x512xf32>
    %148 = vector.shape_cast %147 : vector<1x1x512xf32> to vector<1x512xf32>
    %149 = arith.truncf %72 : vector<8x32xf32> to vector<8x32xbf16>
    %cst_74 = arith.constant dense<0.000000e+00> : vector<8x512xf32>
    %150 = tpu.matmul %149, %144, %cst_74 {dimension_numbers = #tpu.dot_dimension_numbers<[1], [0], [0], [1], [0, 0, 1, 1], [], []>} : vector<8x32xbf16>, vector<32x512xbf16>, vector<8x512xf32> -> vector<8x512xf32>
    %151 = arith.truncf %107 : vector<8x32xf32> to vector<8x32xbf16>
    %cst_75 = arith.constant dense<0.000000e+00> : vector<8x512xf32>
    %152 = tpu.matmul %151, %146, %cst_75 {dimension_numbers = #tpu.dot_dimension_numbers<[1], [0], [0], [1], [0, 0, 1, 1], [], []>} : vector<8x32xbf16>, vector<32x512xbf16>, vector<8x512xf32> -> vector<8x512xf32>
    %153 = arith.addf %150, %152 : vector<8x512xf32>
    %154 = vector.broadcast %148 : vector<1x512xf32> to vector<8x512xf32>
    %155 = arith.addf %153, %154 : vector<8x512xf32>
    %156 = vector.extract_strided_slice %155 {offsets = [0, 0], sizes = [8, 256], strides = [1, 1]} : vector<8x512xf32> to vector<8x256xf32>
    %cst_76 = arith.constant 5.000000e-01 : f32
    %157 = vector.broadcast %cst_76 : f32 to vector<8x256xf32>
    %158 = arith.mulf %157, %156 : vector<8x256xf32>
    %159 = math.tanh %158 : vector<8x256xf32>
    %cst_77 = arith.constant 5.000000e-01 : f32
    %160 = vector.broadcast %cst_77 : f32 to vector<8x256xf32>
    %161 = arith.mulf %160, %159 : vector<8x256xf32>
    %cst_78 = arith.constant 5.000000e-01 : f32
    %162 = vector.broadcast %cst_78 : f32 to vector<8x256xf32>
    %163 = arith.addf %162, %161 : vector<8x256xf32>
    %164 = vector.extract_strided_slice %163 {offsets = [0, 0], sizes = [8, 128], strides = [1, 1]} : vector<8x256xf32> to vector<8x128xf32>
    %165 = vector.extract_strided_slice %163 {offsets = [0, 128], sizes = [8, 128], strides = [1, 1]} : vector<8x256xf32> to vector<8x128xf32>
    %166 = vector.extract_strided_slice %155 {offsets = [0, 256], sizes = [8, 128], strides = [1, 1]} : vector<8x512xf32> to vector<8x128xf32>
    %167 = vector.extract_strided_slice %155 {offsets = [0, 384], sizes = [8, 128], strides = [1, 1]} : vector<8x512xf32> to vector<8x128xf32>
    %168 = arith.mulf %164, %167 : vector<8x128xf32>
    %169 = arith.addf %166, %168 : vector<8x128xf32>
    %170 = math.tanh %169 : vector<8x128xf32>
    %171 = vector.extract_strided_slice %165 {offsets = [0, 0], sizes = [8, 32], strides = [1, 1]} : vector<8x128xf32> to vector<8x32xf32>
    %cst_79 = arith.constant 1.000000e+00 : f32
    %172 = vector.broadcast %cst_79 : f32 to vector<8x32xf32>
    %173 = arith.subf %172, %171 : vector<8x32xf32>
    %174 = vector.extract_strided_slice %170 {offsets = [0, 0], sizes = [8, 32], strides = [1, 1]} : vector<8x128xf32> to vector<8x32xf32>
    %175 = arith.mulf %173, %174 : vector<8x32xf32>
    %176 = arith.mulf %171, %107 : vector<8x32xf32>
    %177 = arith.addf %175, %176 : vector<8x32xf32>
    %c1_80 = arith.constant 1 : index
    %c0_81 = arith.constant 0 : index
    %c0_82 = arith.constant 0 : index
    %178 = vector.load %arg2[%c1_80, %c0_81, %c0_82] : memref<2x32x512xbf16, #tpu.memory_space<vmem>>, vector<1x32x512xbf16>
    %179 = vector.shape_cast %178 : vector<1x32x512xbf16> to vector<32x512xbf16>
    %c2_83 = arith.constant 2 : index
    %c0_84 = arith.constant 0 : index
    %c0_85 = arith.constant 0 : index
    %180 = vector.load %arg3[%c2_83, %c0_84, %c0_85] : memref<3x32x512xbf16, #tpu.memory_space<vmem>>, vector<1x32x512xbf16>
    %181 = vector.shape_cast %180 : vector<1x32x512xbf16> to vector<32x512xbf16>
    %c2_86 = arith.constant 2 : index
    %c0_87 = arith.constant 0 : index
    %c0_88 = arith.constant 0 : index
    %182 = vector.load %arg4[%c2_86, %c0_87, %c0_88] : memref<3x1x512xf32, #tpu.memory_space<vmem>>, vector<1x1x512xf32>
    %183 = vector.shape_cast %182 : vector<1x1x512xf32> to vector<1x512xf32>
    %184 = arith.truncf %107 : vector<8x32xf32> to vector<8x32xbf16>
    %cst_89 = arith.constant dense<0.000000e+00> : vector<8x512xf32>
    %185 = tpu.matmul %184, %179, %cst_89 {dimension_numbers = #tpu.dot_dimension_numbers<[1], [0], [0], [1], [0, 0, 1, 1], [], []>} : vector<8x32xbf16>, vector<32x512xbf16>, vector<8x512xf32> -> vector<8x512xf32>
    %186 = arith.truncf %2 : vector<8x32xf32> to vector<8x32xbf16>
    %cst_90 = arith.constant dense<0.000000e+00> : vector<8x512xf32>
    %187 = tpu.matmul %186, %181, %cst_90 {dimension_numbers = #tpu.dot_dimension_numbers<[1], [0], [0], [1], [0, 0, 1, 1], [], []>} : vector<8x32xbf16>, vector<32x512xbf16>, vector<8x512xf32> -> vector<8x512xf32>
    %188 = arith.addf %185, %187 : vector<8x512xf32>
    %189 = vector.broadcast %183 : vector<1x512xf32> to vector<8x512xf32>
    %190 = arith.addf %188, %189 : vector<8x512xf32>
    %191 = vector.extract_strided_slice %190 {offsets = [0, 0], sizes = [8, 256], strides = [1, 1]} : vector<8x512xf32> to vector<8x256xf32>
    %cst_91 = arith.constant 5.000000e-01 : f32
    %192 = vector.broadcast %cst_91 : f32 to vector<8x256xf32>
    %193 = arith.mulf %192, %191 : vector<8x256xf32>
    %194 = math.tanh %193 : vector<8x256xf32>
    %cst_92 = arith.constant 5.000000e-01 : f32
    %195 = vector.broadcast %cst_92 : f32 to vector<8x256xf32>
    %196 = arith.mulf %195, %194 : vector<8x256xf32>
    %cst_93 = arith.constant 5.000000e-01 : f32
    %197 = vector.broadcast %cst_93 : f32 to vector<8x256xf32>
    %198 = arith.addf %197, %196 : vector<8x256xf32>
    %199 = vector.extract_strided_slice %198 {offsets = [0, 0], sizes = [8, 128], strides = [1, 1]} : vector<8x256xf32> to vector<8x128xf32>
    %200 = vector.extract_strided_slice %198 {offsets = [0, 128], sizes = [8, 128], strides = [1, 1]} : vector<8x256xf32> to vector<8x128xf32>
    %201 = vector.extract_strided_slice %190 {offsets = [0, 256], sizes = [8, 128], strides = [1, 1]} : vector<8x512xf32> to vector<8x128xf32>
    %202 = vector.extract_strided_slice %190 {offsets = [0, 384], sizes = [8, 128], strides = [1, 1]} : vector<8x512xf32> to vector<8x128xf32>
    %203 = arith.mulf %199, %202 : vector<8x128xf32>
    %204 = arith.addf %201, %203 : vector<8x128xf32>
    %205 = math.tanh %204 : vector<8x128xf32>
    %206 = vector.extract_strided_slice %200 {offsets = [0, 0], sizes = [8, 32], strides = [1, 1]} : vector<8x128xf32> to vector<8x32xf32>
    %cst_94 = arith.constant 1.000000e+00 : f32
    %207 = vector.broadcast %cst_94 : f32 to vector<8x32xf32>
    %208 = arith.subf %207, %206 : vector<8x32xf32>
    %209 = vector.extract_strided_slice %205 {offsets = [0, 0], sizes = [8, 32], strides = [1, 1]} : vector<8x128xf32> to vector<8x32xf32>
    %210 = arith.mulf %208, %209 : vector<8x32xf32>
    %211 = arith.mulf %206, %2 : vector<8x32xf32>
    %212 = arith.addf %210, %211 : vector<8x32xf32>
    %c0_95 = arith.constant 0 : index
    %c0_96 = arith.constant 0 : index
    %c0_97 = arith.constant 0 : index
    %213 = vector.load %arg5[%c0_95, %c0_96, %c0_97] : memref<8x8x32xf32, #tpu.memory_space<vmem>>, vector<1x8x32xf32>
    %214 = vector.shape_cast %213 : vector<1x8x32xf32> to vector<8x32xf32>
    %215 = vector.shape_cast %212 : vector<8x32xf32> to vector<1x8x32xf32>
    tpu.vector_store %arg5[%c0_95, %c0_96, %c0_97], %215 {strides = array<i32>} : memref<8x8x32xf32, #tpu.memory_space<vmem>>, vector<1x8x32xf32>,
    %c3 = arith.constant 3 : index
    %c0_98 = arith.constant 0 : index
    %c0_99 = arith.constant 0 : index
    %216 = vector.load %arg0[%c3, %c0_98, %c0_99] : memref<8x8x32xbf16, #tpu.memory_space<vmem>>, vector<1x8x32xbf16>
    %217 = vector.shape_cast %216 : vector<1x8x32xbf16> to vector<8x32xbf16>
    %c0_100 = arith.constant 0 : index
    %c0_101 = arith.constant 0 : index
    %218 = vector.load %arg1[%c0_100, %c0_101] : memref<32x512xbf16, #tpu.memory_space<vmem>>, vector<32x512xbf16>
    %c0_102 = arith.constant 0 : index
    %c0_103 = arith.constant 0 : index
    %c0_104 = arith.constant 0 : index
    %219 = vector.load %arg3[%c0_102, %c0_103, %c0_104] : memref<3x32x512xbf16, #tpu.memory_space<vmem>>, vector<1x32x512xbf16>
    %220 = vector.shape_cast %219 : vector<1x32x512xbf16> to vector<32x512xbf16>
    %c0_105 = arith.constant 0 : index
    %c0_106 = arith.constant 0 : index
    %c0_107 = arith.constant 0 : index
    %221 = vector.load %arg4[%c0_105, %c0_106, %c0_107] : memref<3x1x512xf32, #tpu.memory_space<vmem>>, vector<1x1x512xf32>
    %222 = vector.shape_cast %221 : vector<1x1x512xf32> to vector<1x512xf32>
    %cst_108 = arith.constant dense<0.000000e+00> : vector<8x512xf32>
    %223 = tpu.matmul %217, %218, %cst_108 {dimension_numbers = #tpu.dot_dimension_numbers<[1], [0], [0], [1], [0, 0, 1, 1], [], []>} : vector<8x32xbf16>, vector<32x512xbf16>, vector<8x512xf32> -> vector<8x512xf32>
    %224 = arith.truncf %142 : vector<8x32xf32> to vector<8x32xbf16>
    %cst_109 = arith.constant dense<0.000000e+00> : vector<8x512xf32>
    %225 = tpu.matmul %224, %220, %cst_109 {dimension_numbers = #tpu.dot_dimension_numbers<[1], [0], [0], [1], [0, 0, 1, 1], [], []>} : vector<8x32xbf16>, vector<32x512xbf16>, vector<8x512xf32> -> vector<8x512xf32>
    %226 = arith.addf %223, %225 : vector<8x512xf32>
    %227 = vector.broadcast %222 : vector<1x512xf32> to vector<8x512xf32>
    %228 = arith.addf %226, %227 : vector<8x512xf32>
    %229 = vector.extract_strided_slice %228 {offsets = [0, 0], sizes = [8, 256], strides = [1, 1]} : vector<8x512xf32> to vector<8x256xf32>
    %cst_110 = arith.constant 5.000000e-01 : f32
    %230 = vector.broadcast %cst_110 : f32 to vector<8x256xf32>
    %231 = arith.mulf %230, %229 : vector<8x256xf32>
    %232 = math.tanh %231 : vector<8x256xf32>
    %cst_111 = arith.constant 5.000000e-01 : f32
    %233 = vector.broadcast %cst_111 : f32 to vector<8x256xf32>
    %234 = arith.mulf %233, %232 : vector<8x256xf32>
    %cst_112 = arith.constant 5.000000e-01 : f32
    %235 = vector.broadcast %cst_112 : f32 to vector<8x256xf32>
    %236 = arith.addf %235, %234 : vector<8x256xf32>
    %237 = vector.extract_strided_slice %236 {offsets = [0, 0], sizes = [8, 128], strides = [1, 1]} : vector<8x256xf32> to vector<8x128xf32>
    %238 = vector.extract_strided_slice %236 {offsets = [0, 128], sizes = [8, 128], strides = [1, 1]} : vector<8x256xf32> to vector<8x128xf32>
    %239 = vector.extract_strided_slice %228 {offsets = [0, 256], sizes = [8, 128], strides = [1, 1]} : vector<8x512xf32> to vector<8x128xf32>
    %240 = vector.extract_strided_slice %228 {offsets = [0, 384], sizes = [8, 128], strides = [1, 1]} : vector<8x512xf32> to vector<8x128xf32>
    %241 = arith.mulf %237, %240 : vector<8x128xf32>
    %242 = arith.addf %239, %241 : vector<8x128xf32>
    %243 = math.tanh %242 : vector<8x128xf32>
    %244 = vector.extract_strided_slice %238 {offsets = [0, 0], sizes = [8, 32], strides = [1, 1]} : vector<8x128xf32> to vector<8x32xf32>
    %cst_113 = arith.constant 1.000000e+00 : f32
    %245 = vector.broadcast %cst_113 : f32 to vector<8x32xf32>
    %246 = arith.subf %245, %244 : vector<8x32xf32>
    %247 = vector.extract_strided_slice %243 {offsets = [0, 0], sizes = [8, 32], strides = [1, 1]} : vector<8x128xf32> to vector<8x32xf32>
    %248 = arith.mulf %246, %247 : vector<8x32xf32>
    %249 = arith.mulf %244, %142 : vector<8x32xf32>
    %250 = arith.addf %248, %249 : vector<8x32xf32>
    %c0_114 = arith.constant 0 : index
    %c0_115 = arith.constant 0 : index
    %c0_116 = arith.constant 0 : index
    %251 = vector.load %arg2[%c0_114, %c0_115, %c0_116] : memref<2x32x512xbf16, #tpu.memory_space<vmem>>, vector<1x32x512xbf16>
    %252 = vector.shape_cast %251 : vector<1x32x512xbf16> to vector<32x512xbf16>
    %c1_117 = arith.constant 1 : index
    %c0_118 = arith.constant 0 : index
    %c0_119 = arith.constant 0 : index
    %253 = vector.load %arg3[%c1_117, %c0_118, %c0_119] : memref<3x32x512xbf16, #tpu.memory_space<vmem>>, vector<1x32x512xbf16>
    %254 = vector.shape_cast %253 : vector<1x32x512xbf16> to vector<32x512xbf16>
    %c1_120 = arith.constant 1 : index
    %c0_121 = arith.constant 0 : index
    %c0_122 = arith.constant 0 : index
    %255 = vector.load %arg4[%c1_120, %c0_121, %c0_122] : memref<3x1x512xf32, #tpu.memory_space<vmem>>, vector<1x1x512xf32>
    %256 = vector.shape_cast %255 : vector<1x1x512xf32> to vector<1x512xf32>
    %257 = arith.truncf %142 : vector<8x32xf32> to vector<8x32xbf16>
    %cst_123 = arith.constant dense<0.000000e+00> : vector<8x512xf32>
    %258 = tpu.matmul %257, %252, %cst_123 {dimension_numbers = #tpu.dot_dimension_numbers<[1], [0], [0], [1], [0, 0, 1, 1], [], []>} : vector<8x32xbf16>, vector<32x512xbf16>, vector<8x512xf32> -> vector<8x512xf32>
    %259 = arith.truncf %177 : vector<8x32xf32> to vector<8x32xbf16>
    %cst_124 = arith.constant dense<0.000000e+00> : vector<8x512xf32>
    %260 = tpu.matmul %259, %254, %cst_124 {dimension_numbers = #tpu.dot_dimension_numbers<[1], [0], [0], [1], [0, 0, 1, 1], [], []>} : vector<8x32xbf16>, vector<32x512xbf16>, vector<8x512xf32> -> vector<8x512xf32>
    %261 = arith.addf %258, %260 : vector<8x512xf32>
    %262 = vector.broadcast %256 : vector<1x512xf32> to vector<8x512xf32>
    %263 = arith.addf %261, %262 : vector<8x512xf32>
    %264 = vector.extract_strided_slice %263 {offsets = [0, 0], sizes = [8, 256], strides = [1, 1]} : vector<8x512xf32> to vector<8x256xf32>
    %cst_125 = arith.constant 5.000000e-01 : f32
    %265 = vector.broadcast %cst_125 : f32 to vector<8x256xf32>
    %266 = arith.mulf %265, %264 : vector<8x256xf32>
    %267 = math.tanh %266 : vector<8x256xf32>
    %cst_126 = arith.constant 5.000000e-01 : f32
    %268 = vector.broadcast %cst_126 : f32 to vector<8x256xf32>
    %269 = arith.mulf %268, %267 : vector<8x256xf32>
    %cst_127 = arith.constant 5.000000e-01 : f32
    %270 = vector.broadcast %cst_127 : f32 to vector<8x256xf32>
    %271 = arith.addf %270, %269 : vector<8x256xf32>
    %272 = vector.extract_strided_slice %271 {offsets = [0, 0], sizes = [8, 128], strides = [1, 1]} : vector<8x256xf32> to vector<8x128xf32>
    %273 = vector.extract_strided_slice %271 {offsets = [0, 128], sizes = [8, 128], strides = [1, 1]} : vector<8x256xf32> to vector<8x128xf32>
    %274 = vector.extract_strided_slice %263 {offsets = [0, 256], sizes = [8, 128], strides = [1, 1]} : vector<8x512xf32> to vector<8x128xf32>
    %275 = vector.extract_strided_slice %263 {offsets = [0, 384], sizes = [8, 128], strides = [1, 1]} : vector<8x512xf32> to vector<8x128xf32>
    %276 = arith.mulf %272, %275 : vector<8x128xf32>
    %277 = arith.addf %274, %276 : vector<8x128xf32>
    %278 = math.tanh %277 : vector<8x128xf32>
    %279 = vector.extract_strided_slice %273 {offsets = [0, 0], sizes = [8, 32], strides = [1, 1]} : vector<8x128xf32> to vector<8x32xf32>
    %cst_128 = arith.constant 1.000000e+00 : f32
    %280 = vector.broadcast %cst_128 : f32 to vector<8x32xf32>
    %281 = arith.subf %280, %279 : vector<8x32xf32>
    %282 = vector.extract_strided_slice %278 {offsets = [0, 0], sizes = [8, 32], strides = [1, 1]} : vector<8x128xf32> to vector<8x32xf32>
    %283 = arith.mulf %281, %282 : vector<8x32xf32>
    %284 = arith.mulf %279, %177 : vector<8x32xf32>
    %285 = arith.addf %283, %284 : vector<8x32xf32>
    %c1_129 = arith.constant 1 : index
    %c0_130 = arith.constant 0 : index
    %c0_131 = arith.constant 0 : index
    %286 = vector.load %arg2[%c1_129, %c0_130, %c0_131] : memref<2x32x512xbf16, #tpu.memory_space<vmem>>, vector<1x32x512xbf16>
    %287 = vector.shape_cast %286 : vector<1x32x512xbf16> to vector<32x512xbf16>
    %c2_132 = arith.constant 2 : index
    %c0_133 = arith.constant 0 : index
    %c0_134 = arith.constant 0 : index
    %288 = vector.load %arg3[%c2_132, %c0_133, %c0_134] : memref<3x32x512xbf16, #tpu.memory_space<vmem>>, vector<1x32x512xbf16>
    %289 = vector.shape_cast %288 : vector<1x32x512xbf16> to vector<32x512xbf16>
    %c2_135 = arith.constant 2 : index
    %c0_136 = arith.constant 0 : index
    %c0_137 = arith.constant 0 : index
    %290 = vector.load %arg4[%c2_135, %c0_136, %c0_137] : memref<3x1x512xf32, #tpu.memory_space<vmem>>, vector<1x1x512xf32>
    %291 = vector.shape_cast %290 : vector<1x1x512xf32> to vector<1x512xf32>
    %292 = arith.truncf %177 : vector<8x32xf32> to vector<8x32xbf16>
    %cst_138 = arith.constant dense<0.000000e+00> : vector<8x512xf32>
    %293 = tpu.matmul %292, %287, %cst_138 {dimension_numbers = #tpu.dot_dimension_numbers<[1], [0], [0], [1], [0, 0, 1, 1], [], []>} : vector<8x32xbf16>, vector<32x512xbf16>, vector<8x512xf32> -> vector<8x512xf32>
    %294 = arith.truncf %212 : vector<8x32xf32> to vector<8x32xbf16>
    %cst_139 = arith.constant dense<0.000000e+00> : vector<8x512xf32>
    %295 = tpu.matmul %294, %289, %cst_139 {dimension_numbers = #tpu.dot_dimension_numbers<[1], [0], [0], [1], [0, 0, 1, 1], [], []>} : vector<8x32xbf16>, vector<32x512xbf16>, vector<8x512xf32> -> vector<8x512xf32>
    %296 = arith.addf %293, %295 : vector<8x512xf32>
    %297 = vector.broadcast %291 : vector<1x512xf32> to vector<8x512xf32>
    %298 = arith.addf %296, %297 : vector<8x512xf32>
    %299 = vector.extract_strided_slice %298 {offsets = [0, 0], sizes = [8, 256], strides = [1, 1]} : vector<8x512xf32> to vector<8x256xf32>
    %cst_140 = arith.constant 5.000000e-01 : f32
    %300 = vector.broadcast %cst_140 : f32 to vector<8x256xf32>
    %301 = arith.mulf %300, %299 : vector<8x256xf32>
    %302 = math.tanh %301 : vector<8x256xf32>
    %cst_141 = arith.constant 5.000000e-01 : f32
    %303 = vector.broadcast %cst_141 : f32 to vector<8x256xf32>
    %304 = arith.mulf %303, %302 : vector<8x256xf32>
    %cst_142 = arith.constant 5.000000e-01 : f32
    %305 = vector.broadcast %cst_142 : f32 to vector<8x256xf32>
    %306 = arith.addf %305, %304 : vector<8x256xf32>
    %307 = vector.extract_strided_slice %306 {offsets = [0, 0], sizes = [8, 128], strides = [1, 1]} : vector<8x256xf32> to vector<8x128xf32>
    %308 = vector.extract_strided_slice %306 {offsets = [0, 128], sizes = [8, 128], strides = [1, 1]} : vector<8x256xf32> to vector<8x128xf32>
    %309 = vector.extract_strided_slice %298 {offsets = [0, 256], sizes = [8, 128], strides = [1, 1]} : vector<8x512xf32> to vector<8x128xf32>
    %310 = vector.extract_strided_slice %298 {offsets = [0, 384], sizes = [8, 128], strides = [1, 1]} : vector<8x512xf32> to vector<8x128xf32>
    %311 = arith.mulf %307, %310 : vector<8x128xf32>
    %312 = arith.addf %309, %311 : vector<8x128xf32>
    %313 = math.tanh %312 : vector<8x128xf32>
    %314 = vector.extract_strided_slice %308 {offsets = [0, 0], sizes = [8, 32], strides = [1, 1]} : vector<8x128xf32> to vector<8x32xf32>
    %cst_143 = arith.constant 1.000000e+00 : f32
    %315 = vector.broadcast %cst_143 : f32 to vector<8x32xf32>
    %316 = arith.subf %315, %314 : vector<8x32xf32>
    %317 = vector.extract_strided_slice %313 {offsets = [0, 0], sizes = [8, 32], strides = [1, 1]} : vector<8x128xf32> to vector<8x32xf32>
    %318 = arith.mulf %316, %317 : vector<8x32xf32>
    %319 = arith.mulf %314, %212 : vector<8x32xf32>
    %320 = arith.addf %318, %319 : vector<8x32xf32>
    %c1_144 = arith.constant 1 : index
    %c0_145 = arith.constant 0 : index
    %c0_146 = arith.constant 0 : index
    %321 = vector.load %arg5[%c1_144, %c0_145, %c0_146] : memref<8x8x32xf32, #tpu.memory_space<vmem>>, vector<1x8x32xf32>
    %322 = vector.shape_cast %321 : vector<1x8x32xf32> to vector<8x32xf32>
    %323 = vector.shape_cast %320 : vector<8x32xf32> to vector<1x8x32xf32>
    tpu.vector_store %arg5[%c1_144, %c0_145, %c0_146], %323 {strides = array<i32>} : memref<8x8x32xf32, #tpu.memory_space<vmem>>, vector<1x8x32xf32>,
    %c4 = arith.constant 4 : index
    %c0_147 = arith.constant 0 : index
    %c0_148 = arith.constant 0 : index
    %324 = vector.load %arg0[%c4, %c0_147, %c0_148] : memref<8x8x32xbf16, #tpu.memory_space<vmem>>, vector<1x8x32xbf16>
    %325 = vector.shape_cast %324 : vector<1x8x32xbf16> to vector<8x32xbf16>
    %c0_149 = arith.constant 0 : index
    %c0_150 = arith.constant 0 : index
    %326 = vector.load %arg1[%c0_149, %c0_150] : memref<32x512xbf16, #tpu.memory_space<vmem>>, vector<32x512xbf16>
    %c0_151 = arith.constant 0 : index
    %c0_152 = arith.constant 0 : index
    %c0_153 = arith.constant 0 : index
    %327 = vector.load %arg3[%c0_151, %c0_152, %c0_153] : memref<3x32x512xbf16, #tpu.memory_space<vmem>>, vector<1x32x512xbf16>
    %328 = vector.shape_cast %327 : vector<1x32x512xbf16> to vector<32x512xbf16>
    %c0_154 = arith.constant 0 : index
    %c0_155 = arith.constant 0 : index
    %c0_156 = arith.constant 0 : index
    %329 = vector.load %arg4[%c0_154, %c0_155, %c0_156] : memref<3x1x512xf32, #tpu.memory_space<vmem>>, vector<1x1x512xf32>
    %330 = vector.shape_cast %329 : vector<1x1x512xf32> to vector<1x512xf32>
    %cst_157 = arith.constant dense<0.000000e+00> : vector<8x512xf32>
    %331 = tpu.matmul %325, %326, %cst_157 {dimension_numbers = #tpu.dot_dimension_numbers<[1], [0], [0], [1], [0, 0, 1, 1], [], []>} : vector<8x32xbf16>, vector<32x512xbf16>, vector<8x512xf32> -> vector<8x512xf32>
    %332 = arith.truncf %250 : vector<8x32xf32> to vector<8x32xbf16>
    %cst_158 = arith.constant dense<0.000000e+00> : vector<8x512xf32>
    %333 = tpu.matmul %332, %328, %cst_158 {dimension_numbers = #tpu.dot_dimension_numbers<[1], [0], [0], [1], [0, 0, 1, 1], [], []>} : vector<8x32xbf16>, vector<32x512xbf16>, vector<8x512xf32> -> vector<8x512xf32>
    %334 = arith.addf %331, %333 : vector<8x512xf32>
    %335 = vector.broadcast %330 : vector<1x512xf32> to vector<8x512xf32>
    %336 = arith.addf %334, %335 : vector<8x512xf32>
    %337 = vector.extract_strided_slice %336 {offsets = [0, 0], sizes = [8, 256], strides = [1, 1]} : vector<8x512xf32> to vector<8x256xf32>
    %cst_159 = arith.constant 5.000000e-01 : f32
    %338 = vector.broadcast %cst_159 : f32 to vector<8x256xf32>
    %339 = arith.mulf %338, %337 : vector<8x256xf32>
    %340 = math.tanh %339 : vector<8x256xf32>
    %cst_160 = arith.constant 5.000000e-01 : f32
    %341 = vector.broadcast %cst_160 : f32 to vector<8x256xf32>
    %342 = arith.mulf %341, %340 : vector<8x256xf32>
    %cst_161 = arith.constant 5.000000e-01 : f32
    %343 = vector.broadcast %cst_161 : f32 to vector<8x256xf32>
    %344 = arith.addf %343, %342 : vector<8x256xf32>
    %345 = vector.extract_strided_slice %344 {offsets = [0, 0], sizes = [8, 128], strides = [1, 1]} : vector<8x256xf32> to vector<8x128xf32>
    %346 = vector.extract_strided_slice %344 {offsets = [0, 128], sizes = [8, 128], strides = [1, 1]} : vector<8x256xf32> to vector<8x128xf32>
    %347 = vector.extract_strided_slice %336 {offsets = [0, 256], sizes = [8, 128], strides = [1, 1]} : vector<8x512xf32> to vector<8x128xf32>
    %348 = vector.extract_strided_slice %336 {offsets = [0, 384], sizes = [8, 128], strides = [1, 1]} : vector<8x512xf32> to vector<8x128xf32>
    %349 = arith.mulf %345, %348 : vector<8x128xf32>
    %350 = arith.addf %347, %349 : vector<8x128xf32>
    %351 = math.tanh %350 : vector<8x128xf32>
    %352 = vector.extract_strided_slice %346 {offsets = [0, 0], sizes = [8, 32], strides = [1, 1]} : vector<8x128xf32> to vector<8x32xf32>
    %cst_162 = arith.constant 1.000000e+00 : f32
    %353 = vector.broadcast %cst_162 : f32 to vector<8x32xf32>
    %354 = arith.subf %353, %352 : vector<8x32xf32>
    %355 = vector.extract_strided_slice %351 {offsets = [0, 0], sizes = [8, 32], strides = [1, 1]} : vector<8x128xf32> to vector<8x32xf32>
    %356 = arith.mulf %354, %355 : vector<8x32xf32>
    %357 = arith.mulf %352, %250 : vector<8x32xf32>
    %358 = arith.addf %356, %357 : vector<8x32xf32>
    %c0_163 = arith.constant 0 : index
    %c0_164 = arith.constant 0 : index
    %c0_165 = arith.constant 0 : index
    %359 = vector.load %arg2[%c0_163, %c0_164, %c0_165] : memref<2x32x512xbf16, #tpu.memory_space<vmem>>, vector<1x32x512xbf16>
    %360 = vector.shape_cast %359 : vector<1x32x512xbf16> to vector<32x512xbf16>
    %c1_166 = arith.constant 1 : index
    %c0_167 = arith.constant 0 : index
    %c0_168 = arith.constant 0 : index
    %361 = vector.load %arg3[%c1_166, %c0_167, %c0_168] : memref<3x32x512xbf16, #tpu.memory_space<vmem>>, vector<1x32x512xbf16>
    %362 = vector.shape_cast %361 : vector<1x32x512xbf16> to vector<32x512xbf16>
    %c1_169 = arith.constant 1 : index
    %c0_170 = arith.constant 0 : index
    %c0_171 = arith.constant 0 : index
    %363 = vector.load %arg4[%c1_169, %c0_170, %c0_171] : memref<3x1x512xf32, #tpu.memory_space<vmem>>, vector<1x1x512xf32>
    %364 = vector.shape_cast %363 : vector<1x1x512xf32> to vector<1x512xf32>
    %365 = arith.truncf %250 : vector<8x32xf32> to vector<8x32xbf16>
    %cst_172 = arith.constant dense<0.000000e+00> : vector<8x512xf32>
    %366 = tpu.matmul %365, %360, %cst_172 {dimension_numbers = #tpu.dot_dimension_numbers<[1], [0], [0], [1], [0, 0, 1, 1], [], []>} : vector<8x32xbf16>, vector<32x512xbf16>, vector<8x512xf32> -> vector<8x512xf32>
    %367 = arith.truncf %285 : vector<8x32xf32> to vector<8x32xbf16>
    %cst_173 = arith.constant dense<0.000000e+00> : vector<8x512xf32>
    %368 = tpu.matmul %367, %362, %cst_173 {dimension_numbers = #tpu.dot_dimension_numbers<[1], [0], [0], [1], [0, 0, 1, 1], [], []>} : vector<8x32xbf16>, vector<32x512xbf16>, vector<8x512xf32> -> vector<8x512xf32>
    %369 = arith.addf %366, %368 : vector<8x512xf32>
    %370 = vector.broadcast %364 : vector<1x512xf32> to vector<8x512xf32>
    %371 = arith.addf %369, %370 : vector<8x512xf32>
    %372 = vector.extract_strided_slice %371 {offsets = [0, 0], sizes = [8, 256], strides = [1, 1]} : vector<8x512xf32> to vector<8x256xf32>
    %cst_174 = arith.constant 5.000000e-01 : f32
    %373 = vector.broadcast %cst_174 : f32 to vector<8x256xf32>
    %374 = arith.mulf %373, %372 : vector<8x256xf32>
    %375 = math.tanh %374 : vector<8x256xf32>
    %cst_175 = arith.constant 5.000000e-01 : f32
    %376 = vector.broadcast %cst_175 : f32 to vector<8x256xf32>
    %377 = arith.mulf %376, %375 : vector<8x256xf32>
    %cst_176 = arith.constant 5.000000e-01 : f32
    %378 = vector.broadcast %cst_176 : f32 to vector<8x256xf32>
    %379 = arith.addf %378, %377 : vector<8x256xf32>
    %380 = vector.extract_strided_slice %379 {offsets = [0, 0], sizes = [8, 128], strides = [1, 1]} : vector<8x256xf32> to vector<8x128xf32>
    %381 = vector.extract_strided_slice %379 {offsets = [0, 128], sizes = [8, 128], strides = [1, 1]} : vector<8x256xf32> to vector<8x128xf32>
    %382 = vector.extract_strided_slice %371 {offsets = [0, 256], sizes = [8, 128], strides = [1, 1]} : vector<8x512xf32> to vector<8x128xf32>
    %383 = vector.extract_strided_slice %371 {offsets = [0, 384], sizes = [8, 128], strides = [1, 1]} : vector<8x512xf32> to vector<8x128xf32>
    %384 = arith.mulf %380, %383 : vector<8x128xf32>
    %385 = arith.addf %382, %384 : vector<8x128xf32>
    %386 = math.tanh %385 : vector<8x128xf32>
    %387 = vector.extract_strided_slice %381 {offsets = [0, 0], sizes = [8, 32], strides = [1, 1]} : vector<8x128xf32> to vector<8x32xf32>
    %cst_177 = arith.constant 1.000000e+00 : f32
    %388 = vector.broadcast %cst_177 : f32 to vector<8x32xf32>
    %389 = arith.subf %388, %387 : vector<8x32xf32>
    %390 = vector.extract_strided_slice %386 {offsets = [0, 0], sizes = [8, 32], strides = [1, 1]} : vector<8x128xf32> to vector<8x32xf32>
    %391 = arith.mulf %389, %390 : vector<8x32xf32>
    %392 = arith.mulf %387, %285 : vector<8x32xf32>
    %393 = arith.addf %391, %392 : vector<8x32xf32>
    %c1_178 = arith.constant 1 : index
    %c0_179 = arith.constant 0 : index
    %c0_180 = arith.constant 0 : index
    %394 = vector.load %arg2[%c1_178, %c0_179, %c0_180] : memref<2x32x512xbf16, #tpu.memory_space<vmem>>, vector<1x32x512xbf16>
    %395 = vector.shape_cast %394 : vector<1x32x512xbf16> to vector<32x512xbf16>
    %c2_181 = arith.constant 2 : index
    %c0_182 = arith.constant 0 : index
    %c0_183 = arith.constant 0 : index
    %396 = vector.load %arg3[%c2_181, %c0_182, %c0_183] : memref<3x32x512xbf16, #tpu.memory_space<vmem>>, vector<1x32x512xbf16>
    %397 = vector.shape_cast %396 : vector<1x32x512xbf16> to vector<32x512xbf16>
    %c2_184 = arith.constant 2 : index
    %c0_185 = arith.constant 0 : index
    %c0_186 = arith.constant 0 : index
    %398 = vector.load %arg4[%c2_184, %c0_185, %c0_186] : memref<3x1x512xf32, #tpu.memory_space<vmem>>, vector<1x1x512xf32>
    %399 = vector.shape_cast %398 : vector<1x1x512xf32> to vector<1x512xf32>
    %400 = arith.truncf %285 : vector<8x32xf32> to vector<8x32xbf16>
    %cst_187 = arith.constant dense<0.000000e+00> : vector<8x512xf32>
    %401 = tpu.matmul %400, %395, %cst_187 {dimension_numbers = #tpu.dot_dimension_numbers<[1], [0], [0], [1], [0, 0, 1, 1], [], []>} : vector<8x32xbf16>, vector<32x512xbf16>, vector<8x512xf32> -> vector<8x512xf32>
    %402 = arith.truncf %320 : vector<8x32xf32> to vector<8x32xbf16>
    %cst_188 = arith.constant dense<0.000000e+00> : vector<8x512xf32>
    %403 = tpu.matmul %402, %397, %cst_188 {dimension_numbers = #tpu.dot_dimension_numbers<[1], [0], [0], [1], [0, 0, 1, 1], [], []>} : vector<8x32xbf16>, vector<32x512xbf16>, vector<8x512xf32> -> vector<8x512xf32>
    %404 = arith.addf %401, %403 : vector<8x512xf32>
    %405 = vector.broadcast %399 : vector<1x512xf32> to vector<8x512xf32>
    %406 = arith.addf %404, %405 : vector<8x512xf32>
    %407 = vector.extract_strided_slice %406 {offsets = [0, 0], sizes = [8, 256], strides = [1, 1]} : vector<8x512xf32> to vector<8x256xf32>
    %cst_189 = arith.constant 5.000000e-01 : f32
    %408 = vector.broadcast %cst_189 : f32 to vector<8x256xf32>
    %409 = arith.mulf %408, %407 : vector<8x256xf32>
    %410 = math.tanh %409 : vector<8x256xf32>
    %cst_190 = arith.constant 5.000000e-01 : f32
    %411 = vector.broadcast %cst_190 : f32 to vector<8x256xf32>
    %412 = arith.mulf %411, %410 : vector<8x256xf32>
    %cst_191 = arith.constant 5.000000e-01 : f32
    %413 = vector.broadcast %cst_191 : f32 to vector<8x256xf32>
    %414 = arith.addf %413, %412 : vector<8x256xf32>
    %415 = vector.extract_strided_slice %414 {offsets = [0, 0], sizes = [8, 128], strides = [1, 1]} : vector<8x256xf32> to vector<8x128xf32>
    %416 = vector.extract_strided_slice %414 {offsets = [0, 128], sizes = [8, 128], strides = [1, 1]} : vector<8x256xf32> to vector<8x128xf32>
    %417 = vector.extract_strided_slice %406 {offsets = [0, 256], sizes = [8, 128], strides = [1, 1]} : vector<8x512xf32> to vector<8x128xf32>
    %418 = vector.extract_strided_slice %406 {offsets = [0, 384], sizes = [8, 128], strides = [1, 1]} : vector<8x512xf32> to vector<8x128xf32>
    %419 = arith.mulf %415, %418 : vector<8x128xf32>
    %420 = arith.addf %417, %419 : vector<8x128xf32>
    %421 = math.tanh %420 : vector<8x128xf32>
    %422 = vector.extract_strided_slice %416 {offsets = [0, 0], sizes = [8, 32], strides = [1, 1]} : vector<8x128xf32> to vector<8x32xf32>
    %cst_192 = arith.constant 1.000000e+00 : f32
    %423 = vector.broadcast %cst_192 : f32 to vector<8x32xf32>
    %424 = arith.subf %423, %422 : vector<8x32xf32>
    %425 = vector.extract_strided_slice %421 {offsets = [0, 0], sizes = [8, 32], strides = [1, 1]} : vector<8x128xf32> to vector<8x32xf32>
    %426 = arith.mulf %424, %425 : vector<8x32xf32>
    %427 = arith.mulf %422, %320 : vector<8x32xf32>
    %428 = arith.addf %426, %427 : vector<8x32xf32>
    %c2_193 = arith.constant 2 : index
    %c0_194 = arith.constant 0 : index
    %c0_195 = arith.constant 0 : index
    %429 = vector.load %arg5[%c2_193, %c0_194, %c0_195] : memref<8x8x32xf32, #tpu.memory_space<vmem>>, vector<1x8x32xf32>
    %430 = vector.shape_cast %429 : vector<1x8x32xf32> to vector<8x32xf32>
    %431 = vector.shape_cast %428 : vector<8x32xf32> to vector<1x8x32xf32>
    tpu.vector_store %arg5[%c2_193, %c0_194, %c0_195], %431 {strides = array<i32>} : memref<8x8x32xf32, #tpu.memory_space<vmem>>, vector<1x8x32xf32>,
    %c5 = arith.constant 5 : index
    %c0_196 = arith.constant 0 : index
    %c0_197 = arith.constant 0 : index
    %432 = vector.load %arg0[%c5, %c0_196, %c0_197] : memref<8x8x32xbf16, #tpu.memory_space<vmem>>, vector<1x8x32xbf16>
    %433 = vector.shape_cast %432 : vector<1x8x32xbf16> to vector<8x32xbf16>
    %c0_198 = arith.constant 0 : index
    %c0_199 = arith.constant 0 : index
    %434 = vector.load %arg1[%c0_198, %c0_199] : memref<32x512xbf16, #tpu.memory_space<vmem>>, vector<32x512xbf16>
    %c0_200 = arith.constant 0 : index
    %c0_201 = arith.constant 0 : index
    %c0_202 = arith.constant 0 : index
    %435 = vector.load %arg3[%c0_200, %c0_201, %c0_202] : memref<3x32x512xbf16, #tpu.memory_space<vmem>>, vector<1x32x512xbf16>
    %436 = vector.shape_cast %435 : vector<1x32x512xbf16> to vector<32x512xbf16>
    %c0_203 = arith.constant 0 : index
    %c0_204 = arith.constant 0 : index
    %c0_205 = arith.constant 0 : index
    %437 = vector.load %arg4[%c0_203, %c0_204, %c0_205] : memref<3x1x512xf32, #tpu.memory_space<vmem>>, vector<1x1x512xf32>
    %438 = vector.shape_cast %437 : vector<1x1x512xf32> to vector<1x512xf32>
    %cst_206 = arith.constant dense<0.000000e+00> : vector<8x512xf32>
    %439 = tpu.matmul %433, %434, %cst_206 {dimension_numbers = #tpu.dot_dimension_numbers<[1], [0], [0], [1], [0, 0, 1, 1], [], []>} : vector<8x32xbf16>, vector<32x512xbf16>, vector<8x512xf32> -> vector<8x512xf32>
    %440 = arith.truncf %358 : vector<8x32xf32> to vector<8x32xbf16>
    %cst_207 = arith.constant dense<0.000000e+00> : vector<8x512xf32>
    %441 = tpu.matmul %440, %436, %cst_207 {dimension_numbers = #tpu.dot_dimension_numbers<[1], [0], [0], [1], [0, 0, 1, 1], [], []>} : vector<8x32xbf16>, vector<32x512xbf16>, vector<8x512xf32> -> vector<8x512xf32>
    %442 = arith.addf %439, %441 : vector<8x512xf32>
    %443 = vector.broadcast %438 : vector<1x512xf32> to vector<8x512xf32>
    %444 = arith.addf %442, %443 : vector<8x512xf32>
    %445 = vector.extract_strided_slice %444 {offsets = [0, 0], sizes = [8, 256], strides = [1, 1]} : vector<8x512xf32> to vector<8x256xf32>
    %cst_208 = arith.constant 5.000000e-01 : f32
    %446 = vector.broadcast %cst_208 : f32 to vector<8x256xf32>
    %447 = arith.mulf %446, %445 : vector<8x256xf32>
    %448 = math.tanh %447 : vector<8x256xf32>
    %cst_209 = arith.constant 5.000000e-01 : f32
    %449 = vector.broadcast %cst_209 : f32 to vector<8x256xf32>
    %450 = arith.mulf %449, %448 : vector<8x256xf32>
    %cst_210 = arith.constant 5.000000e-01 : f32
    %451 = vector.broadcast %cst_210 : f32 to vector<8x256xf32>
    %452 = arith.addf %451, %450 : vector<8x256xf32>
    %453 = vector.extract_strided_slice %452 {offsets = [0, 0], sizes = [8, 128], strides = [1, 1]} : vector<8x256xf32> to vector<8x128xf32>
    %454 = vector.extract_strided_slice %452 {offsets = [0, 128], sizes = [8, 128], strides = [1, 1]} : vector<8x256xf32> to vector<8x128xf32>
    %455 = vector.extract_strided_slice %444 {offsets = [0, 256], sizes = [8, 128], strides = [1, 1]} : vector<8x512xf32> to vector<8x128xf32>
    %456 = vector.extract_strided_slice %444 {offsets = [0, 384], sizes = [8, 128], strides = [1, 1]} : vector<8x512xf32> to vector<8x128xf32>
    %457 = arith.mulf %453, %456 : vector<8x128xf32>
    %458 = arith.addf %455, %457 : vector<8x128xf32>
    %459 = math.tanh %458 : vector<8x128xf32>
    %460 = vector.extract_strided_slice %454 {offsets = [0, 0], sizes = [8, 32], strides = [1, 1]} : vector<8x128xf32> to vector<8x32xf32>
    %cst_211 = arith.constant 1.000000e+00 : f32
    %461 = vector.broadcast %cst_211 : f32 to vector<8x32xf32>
    %462 = arith.subf %461, %460 : vector<8x32xf32>
    %463 = vector.extract_strided_slice %459 {offsets = [0, 0], sizes = [8, 32], strides = [1, 1]} : vector<8x128xf32> to vector<8x32xf32>
    %464 = arith.mulf %462, %463 : vector<8x32xf32>
    %465 = arith.mulf %460, %358 : vector<8x32xf32>
    %466 = arith.addf %464, %465 : vector<8x32xf32>
    %c0_212 = arith.constant 0 : index
    %c0_213 = arith.constant 0 : index
    %c0_214 = arith.constant 0 : index
    %467 = vector.load %arg2[%c0_212, %c0_213, %c0_214] : memref<2x32x512xbf16, #tpu.memory_space<vmem>>, vector<1x32x512xbf16>
    %468 = vector.shape_cast %467 : vector<1x32x512xbf16> to vector<32x512xbf16>
    %c1_215 = arith.constant 1 : index
    %c0_216 = arith.constant 0 : index
    %c0_217 = arith.constant 0 : index
    %469 = vector.load %arg3[%c1_215, %c0_216, %c0_217] : memref<3x32x512xbf16, #tpu.memory_space<vmem>>, vector<1x32x512xbf16>
    %470 = vector.shape_cast %469 : vector<1x32x512xbf16> to vector<32x512xbf16>
    %c1_218 = arith.constant 1 : index
    %c0_219 = arith.constant 0 : index
    %c0_220 = arith.constant 0 : index
    %471 = vector.load %arg4[%c1_218, %c0_219, %c0_220] : memref<3x1x512xf32, #tpu.memory_space<vmem>>, vector<1x1x512xf32>
    %472 = vector.shape_cast %471 : vector<1x1x512xf32> to vector<1x512xf32>
    %473 = arith.truncf %358 : vector<8x32xf32> to vector<8x32xbf16>
    %cst_221 = arith.constant dense<0.000000e+00> : vector<8x512xf32>
    %474 = tpu.matmul %473, %468, %cst_221 {dimension_numbers = #tpu.dot_dimension_numbers<[1], [0], [0], [1], [0, 0, 1, 1], [], []>} : vector<8x32xbf16>, vector<32x512xbf16>, vector<8x512xf32> -> vector<8x512xf32>
    %475 = arith.truncf %393 : vector<8x32xf32> to vector<8x32xbf16>
    %cst_222 = arith.constant dense<0.000000e+00> : vector<8x512xf32>
    %476 = tpu.matmul %475, %470, %cst_222 {dimension_numbers = #tpu.dot_dimension_numbers<[1], [0], [0], [1], [0, 0, 1, 1], [], []>} : vector<8x32xbf16>, vector<32x512xbf16>, vector<8x512xf32> -> vector<8x512xf32>
    %477 = arith.addf %474, %476 : vector<8x512xf32>
    %478 = vector.broadcast %472 : vector<1x512xf32> to vector<8x512xf32>
    %479 = arith.addf %477, %478 : vector<8x512xf32>
    %480 = vector.extract_strided_slice %479 {offsets = [0, 0], sizes = [8, 256], strides = [1, 1]} : vector<8x512xf32> to vector<8x256xf32>
    %cst_223 = arith.constant 5.000000e-01 : f32
    %481 = vector.broadcast %cst_223 : f32 to vector<8x256xf32>
    %482 = arith.mulf %481, %480 : vector<8x256xf32>
    %483 = math.tanh %482 : vector<8x256xf32>
    %cst_224 = arith.constant 5.000000e-01 : f32
    %484 = vector.broadcast %cst_224 : f32 to vector<8x256xf32>
    %485 = arith.mulf %484, %483 : vector<8x256xf32>
    %cst_225 = arith.constant 5.000000e-01 : f32
    %486 = vector.broadcast %cst_225 : f32 to vector<8x256xf32>
    %487 = arith.addf %486, %485 : vector<8x256xf32>
    %488 = vector.extract_strided_slice %487 {offsets = [0, 0], sizes = [8, 128], strides = [1, 1]} : vector<8x256xf32> to vector<8x128xf32>
    %489 = vector.extract_strided_slice %487 {offsets = [0, 128], sizes = [8, 128], strides = [1, 1]} : vector<8x256xf32> to vector<8x128xf32>
    %490 = vector.extract_strided_slice %479 {offsets = [0, 256], sizes = [8, 128], strides = [1, 1]} : vector<8x512xf32> to vector<8x128xf32>
    %491 = vector.extract_strided_slice %479 {offsets = [0, 384], sizes = [8, 128], strides = [1, 1]} : vector<8x512xf32> to vector<8x128xf32>
    %492 = arith.mulf %488, %491 : vector<8x128xf32>
    %493 = arith.addf %490, %492 : vector<8x128xf32>
    %494 = math.tanh %493 : vector<8x128xf32>
    %495 = vector.extract_strided_slice %489 {offsets = [0, 0], sizes = [8, 32], strides = [1, 1]} : vector<8x128xf32> to vector<8x32xf32>
    %cst_226 = arith.constant 1.000000e+00 : f32
    %496 = vector.broadcast %cst_226 : f32 to vector<8x32xf32>
    %497 = arith.subf %496, %495 : vector<8x32xf32>
    %498 = vector.extract_strided_slice %494 {offsets = [0, 0], sizes = [8, 32], strides = [1, 1]} : vector<8x128xf32> to vector<8x32xf32>
    %499 = arith.mulf %497, %498 : vector<8x32xf32>
    %500 = arith.mulf %495, %393 : vector<8x32xf32>
    %501 = arith.addf %499, %500 : vector<8x32xf32>
    %c1_227 = arith.constant 1 : index
    %c0_228 = arith.constant 0 : index
    %c0_229 = arith.constant 0 : index
    %502 = vector.load %arg2[%c1_227, %c0_228, %c0_229] : memref<2x32x512xbf16, #tpu.memory_space<vmem>>, vector<1x32x512xbf16>
    %503 = vector.shape_cast %502 : vector<1x32x512xbf16> to vector<32x512xbf16>
    %c2_230 = arith.constant 2 : index
    %c0_231 = arith.constant 0 : index
    %c0_232 = arith.constant 0 : index
    %504 = vector.load %arg3[%c2_230, %c0_231, %c0_232] : memref<3x32x512xbf16, #tpu.memory_space<vmem>>, vector<1x32x512xbf16>
    %505 = vector.shape_cast %504 : vector<1x32x512xbf16> to vector<32x512xbf16>
    %c2_233 = arith.constant 2 : index
    %c0_234 = arith.constant 0 : index
    %c0_235 = arith.constant 0 : index
    %506 = vector.load %arg4[%c2_233, %c0_234, %c0_235] : memref<3x1x512xf32, #tpu.memory_space<vmem>>, vector<1x1x512xf32>
    %507 = vector.shape_cast %506 : vector<1x1x512xf32> to vector<1x512xf32>
    %508 = arith.truncf %393 : vector<8x32xf32> to vector<8x32xbf16>
    %cst_236 = arith.constant dense<0.000000e+00> : vector<8x512xf32>
    %509 = tpu.matmul %508, %503, %cst_236 {dimension_numbers = #tpu.dot_dimension_numbers<[1], [0], [0], [1], [0, 0, 1, 1], [], []>} : vector<8x32xbf16>, vector<32x512xbf16>, vector<8x512xf32> -> vector<8x512xf32>
    %510 = arith.truncf %428 : vector<8x32xf32> to vector<8x32xbf16>
    %cst_237 = arith.constant dense<0.000000e+00> : vector<8x512xf32>
    %511 = tpu.matmul %510, %505, %cst_237 {dimension_numbers = #tpu.dot_dimension_numbers<[1], [0], [0], [1], [0, 0, 1, 1], [], []>} : vector<8x32xbf16>, vector<32x512xbf16>, vector<8x512xf32> -> vector<8x512xf32>
    %512 = arith.addf %509, %511 : vector<8x512xf32>
    %513 = vector.broadcast %507 : vector<1x512xf32> to vector<8x512xf32>
    %514 = arith.addf %512, %513 : vector<8x512xf32>
    %515 = vector.extract_strided_slice %514 {offsets = [0, 0], sizes = [8, 256], strides = [1, 1]} : vector<8x512xf32> to vector<8x256xf32>
    %cst_238 = arith.constant 5.000000e-01 : f32
    %516 = vector.broadcast %cst_238 : f32 to vector<8x256xf32>
    %517 = arith.mulf %516, %515 : vector<8x256xf32>
    %518 = math.tanh %517 : vector<8x256xf32>
    %cst_239 = arith.constant 5.000000e-01 : f32
    %519 = vector.broadcast %cst_239 : f32 to vector<8x256xf32>
    %520 = arith.mulf %519, %518 : vector<8x256xf32>
    %cst_240 = arith.constant 5.000000e-01 : f32
    %521 = vector.broadcast %cst_240 : f32 to vector<8x256xf32>
    %522 = arith.addf %521, %520 : vector<8x256xf32>
    %523 = vector.extract_strided_slice %522 {offsets = [0, 0], sizes = [8, 128], strides = [1, 1]} : vector<8x256xf32> to vector<8x128xf32>
    %524 = vector.extract_strided_slice %522 {offsets = [0, 128], sizes = [8, 128], strides = [1, 1]} : vector<8x256xf32> to vector<8x128xf32>
    %525 = vector.extract_strided_slice %514 {offsets = [0, 256], sizes = [8, 128], strides = [1, 1]} : vector<8x512xf32> to vector<8x128xf32>
    %526 = vector.extract_strided_slice %514 {offsets = [0, 384], sizes = [8, 128], strides = [1, 1]} : vector<8x512xf32> to vector<8x128xf32>
    %527 = arith.mulf %523, %526 : vector<8x128xf32>
    %528 = arith.addf %525, %527 : vector<8x128xf32>
    %529 = math.tanh %528 : vector<8x128xf32>
    %530 = vector.extract_strided_slice %524 {offsets = [0, 0], sizes = [8, 32], strides = [1, 1]} : vector<8x128xf32> to vector<8x32xf32>
    %cst_241 = arith.constant 1.000000e+00 : f32
    %531 = vector.broadcast %cst_241 : f32 to vector<8x32xf32>
    %532 = arith.subf %531, %530 : vector<8x32xf32>
    %533 = vector.extract_strided_slice %529 {offsets = [0, 0], sizes = [8, 32], strides = [1, 1]} : vector<8x128xf32> to vector<8x32xf32>
    %534 = arith.mulf %532, %533 : vector<8x32xf32>
    %535 = arith.mulf %530, %428 : vector<8x32xf32>
    %536 = arith.addf %534, %535 : vector<8x32xf32>
    %c3_242 = arith.constant 3 : index
    %c0_243 = arith.constant 0 : index
    %c0_244 = arith.constant 0 : index
    %537 = vector.load %arg5[%c3_242, %c0_243, %c0_244] : memref<8x8x32xf32, #tpu.memory_space<vmem>>, vector<1x8x32xf32>
    %538 = vector.shape_cast %537 : vector<1x8x32xf32> to vector<8x32xf32>
    %539 = vector.shape_cast %536 : vector<8x32xf32> to vector<1x8x32xf32>
    tpu.vector_store %arg5[%c3_242, %c0_243, %c0_244], %539 {strides = array<i32>} : memref<8x8x32xf32, #tpu.memory_space<vmem>>, vector<1x8x32xf32>,
    %c6 = arith.constant 6 : index
    %c0_245 = arith.constant 0 : index
    %c0_246 = arith.constant 0 : index
    %540 = vector.load %arg0[%c6, %c0_245, %c0_246] : memref<8x8x32xbf16, #tpu.memory_space<vmem>>, vector<1x8x32xbf16>
    %541 = vector.shape_cast %540 : vector<1x8x32xbf16> to vector<8x32xbf16>
    %c0_247 = arith.constant 0 : index
    %c0_248 = arith.constant 0 : index
    %542 = vector.load %arg1[%c0_247, %c0_248] : memref<32x512xbf16, #tpu.memory_space<vmem>>, vector<32x512xbf16>
    %c0_249 = arith.constant 0 : index
    %c0_250 = arith.constant 0 : index
    %c0_251 = arith.constant 0 : index
    %543 = vector.load %arg3[%c0_249, %c0_250, %c0_251] : memref<3x32x512xbf16, #tpu.memory_space<vmem>>, vector<1x32x512xbf16>
    %544 = vector.shape_cast %543 : vector<1x32x512xbf16> to vector<32x512xbf16>
    %c0_252 = arith.constant 0 : index
    %c0_253 = arith.constant 0 : index
    %c0_254 = arith.constant 0 : index
    %545 = vector.load %arg4[%c0_252, %c0_253, %c0_254] : memref<3x1x512xf32, #tpu.memory_space<vmem>>, vector<1x1x512xf32>
    %546 = vector.shape_cast %545 : vector<1x1x512xf32> to vector<1x512xf32>
    %cst_255 = arith.constant dense<0.000000e+00> : vector<8x512xf32>
    %547 = tpu.matmul %541, %542, %cst_255 {dimension_numbers = #tpu.dot_dimension_numbers<[1], [0], [0], [1], [0, 0, 1, 1], [], []>} : vector<8x32xbf16>, vector<32x512xbf16>, vector<8x512xf32> -> vector<8x512xf32>
    %548 = arith.truncf %466 : vector<8x32xf32> to vector<8x32xbf16>
    %cst_256 = arith.constant dense<0.000000e+00> : vector<8x512xf32>
    %549 = tpu.matmul %548, %544, %cst_256 {dimension_numbers = #tpu.dot_dimension_numbers<[1], [0], [0], [1], [0, 0, 1, 1], [], []>} : vector<8x32xbf16>, vector<32x512xbf16>, vector<8x512xf32> -> vector<8x512xf32>
    %550 = arith.addf %547, %549 : vector<8x512xf32>
    %551 = vector.broadcast %546 : vector<1x512xf32> to vector<8x512xf32>
    %552 = arith.addf %550, %551 : vector<8x512xf32>
    %553 = vector.extract_strided_slice %552 {offsets = [0, 0], sizes = [8, 256], strides = [1, 1]} : vector<8x512xf32> to vector<8x256xf32>
    %cst_257 = arith.constant 5.000000e-01 : f32
    %554 = vector.broadcast %cst_257 : f32 to vector<8x256xf32>
    %555 = arith.mulf %554, %553 : vector<8x256xf32>
    %556 = math.tanh %555 : vector<8x256xf32>
    %cst_258 = arith.constant 5.000000e-01 : f32
    %557 = vector.broadcast %cst_258 : f32 to vector<8x256xf32>
    %558 = arith.mulf %557, %556 : vector<8x256xf32>
    %cst_259 = arith.constant 5.000000e-01 : f32
    %559 = vector.broadcast %cst_259 : f32 to vector<8x256xf32>
    %560 = arith.addf %559, %558 : vector<8x256xf32>
    %561 = vector.extract_strided_slice %560 {offsets = [0, 0], sizes = [8, 128], strides = [1, 1]} : vector<8x256xf32> to vector<8x128xf32>
    %562 = vector.extract_strided_slice %560 {offsets = [0, 128], sizes = [8, 128], strides = [1, 1]} : vector<8x256xf32> to vector<8x128xf32>
    %563 = vector.extract_strided_slice %552 {offsets = [0, 256], sizes = [8, 128], strides = [1, 1]} : vector<8x512xf32> to vector<8x128xf32>
    %564 = vector.extract_strided_slice %552 {offsets = [0, 384], sizes = [8, 128], strides = [1, 1]} : vector<8x512xf32> to vector<8x128xf32>
    %565 = arith.mulf %561, %564 : vector<8x128xf32>
    %566 = arith.addf %563, %565 : vector<8x128xf32>
    %567 = math.tanh %566 : vector<8x128xf32>
    %568 = vector.extract_strided_slice %562 {offsets = [0, 0], sizes = [8, 32], strides = [1, 1]} : vector<8x128xf32> to vector<8x32xf32>
    %cst_260 = arith.constant 1.000000e+00 : f32
    %569 = vector.broadcast %cst_260 : f32 to vector<8x32xf32>
    %570 = arith.subf %569, %568 : vector<8x32xf32>
    %571 = vector.extract_strided_slice %567 {offsets = [0, 0], sizes = [8, 32], strides = [1, 1]} : vector<8x128xf32> to vector<8x32xf32>
    %572 = arith.mulf %570, %571 : vector<8x32xf32>
    %573 = arith.mulf %568, %466 : vector<8x32xf32>
    %574 = arith.addf %572, %573 : vector<8x32xf32>
    %c0_261 = arith.constant 0 : index
    %c0_262 = arith.constant 0 : index
    %c0_263 = arith.constant 0 : index
    %575 = vector.load %arg2[%c0_261, %c0_262, %c0_263] : memref<2x32x512xbf16, #tpu.memory_space<vmem>>, vector<1x32x512xbf16>
    %576 = vector.shape_cast %575 : vector<1x32x512xbf16> to vector<32x512xbf16>
    %c1_264 = arith.constant 1 : index
    %c0_265 = arith.constant 0 : index
    %c0_266 = arith.constant 0 : index
    %577 = vector.load %arg3[%c1_264, %c0_265, %c0_266] : memref<3x32x512xbf16, #tpu.memory_space<vmem>>, vector<1x32x512xbf16>
    %578 = vector.shape_cast %577 : vector<1x32x512xbf16> to vector<32x512xbf16>
    %c1_267 = arith.constant 1 : index
    %c0_268 = arith.constant 0 : index
    %c0_269 = arith.constant 0 : index
    %579 = vector.load %arg4[%c1_267, %c0_268, %c0_269] : memref<3x1x512xf32, #tpu.memory_space<vmem>>, vector<1x1x512xf32>
    %580 = vector.shape_cast %579 : vector<1x1x512xf32> to vector<1x512xf32>
    %581 = arith.truncf %466 : vector<8x32xf32> to vector<8x32xbf16>
    %cst_270 = arith.constant dense<0.000000e+00> : vector<8x512xf32>
    %582 = tpu.matmul %581, %576, %cst_270 {dimension_numbers = #tpu.dot_dimension_numbers<[1], [0], [0], [1], [0, 0, 1, 1], [], []>} : vector<8x32xbf16>, vector<32x512xbf16>, vector<8x512xf32> -> vector<8x512xf32>
    %583 = arith.truncf %501 : vector<8x32xf32> to vector<8x32xbf16>
    %cst_271 = arith.constant dense<0.000000e+00> : vector<8x512xf32>
    %584 = tpu.matmul %583, %578, %cst_271 {dimension_numbers = #tpu.dot_dimension_numbers<[1], [0], [0], [1], [0, 0, 1, 1], [], []>} : vector<8x32xbf16>, vector<32x512xbf16>, vector<8x512xf32> -> vector<8x512xf32>
    %585 = arith.addf %582, %584 : vector<8x512xf32>
    %586 = vector.broadcast %580 : vector<1x512xf32> to vector<8x512xf32>
    %587 = arith.addf %585, %586 : vector<8x512xf32>
    %588 = vector.extract_strided_slice %587 {offsets = [0, 0], sizes = [8, 256], strides = [1, 1]} : vector<8x512xf32> to vector<8x256xf32>
    %cst_272 = arith.constant 5.000000e-01 : f32
    %589 = vector.broadcast %cst_272 : f32 to vector<8x256xf32>
    %590 = arith.mulf %589, %588 : vector<8x256xf32>
    %591 = math.tanh %590 : vector<8x256xf32>
    %cst_273 = arith.constant 5.000000e-01 : f32
    %592 = vector.broadcast %cst_273 : f32 to vector<8x256xf32>
    %593 = arith.mulf %592, %591 : vector<8x256xf32>
    %cst_274 = arith.constant 5.000000e-01 : f32
    %594 = vector.broadcast %cst_274 : f32 to vector<8x256xf32>
    %595 = arith.addf %594, %593 : vector<8x256xf32>
    %596 = vector.extract_strided_slice %595 {offsets = [0, 0], sizes = [8, 128], strides = [1, 1]} : vector<8x256xf32> to vector<8x128xf32>
    %597 = vector.extract_strided_slice %595 {offsets = [0, 128], sizes = [8, 128], strides = [1, 1]} : vector<8x256xf32> to vector<8x128xf32>
    %598 = vector.extract_strided_slice %587 {offsets = [0, 256], sizes = [8, 128], strides = [1, 1]} : vector<8x512xf32> to vector<8x128xf32>
    %599 = vector.extract_strided_slice %587 {offsets = [0, 384], sizes = [8, 128], strides = [1, 1]} : vector<8x512xf32> to vector<8x128xf32>
    %600 = arith.mulf %596, %599 : vector<8x128xf32>
    %601 = arith.addf %598, %600 : vector<8x128xf32>
    %602 = math.tanh %601 : vector<8x128xf32>
    %603 = vector.extract_strided_slice %597 {offsets = [0, 0], sizes = [8, 32], strides = [1, 1]} : vector<8x128xf32> to vector<8x32xf32>
    %cst_275 = arith.constant 1.000000e+00 : f32
    %604 = vector.broadcast %cst_275 : f32 to vector<8x32xf32>
    %605 = arith.subf %604, %603 : vector<8x32xf32>
    %606 = vector.extract_strided_slice %602 {offsets = [0, 0], sizes = [8, 32], strides = [1, 1]} : vector<8x128xf32> to vector<8x32xf32>
    %607 = arith.mulf %605, %606 : vector<8x32xf32>
    %608 = arith.mulf %603, %501 : vector<8x32xf32>
    %609 = arith.addf %607, %608 : vector<8x32xf32>
    %c1_276 = arith.constant 1 : index
    %c0_277 = arith.constant 0 : index
    %c0_278 = arith.constant 0 : index
    %610 = vector.load %arg2[%c1_276, %c0_277, %c0_278] : memref<2x32x512xbf16, #tpu.memory_space<vmem>>, vector<1x32x512xbf16>
    %611 = vector.shape_cast %610 : vector<1x32x512xbf16> to vector<32x512xbf16>
    %c2_279 = arith.constant 2 : index
    %c0_280 = arith.constant 0 : index
    %c0_281 = arith.constant 0 : index
    %612 = vector.load %arg3[%c2_279, %c0_280, %c0_281] : memref<3x32x512xbf16, #tpu.memory_space<vmem>>, vector<1x32x512xbf16>
    %613 = vector.shape_cast %612 : vector<1x32x512xbf16> to vector<32x512xbf16>
    %c2_282 = arith.constant 2 : index
    %c0_283 = arith.constant 0 : index
    %c0_284 = arith.constant 0 : index
    %614 = vector.load %arg4[%c2_282, %c0_283, %c0_284] : memref<3x1x512xf32, #tpu.memory_space<vmem>>, vector<1x1x512xf32>
    %615 = vector.shape_cast %614 : vector<1x1x512xf32> to vector<1x512xf32>
    %616 = arith.truncf %501 : vector<8x32xf32> to vector<8x32xbf16>
    %cst_285 = arith.constant dense<0.000000e+00> : vector<8x512xf32>
    %617 = tpu.matmul %616, %611, %cst_285 {dimension_numbers = #tpu.dot_dimension_numbers<[1], [0], [0], [1], [0, 0, 1, 1], [], []>} : vector<8x32xbf16>, vector<32x512xbf16>, vector<8x512xf32> -> vector<8x512xf32>
    %618 = arith.truncf %536 : vector<8x32xf32> to vector<8x32xbf16>
    %cst_286 = arith.constant dense<0.000000e+00> : vector<8x512xf32>
    %619 = tpu.matmul %618, %613, %cst_286 {dimension_numbers = #tpu.dot_dimension_numbers<[1], [0], [0], [1], [0, 0, 1, 1], [], []>} : vector<8x32xbf16>, vector<32x512xbf16>, vector<8x512xf32> -> vector<8x512xf32>
    %620 = arith.addf %617, %619 : vector<8x512xf32>
    %621 = vector.broadcast %615 : vector<1x512xf32> to vector<8x512xf32>
    %622 = arith.addf %620, %621 : vector<8x512xf32>
    %623 = vector.extract_strided_slice %622 {offsets = [0, 0], sizes = [8, 256], strides = [1, 1]} : vector<8x512xf32> to vector<8x256xf32>
    %cst_287 = arith.constant 5.000000e-01 : f32
    %624 = vector.broadcast %cst_287 : f32 to vector<8x256xf32>
    %625 = arith.mulf %624, %623 : vector<8x256xf32>
    %626 = math.tanh %625 : vector<8x256xf32>
    %cst_288 = arith.constant 5.000000e-01 : f32
    %627 = vector.broadcast %cst_288 : f32 to vector<8x256xf32>
    %628 = arith.mulf %627, %626 : vector<8x256xf32>
    %cst_289 = arith.constant 5.000000e-01 : f32
    %629 = vector.broadcast %cst_289 : f32 to vector<8x256xf32>
    %630 = arith.addf %629, %628 : vector<8x256xf32>
    %631 = vector.extract_strided_slice %630 {offsets = [0, 0], sizes = [8, 128], strides = [1, 1]} : vector<8x256xf32> to vector<8x128xf32>
    %632 = vector.extract_strided_slice %630 {offsets = [0, 128], sizes = [8, 128], strides = [1, 1]} : vector<8x256xf32> to vector<8x128xf32>
    %633 = vector.extract_strided_slice %622 {offsets = [0, 256], sizes = [8, 128], strides = [1, 1]} : vector<8x512xf32> to vector<8x128xf32>
    %634 = vector.extract_strided_slice %622 {offsets = [0, 384], sizes = [8, 128], strides = [1, 1]} : vector<8x512xf32> to vector<8x128xf32>
    %635 = arith.mulf %631, %634 : vector<8x128xf32>
    %636 = arith.addf %633, %635 : vector<8x128xf32>
    %637 = math.tanh %636 : vector<8x128xf32>
    %638 = vector.extract_strided_slice %632 {offsets = [0, 0], sizes = [8, 32], strides = [1, 1]} : vector<8x128xf32> to vector<8x32xf32>
    %cst_290 = arith.constant 1.000000e+00 : f32
    %639 = vector.broadcast %cst_290 : f32 to vector<8x32xf32>
    %640 = arith.subf %639, %638 : vector<8x32xf32>
    %641 = vector.extract_strided_slice %637 {offsets = [0, 0], sizes = [8, 32], strides = [1, 1]} : vector<8x128xf32> to vector<8x32xf32>
    %642 = arith.mulf %640, %641 : vector<8x32xf32>
    %643 = arith.mulf %638, %536 : vector<8x32xf32>
    %644 = arith.addf %642, %643 : vector<8x32xf32>
    %c4_291 = arith.constant 4 : index
    %c0_292 = arith.constant 0 : index
    %c0_293 = arith.constant 0 : index
    %645 = vector.load %arg5[%c4_291, %c0_292, %c0_293] : memref<8x8x32xf32, #tpu.memory_space<vmem>>, vector<1x8x32xf32>
    %646 = vector.shape_cast %645 : vector<1x8x32xf32> to vector<8x32xf32>
    %647 = vector.shape_cast %644 : vector<8x32xf32> to vector<1x8x32xf32>
    tpu.vector_store %arg5[%c4_291, %c0_292, %c0_293], %647 {strides = array<i32>} : memref<8x8x32xf32, #tpu.memory_space<vmem>>, vector<1x8x32xf32>,
    %c7 = arith.constant 7 : index
    %c0_294 = arith.constant 0 : index
    %c0_295 = arith.constant 0 : index
    %648 = vector.load %arg0[%c7, %c0_294, %c0_295] : memref<8x8x32xbf16, #tpu.memory_space<vmem>>, vector<1x8x32xbf16>
    %649 = vector.shape_cast %648 : vector<1x8x32xbf16> to vector<8x32xbf16>
    %c0_296 = arith.constant 0 : index
    %c0_297 = arith.constant 0 : index
    %650 = vector.load %arg1[%c0_296, %c0_297] : memref<32x512xbf16, #tpu.memory_space<vmem>>, vector<32x512xbf16>
    %c0_298 = arith.constant 0 : index
    %c0_299 = arith.constant 0 : index
    %c0_300 = arith.constant 0 : index
    %651 = vector.load %arg3[%c0_298, %c0_299, %c0_300] : memref<3x32x512xbf16, #tpu.memory_space<vmem>>, vector<1x32x512xbf16>
    %652 = vector.shape_cast %651 : vector<1x32x512xbf16> to vector<32x512xbf16>
    %c0_301 = arith.constant 0 : index
    %c0_302 = arith.constant 0 : index
    %c0_303 = arith.constant 0 : index
    %653 = vector.load %arg4[%c0_301, %c0_302, %c0_303] : memref<3x1x512xf32, #tpu.memory_space<vmem>>, vector<1x1x512xf32>
    %654 = vector.shape_cast %653 : vector<1x1x512xf32> to vector<1x512xf32>
    %cst_304 = arith.constant dense<0.000000e+00> : vector<8x512xf32>
    %655 = tpu.matmul %649, %650, %cst_304 {dimension_numbers = #tpu.dot_dimension_numbers<[1], [0], [0], [1], [0, 0, 1, 1], [], []>} : vector<8x32xbf16>, vector<32x512xbf16>, vector<8x512xf32> -> vector<8x512xf32>
    %656 = arith.truncf %574 : vector<8x32xf32> to vector<8x32xbf16>
    %cst_305 = arith.constant dense<0.000000e+00> : vector<8x512xf32>
    %657 = tpu.matmul %656, %652, %cst_305 {dimension_numbers = #tpu.dot_dimension_numbers<[1], [0], [0], [1], [0, 0, 1, 1], [], []>} : vector<8x32xbf16>, vector<32x512xbf16>, vector<8x512xf32> -> vector<8x512xf32>
    %658 = arith.addf %655, %657 : vector<8x512xf32>
    %659 = vector.broadcast %654 : vector<1x512xf32> to vector<8x512xf32>
    %660 = arith.addf %658, %659 : vector<8x512xf32>
    %661 = vector.extract_strided_slice %660 {offsets = [0, 0], sizes = [8, 256], strides = [1, 1]} : vector<8x512xf32> to vector<8x256xf32>
    %cst_306 = arith.constant 5.000000e-01 : f32
    %662 = vector.broadcast %cst_306 : f32 to vector<8x256xf32>
    %663 = arith.mulf %662, %661 : vector<8x256xf32>
    %664 = math.tanh %663 : vector<8x256xf32>
    %cst_307 = arith.constant 5.000000e-01 : f32
    %665 = vector.broadcast %cst_307 : f32 to vector<8x256xf32>
    %666 = arith.mulf %665, %664 : vector<8x256xf32>
    %cst_308 = arith.constant 5.000000e-01 : f32
    %667 = vector.broadcast %cst_308 : f32 to vector<8x256xf32>
    %668 = arith.addf %667, %666 : vector<8x256xf32>
    %669 = vector.extract_strided_slice %668 {offsets = [0, 0], sizes = [8, 128], strides = [1, 1]} : vector<8x256xf32> to vector<8x128xf32>
    %670 = vector.extract_strided_slice %668 {offsets = [0, 128], sizes = [8, 128], strides = [1, 1]} : vector<8x256xf32> to vector<8x128xf32>
    %671 = vector.extract_strided_slice %660 {offsets = [0, 256], sizes = [8, 128], strides = [1, 1]} : vector<8x512xf32> to vector<8x128xf32>
    %672 = vector.extract_strided_slice %660 {offsets = [0, 384], sizes = [8, 128], strides = [1, 1]} : vector<8x512xf32> to vector<8x128xf32>
    %673 = arith.mulf %669, %672 : vector<8x128xf32>
    %674 = arith.addf %671, %673 : vector<8x128xf32>
    %675 = math.tanh %674 : vector<8x128xf32>
    %676 = vector.extract_strided_slice %670 {offsets = [0, 0], sizes = [8, 32], strides = [1, 1]} : vector<8x128xf32> to vector<8x32xf32>
    %cst_309 = arith.constant 1.000000e+00 : f32
    %677 = vector.broadcast %cst_309 : f32 to vector<8x32xf32>
    %678 = arith.subf %677, %676 : vector<8x32xf32>
    %679 = vector.extract_strided_slice %675 {offsets = [0, 0], sizes = [8, 32], strides = [1, 1]} : vector<8x128xf32> to vector<8x32xf32>
    %680 = arith.mulf %678, %679 : vector<8x32xf32>
    %681 = arith.mulf %676, %574 : vector<8x32xf32>
    %682 = arith.addf %680, %681 : vector<8x32xf32>
    %c0_310 = arith.constant 0 : index
    %c0_311 = arith.constant 0 : index
    %c0_312 = arith.constant 0 : index
    %683 = vector.load %arg2[%c0_310, %c0_311, %c0_312] : memref<2x32x512xbf16, #tpu.memory_space<vmem>>, vector<1x32x512xbf16>
    %684 = vector.shape_cast %683 : vector<1x32x512xbf16> to vector<32x512xbf16>
    %c1_313 = arith.constant 1 : index
    %c0_314 = arith.constant 0 : index
    %c0_315 = arith.constant 0 : index
    %685 = vector.load %arg3[%c1_313, %c0_314, %c0_315] : memref<3x32x512xbf16, #tpu.memory_space<vmem>>, vector<1x32x512xbf16>
    %686 = vector.shape_cast %685 : vector<1x32x512xbf16> to vector<32x512xbf16>
    %c1_316 = arith.constant 1 : index
    %c0_317 = arith.constant 0 : index
    %c0_318 = arith.constant 0 : index
    %687 = vector.load %arg4[%c1_316, %c0_317, %c0_318] : memref<3x1x512xf32, #tpu.memory_space<vmem>>, vector<1x1x512xf32>
    %688 = vector.shape_cast %687 : vector<1x1x512xf32> to vector<1x512xf32>
    %689 = arith.truncf %574 : vector<8x32xf32> to vector<8x32xbf16>
    %cst_319 = arith.constant dense<0.000000e+00> : vector<8x512xf32>
    %690 = tpu.matmul %689, %684, %cst_319 {dimension_numbers = #tpu.dot_dimension_numbers<[1], [0], [0], [1], [0, 0, 1, 1], [], []>} : vector<8x32xbf16>, vector<32x512xbf16>, vector<8x512xf32> -> vector<8x512xf32>
    %691 = arith.truncf %609 : vector<8x32xf32> to vector<8x32xbf16>
    %cst_320 = arith.constant dense<0.000000e+00> : vector<8x512xf32>
    %692 = tpu.matmul %691, %686, %cst_320 {dimension_numbers = #tpu.dot_dimension_numbers<[1], [0], [0], [1], [0, 0, 1, 1], [], []>} : vector<8x32xbf16>, vector<32x512xbf16>, vector<8x512xf32> -> vector<8x512xf32>
    %693 = arith.addf %690, %692 : vector<8x512xf32>
    %694 = vector.broadcast %688 : vector<1x512xf32> to vector<8x512xf32>
    %695 = arith.addf %693, %694 : vector<8x512xf32>
    %696 = vector.extract_strided_slice %695 {offsets = [0, 0], sizes = [8, 256], strides = [1, 1]} : vector<8x512xf32> to vector<8x256xf32>
    %cst_321 = arith.constant 5.000000e-01 : f32
    %697 = vector.broadcast %cst_321 : f32 to vector<8x256xf32>
    %698 = arith.mulf %697, %696 : vector<8x256xf32>
    %699 = math.tanh %698 : vector<8x256xf32>
    %cst_322 = arith.constant 5.000000e-01 : f32
    %700 = vector.broadcast %cst_322 : f32 to vector<8x256xf32>
    %701 = arith.mulf %700, %699 : vector<8x256xf32>
    %cst_323 = arith.constant 5.000000e-01 : f32
    %702 = vector.broadcast %cst_323 : f32 to vector<8x256xf32>
    %703 = arith.addf %702, %701 : vector<8x256xf32>
    %704 = vector.extract_strided_slice %703 {offsets = [0, 0], sizes = [8, 128], strides = [1, 1]} : vector<8x256xf32> to vector<8x128xf32>
    %705 = vector.extract_strided_slice %703 {offsets = [0, 128], sizes = [8, 128], strides = [1, 1]} : vector<8x256xf32> to vector<8x128xf32>
    %706 = vector.extract_strided_slice %695 {offsets = [0, 256], sizes = [8, 128], strides = [1, 1]} : vector<8x512xf32> to vector<8x128xf32>
    %707 = vector.extract_strided_slice %695 {offsets = [0, 384], sizes = [8, 128], strides = [1, 1]} : vector<8x512xf32> to vector<8x128xf32>
    %708 = arith.mulf %704, %707 : vector<8x128xf32>
    %709 = arith.addf %706, %708 : vector<8x128xf32>
    %710 = math.tanh %709 : vector<8x128xf32>
    %711 = vector.extract_strided_slice %705 {offsets = [0, 0], sizes = [8, 32], strides = [1, 1]} : vector<8x128xf32> to vector<8x32xf32>
    %cst_324 = arith.constant 1.000000e+00 : f32
    %712 = vector.broadcast %cst_324 : f32 to vector<8x32xf32>
    %713 = arith.subf %712, %711 : vector<8x32xf32>
    %714 = vector.extract_strided_slice %710 {offsets = [0, 0], sizes = [8, 32], strides = [1, 1]} : vector<8x128xf32> to vector<8x32xf32>
    %715 = arith.mulf %713, %714 : vector<8x32xf32>
    %716 = arith.mulf %711, %609 : vector<8x32xf32>
    %717 = arith.addf %715, %716 : vector<8x32xf32>
    %c1_325 = arith.constant 1 : index
    %c0_326 = arith.constant 0 : index
    %c0_327 = arith.constant 0 : index
    %718 = vector.load %arg2[%c1_325, %c0_326, %c0_327] : memref<2x32x512xbf16, #tpu.memory_space<vmem>>, vector<1x32x512xbf16>
    %719 = vector.shape_cast %718 : vector<1x32x512xbf16> to vector<32x512xbf16>
    %c2_328 = arith.constant 2 : index
    %c0_329 = arith.constant 0 : index
    %c0_330 = arith.constant 0 : index
    %720 = vector.load %arg3[%c2_328, %c0_329, %c0_330] : memref<3x32x512xbf16, #tpu.memory_space<vmem>>, vector<1x32x512xbf16>
    %721 = vector.shape_cast %720 : vector<1x32x512xbf16> to vector<32x512xbf16>
    %c2_331 = arith.constant 2 : index
    %c0_332 = arith.constant 0 : index
    %c0_333 = arith.constant 0 : index
    %722 = vector.load %arg4[%c2_331, %c0_332, %c0_333] : memref<3x1x512xf32, #tpu.memory_space<vmem>>, vector<1x1x512xf32>
    %723 = vector.shape_cast %722 : vector<1x1x512xf32> to vector<1x512xf32>
    %724 = arith.truncf %609 : vector<8x32xf32> to vector<8x32xbf16>
    %cst_334 = arith.constant dense<0.000000e+00> : vector<8x512xf32>
    %725 = tpu.matmul %724, %719, %cst_334 {dimension_numbers = #tpu.dot_dimension_numbers<[1], [0], [0], [1], [0, 0, 1, 1], [], []>} : vector<8x32xbf16>, vector<32x512xbf16>, vector<8x512xf32> -> vector<8x512xf32>
    %726 = arith.truncf %644 : vector<8x32xf32> to vector<8x32xbf16>
    %cst_335 = arith.constant dense<0.000000e+00> : vector<8x512xf32>
    %727 = tpu.matmul %726, %721, %cst_335 {dimension_numbers = #tpu.dot_dimension_numbers<[1], [0], [0], [1], [0, 0, 1, 1], [], []>} : vector<8x32xbf16>, vector<32x512xbf16>, vector<8x512xf32> -> vector<8x512xf32>
    %728 = arith.addf %725, %727 : vector<8x512xf32>
    %729 = vector.broadcast %723 : vector<1x512xf32> to vector<8x512xf32>
    %730 = arith.addf %728, %729 : vector<8x512xf32>
    %731 = vector.extract_strided_slice %730 {offsets = [0, 0], sizes = [8, 256], strides = [1, 1]} : vector<8x512xf32> to vector<8x256xf32>
    %cst_336 = arith.constant 5.000000e-01 : f32
    %732 = vector.broadcast %cst_336 : f32 to vector<8x256xf32>
    %733 = arith.mulf %732, %731 : vector<8x256xf32>
    %734 = math.tanh %733 : vector<8x256xf32>
    %cst_337 = arith.constant 5.000000e-01 : f32
    %735 = vector.broadcast %cst_337 : f32 to vector<8x256xf32>
    %736 = arith.mulf %735, %734 : vector<8x256xf32>
    %cst_338 = arith.constant 5.000000e-01 : f32
    %737 = vector.broadcast %cst_338 : f32 to vector<8x256xf32>
    %738 = arith.addf %737, %736 : vector<8x256xf32>
    %739 = vector.extract_strided_slice %738 {offsets = [0, 0], sizes = [8, 128], strides = [1, 1]} : vector<8x256xf32> to vector<8x128xf32>
    %740 = vector.extract_strided_slice %738 {offsets = [0, 128], sizes = [8, 128], strides = [1, 1]} : vector<8x256xf32> to vector<8x128xf32>
    %741 = vector.extract_strided_slice %730 {offsets = [0, 256], sizes = [8, 128], strides = [1, 1]} : vector<8x512xf32> to vector<8x128xf32>
    %742 = vector.extract_strided_slice %730 {offsets = [0, 384], sizes = [8, 128], strides = [1, 1]} : vector<8x512xf32> to vector<8x128xf32>
    %743 = arith.mulf %739, %742 : vector<8x128xf32>
    %744 = arith.addf %741, %743 : vector<8x128xf32>
    %745 = math.tanh %744 : vector<8x128xf32>
    %746 = vector.extract_strided_slice %740 {offsets = [0, 0], sizes = [8, 32], strides = [1, 1]} : vector<8x128xf32> to vector<8x32xf32>
    %cst_339 = arith.constant 1.000000e+00 : f32
    %747 = vector.broadcast %cst_339 : f32 to vector<8x32xf32>
    %748 = arith.subf %747, %746 : vector<8x32xf32>
    %749 = vector.extract_strided_slice %745 {offsets = [0, 0], sizes = [8, 32], strides = [1, 1]} : vector<8x128xf32> to vector<8x32xf32>
    %750 = arith.mulf %748, %749 : vector<8x32xf32>
    %751 = arith.mulf %746, %644 : vector<8x32xf32>
    %752 = arith.addf %750, %751 : vector<8x32xf32>
    %c5_340 = arith.constant 5 : index
    %c0_341 = arith.constant 0 : index
    %c0_342 = arith.constant 0 : index
    %753 = vector.load %arg5[%c5_340, %c0_341, %c0_342] : memref<8x8x32xf32, #tpu.memory_space<vmem>>, vector<1x8x32xf32>
    %754 = vector.shape_cast %753 : vector<1x8x32xf32> to vector<8x32xf32>
    %755 = vector.shape_cast %752 : vector<8x32xf32> to vector<1x8x32xf32>
    tpu.vector_store %arg5[%c5_340, %c0_341, %c0_342], %755 {strides = array<i32>} : memref<8x8x32xf32, #tpu.memory_space<vmem>>, vector<1x8x32xf32>,
    %c0_343 = arith.constant 0 : index
    %c0_344 = arith.constant 0 : index
    %c0_345 = arith.constant 0 : index
    %756 = vector.load %arg2[%c0_343, %c0_344, %c0_345] : memref<2x32x512xbf16, #tpu.memory_space<vmem>>, vector<1x32x512xbf16>
    %757 = vector.shape_cast %756 : vector<1x32x512xbf16> to vector<32x512xbf16>
    %c1_346 = arith.constant 1 : index
    %c0_347 = arith.constant 0 : index
    %c0_348 = arith.constant 0 : index
    %758 = vector.load %arg3[%c1_346, %c0_347, %c0_348] : memref<3x32x512xbf16, #tpu.memory_space<vmem>>, vector<1x32x512xbf16>
    %759 = vector.shape_cast %758 : vector<1x32x512xbf16> to vector<32x512xbf16>
    %c1_349 = arith.constant 1 : index
    %c0_350 = arith.constant 0 : index
    %c0_351 = arith.constant 0 : index
    %760 = vector.load %arg4[%c1_349, %c0_350, %c0_351] : memref<3x1x512xf32, #tpu.memory_space<vmem>>, vector<1x1x512xf32>
    %761 = vector.shape_cast %760 : vector<1x1x512xf32> to vector<1x512xf32>
    %762 = arith.truncf %682 : vector<8x32xf32> to vector<8x32xbf16>
    %cst_352 = arith.constant dense<0.000000e+00> : vector<8x512xf32>
    %763 = tpu.matmul %762, %757, %cst_352 {dimension_numbers = #tpu.dot_dimension_numbers<[1], [0], [0], [1], [0, 0, 1, 1], [], []>} : vector<8x32xbf16>, vector<32x512xbf16>, vector<8x512xf32> -> vector<8x512xf32>
    %764 = arith.truncf %717 : vector<8x32xf32> to vector<8x32xbf16>
    %cst_353 = arith.constant dense<0.000000e+00> : vector<8x512xf32>
    %765 = tpu.matmul %764, %759, %cst_353 {dimension_numbers = #tpu.dot_dimension_numbers<[1], [0], [0], [1], [0, 0, 1, 1], [], []>} : vector<8x32xbf16>, vector<32x512xbf16>, vector<8x512xf32> -> vector<8x512xf32>
    %766 = arith.addf %763, %765 : vector<8x512xf32>
    %767 = vector.broadcast %761 : vector<1x512xf32> to vector<8x512xf32>
    %768 = arith.addf %766, %767 : vector<8x512xf32>
    %769 = vector.extract_strided_slice %768 {offsets = [0, 0], sizes = [8, 256], strides = [1, 1]} : vector<8x512xf32> to vector<8x256xf32>
    %cst_354 = arith.constant 5.000000e-01 : f32
    %770 = vector.broadcast %cst_354 : f32 to vector<8x256xf32>
    %771 = arith.mulf %770, %769 : vector<8x256xf32>
    %772 = math.tanh %771 : vector<8x256xf32>
    %cst_355 = arith.constant 5.000000e-01 : f32
    %773 = vector.broadcast %cst_355 : f32 to vector<8x256xf32>
    %774 = arith.mulf %773, %772 : vector<8x256xf32>
    %cst_356 = arith.constant 5.000000e-01 : f32
    %775 = vector.broadcast %cst_356 : f32 to vector<8x256xf32>
    %776 = arith.addf %775, %774 : vector<8x256xf32>
    %777 = vector.extract_strided_slice %776 {offsets = [0, 0], sizes = [8, 128], strides = [1, 1]} : vector<8x256xf32> to vector<8x128xf32>
    %778 = vector.extract_strided_slice %776 {offsets = [0, 128], sizes = [8, 128], strides = [1, 1]} : vector<8x256xf32> to vector<8x128xf32>
    %779 = vector.extract_strided_slice %768 {offsets = [0, 256], sizes = [8, 128], strides = [1, 1]} : vector<8x512xf32> to vector<8x128xf32>
    %780 = vector.extract_strided_slice %768 {offsets = [0, 384], sizes = [8, 128], strides = [1, 1]} : vector<8x512xf32> to vector<8x128xf32>
    %781 = arith.mulf %777, %780 : vector<8x128xf32>
    %782 = arith.addf %779, %781 : vector<8x128xf32>
    %783 = math.tanh %782 : vector<8x128xf32>
    %784 = vector.extract_strided_slice %778 {offsets = [0, 0], sizes = [8, 32], strides = [1, 1]} : vector<8x128xf32> to vector<8x32xf32>
    %cst_357 = arith.constant 1.000000e+00 : f32
    %785 = vector.broadcast %cst_357 : f32 to vector<8x32xf32>
    %786 = arith.subf %785, %784 : vector<8x32xf32>
    %787 = vector.extract_strided_slice %783 {offsets = [0, 0], sizes = [8, 32], strides = [1, 1]} : vector<8x128xf32> to vector<8x32xf32>
    %788 = arith.mulf %786, %787 : vector<8x32xf32>
    %789 = arith.mulf %784, %717 : vector<8x32xf32>
    %790 = arith.addf %788, %789 : vector<8x32xf32>
    %c1_358 = arith.constant 1 : index
    %c0_359 = arith.constant 0 : index
    %c0_360 = arith.constant 0 : index
    %791 = vector.load %arg2[%c1_358, %c0_359, %c0_360] : memref<2x32x512xbf16, #tpu.memory_space<vmem>>, vector<1x32x512xbf16>
    %792 = vector.shape_cast %791 : vector<1x32x512xbf16> to vector<32x512xbf16>
    %c2_361 = arith.constant 2 : index
    %c0_362 = arith.constant 0 : index
    %c0_363 = arith.constant 0 : index
    %793 = vector.load %arg3[%c2_361, %c0_362, %c0_363] : memref<3x32x512xbf16, #tpu.memory_space<vmem>>, vector<1x32x512xbf16>
    %794 = vector.shape_cast %793 : vector<1x32x512xbf16> to vector<32x512xbf16>
    %c2_364 = arith.constant 2 : index
    %c0_365 = arith.constant 0 : index
    %c0_366 = arith.constant 0 : index
    %795 = vector.load %arg4[%c2_364, %c0_365, %c0_366] : memref<3x1x512xf32, #tpu.memory_space<vmem>>, vector<1x1x512xf32>
    %796 = vector.shape_cast %795 : vector<1x1x512xf32> to vector<1x512xf32>
    %797 = arith.truncf %717 : vector<8x32xf32> to vector<8x32xbf16>
    %cst_367 = arith.constant dense<0.000000e+00> : vector<8x512xf32>
    %798 = tpu.matmul %797, %792, %cst_367 {dimension_numbers = #tpu.dot_dimension_numbers<[1], [0], [0], [1], [0, 0, 1, 1], [], []>} : vector<8x32xbf16>, vector<32x512xbf16>, vector<8x512xf32> -> vector<8x512xf32>
    %799 = arith.truncf %752 : vector<8x32xf32> to vector<8x32xbf16>
    %cst_368 = arith.constant dense<0.000000e+00> : vector<8x512xf32>
    %800 = tpu.matmul %799, %794, %cst_368 {dimension_numbers = #tpu.dot_dimension_numbers<[1], [0], [0], [1], [0, 0, 1, 1], [], []>} : vector<8x32xbf16>, vector<32x512xbf16>, vector<8x512xf32> -> vector<8x512xf32>
    %801 = arith.addf %798, %800 : vector<8x512xf32>
    %802 = vector.broadcast %796 : vector<1x512xf32> to vector<8x512xf32>
    %803 = arith.addf %801, %802 : vector<8x512xf32>
    %804 = vector.extract_strided_slice %803 {offsets = [0, 0], sizes = [8, 256], strides = [1, 1]} : vector<8x512xf32> to vector<8x256xf32>
    %cst_369 = arith.constant 5.000000e-01 : f32
    %805 = vector.broadcast %cst_369 : f32 to vector<8x256xf32>
    %806 = arith.mulf %805, %804 : vector<8x256xf32>
    %807 = math.tanh %806 : vector<8x256xf32>
    %cst_370 = arith.constant 5.000000e-01 : f32
    %808 = vector.broadcast %cst_370 : f32 to vector<8x256xf32>
    %809 = arith.mulf %808, %807 : vector<8x256xf32>
    %cst_371 = arith.constant 5.000000e-01 : f32
    %810 = vector.broadcast %cst_371 : f32 to vector<8x256xf32>
    %811 = arith.addf %810, %809 : vector<8x256xf32>
    %812 = vector.extract_strided_slice %811 {offsets = [0, 0], sizes = [8, 128], strides = [1, 1]} : vector<8x256xf32> to vector<8x128xf32>
    %813 = vector.extract_strided_slice %811 {offsets = [0, 128], sizes = [8, 128], strides = [1, 1]} : vector<8x256xf32> to vector<8x128xf32>
    %814 = vector.extract_strided_slice %803 {offsets = [0, 256], sizes = [8, 128], strides = [1, 1]} : vector<8x512xf32> to vector<8x128xf32>
    %815 = vector.extract_strided_slice %803 {offsets = [0, 384], sizes = [8, 128], strides = [1, 1]} : vector<8x512xf32> to vector<8x128xf32>
    %816 = arith.mulf %812, %815 : vector<8x128xf32>
    %817 = arith.addf %814, %816 : vector<8x128xf32>
    %818 = math.tanh %817 : vector<8x128xf32>
    %819 = vector.extract_strided_slice %813 {offsets = [0, 0], sizes = [8, 32], strides = [1, 1]} : vector<8x128xf32> to vector<8x32xf32>
    %cst_372 = arith.constant 1.000000e+00 : f32
    %820 = vector.broadcast %cst_372 : f32 to vector<8x32xf32>
    %821 = arith.subf %820, %819 : vector<8x32xf32>
    %822 = vector.extract_strided_slice %818 {offsets = [0, 0], sizes = [8, 32], strides = [1, 1]} : vector<8x128xf32> to vector<8x32xf32>
    %823 = arith.mulf %821, %822 : vector<8x32xf32>
    %824 = arith.mulf %819, %752 : vector<8x32xf32>
    %825 = arith.addf %823, %824 : vector<8x32xf32>
    %c6_373 = arith.constant 6 : index
    %c0_374 = arith.constant 0 : index
    %c0_375 = arith.constant 0 : index
    %826 = vector.load %arg5[%c6_373, %c0_374, %c0_375] : memref<8x8x32xf32, #tpu.memory_space<vmem>>, vector<1x8x32xf32>
    %827 = vector.shape_cast %826 : vector<1x8x32xf32> to vector<8x32xf32>
    %828 = vector.shape_cast %825 : vector<8x32xf32> to vector<1x8x32xf32>
    tpu.vector_store %arg5[%c6_373, %c0_374, %c0_375], %828 {strides = array<i32>} : memref<8x8x32xf32, #tpu.memory_space<vmem>>, vector<1x8x32xf32>,
    %c1_376 = arith.constant 1 : index
    %c0_377 = arith.constant 0 : index
    %c0_378 = arith.constant 0 : index
    %829 = vector.load %arg2[%c1_376, %c0_377, %c0_378] : memref<2x32x512xbf16, #tpu.memory_space<vmem>>, vector<1x32x512xbf16>
    %830 = vector.shape_cast %829 : vector<1x32x512xbf16> to vector<32x512xbf16>
    %c2_379 = arith.constant 2 : index
    %c0_380 = arith.constant 0 : index
    %c0_381 = arith.constant 0 : index
    %831 = vector.load %arg3[%c2_379, %c0_380, %c0_381] : memref<3x32x512xbf16, #tpu.memory_space<vmem>>, vector<1x32x512xbf16>
    %832 = vector.shape_cast %831 : vector<1x32x512xbf16> to vector<32x512xbf16>
    %c2_382 = arith.constant 2 : index
    %c0_383 = arith.constant 0 : index
    %c0_384 = arith.constant 0 : index
    %833 = vector.load %arg4[%c2_382, %c0_383, %c0_384] : memref<3x1x512xf32, #tpu.memory_space<vmem>>, vector<1x1x512xf32>
    %834 = vector.shape_cast %833 : vector<1x1x512xf32> to vector<1x512xf32>
    %835 = arith.truncf %790 : vector<8x32xf32> to vector<8x32xbf16>
    %cst_385 = arith.constant dense<0.000000e+00> : vector<8x512xf32>
    %836 = tpu.matmul %835, %830, %cst_385 {dimension_numbers = #tpu.dot_dimension_numbers<[1], [0], [0], [1], [0, 0, 1, 1], [], []>} : vector<8x32xbf16>, vector<32x512xbf16>, vector<8x512xf32> -> vector<8x512xf32>
    %837 = arith.truncf %825 : vector<8x32xf32> to vector<8x32xbf16>
    %cst_386 = arith.constant dense<0.000000e+00> : vector<8x512xf32>
    %838 = tpu.matmul %837, %832, %cst_386 {dimension_numbers = #tpu.dot_dimension_numbers<[1], [0], [0], [1], [0, 0, 1, 1], [], []>} : vector<8x32xbf16>, vector<32x512xbf16>, vector<8x512xf32> -> vector<8x512xf32>
    %839 = arith.addf %836, %838 : vector<8x512xf32>
    %840 = vector.broadcast %834 : vector<1x512xf32> to vector<8x512xf32>
    %841 = arith.addf %839, %840 : vector<8x512xf32>
    %842 = vector.extract_strided_slice %841 {offsets = [0, 0], sizes = [8, 256], strides = [1, 1]} : vector<8x512xf32> to vector<8x256xf32>
    %cst_387 = arith.constant 5.000000e-01 : f32
    %843 = vector.broadcast %cst_387 : f32 to vector<8x256xf32>
    %844 = arith.mulf %843, %842 : vector<8x256xf32>
    %845 = math.tanh %844 : vector<8x256xf32>
    %cst_388 = arith.constant 5.000000e-01 : f32
    %846 = vector.broadcast %cst_388 : f32 to vector<8x256xf32>
    %847 = arith.mulf %846, %845 : vector<8x256xf32>
    %cst_389 = arith.constant 5.000000e-01 : f32
    %848 = vector.broadcast %cst_389 : f32 to vector<8x256xf32>
    %849 = arith.addf %848, %847 : vector<8x256xf32>
    %850 = vector.extract_strided_slice %849 {offsets = [0, 0], sizes = [8, 128], strides = [1, 1]} : vector<8x256xf32> to vector<8x128xf32>
    %851 = vector.extract_strided_slice %849 {offsets = [0, 128], sizes = [8, 128], strides = [1, 1]} : vector<8x256xf32> to vector<8x128xf32>
    %852 = vector.extract_strided_slice %841 {offsets = [0, 256], sizes = [8, 128], strides = [1, 1]} : vector<8x512xf32> to vector<8x128xf32>
    %853 = vector.extract_strided_slice %841 {offsets = [0, 384], sizes = [8, 128], strides = [1, 1]} : vector<8x512xf32> to vector<8x128xf32>
    %854 = arith.mulf %850, %853 : vector<8x128xf32>
    %855 = arith.addf %852, %854 : vector<8x128xf32>
    %856 = math.tanh %855 : vector<8x128xf32>
    %857 = vector.extract_strided_slice %851 {offsets = [0, 0], sizes = [8, 32], strides = [1, 1]} : vector<8x128xf32> to vector<8x32xf32>
    %cst_390 = arith.constant 1.000000e+00 : f32
    %858 = vector.broadcast %cst_390 : f32 to vector<8x32xf32>
    %859 = arith.subf %858, %857 : vector<8x32xf32>
    %860 = vector.extract_strided_slice %856 {offsets = [0, 0], sizes = [8, 32], strides = [1, 1]} : vector<8x128xf32> to vector<8x32xf32>
    %861 = arith.mulf %859, %860 : vector<8x32xf32>
    %862 = arith.mulf %857, %825 : vector<8x32xf32>
    %863 = arith.addf %861, %862 : vector<8x32xf32>
    %c7_391 = arith.constant 7 : index
    %c0_392 = arith.constant 0 : index
    %c0_393 = arith.constant 0 : index
    %864 = vector.load %arg5[%c7_391, %c0_392, %c0_393] : memref<8x8x32xf32, #tpu.memory_space<vmem>>, vector<1x8x32xf32>
    %865 = vector.shape_cast %864 : vector<1x8x32xf32> to vector<8x32xf32>
    %866 = vector.shape_cast %863 : vector<8x32xf32> to vector<1x8x32xf32>
    tpu.vector_store %arg5[%c7_391, %c0_392, %c0_393], %866 {strides = array<i32>} : memref<8x8x32xf32, #tpu.memory_space<vmem>>, vector<1x8x32xf32>,
    return
  }
}

</mosaic_0001>

<bundles_post_ra>
// kernel: base_rnn_forward.1
= control target key start
LH: loop header
LB: loop body
LE: loop exit
PB: predicated region body
PF: predicated region fallthrough
CT: control target
= control target key end

     0   :  { %10 = vsyncpa [#allocation3], 0  ;;  %s9444_s0 = inlined_call_operand.vmem [shape: bf16[8,8,32], index: 0, kind: input, shape index: {}]   ;;  %s9445_s1 = inlined_call_operand.vmem [shape: bf16[32,512], index: 1, kind: input, shape index: {}]   ;;  %s9446_s2 = inlined_call_operand.hbm [shape: bf16[2,32,512], index: 2, kind: input, shape index: {}]   ;;  %s9447_s3 = inlined_call_operand.hbm [shape: bf16[3,32,512], index: 3, kind: input, shape index: {}]   ;;  %s9448_s4 = inlined_call_operand.hbm [shape: f32[3,1,512], index: 4, kind: input, shape index: {}]   ;;  %s9449_s5 = inlined_call_operand.vmem [shape: f32[8,8,32], index: 5, kind: output, shape index: {}]  }
   0x1   :  { %11 = vsyncpa [#allocation5], 0  ;;  %s8026_s18 = smov [#allocation4]   ;;  %s8027_s20 = smov [#allocation2]  }
   0x2   :  { %s33_s19 = sshll.u32 %s8026_s18, 4  ;;  %s21_s21 = sshll.u32 %s8027_s20, 4  ;;  %s34_s19 = int_to_ptr.vmem [resolvable:$true] %s33_s19  ;;  %s22_s21 = int_to_ptr.vmem [resolvable:$true] %s21_s21 }
   0x3   :  { %s7970_s22 = scalar_lea.vmem %s34_s19, 3072  ;;  %p7975_p1 = scmp.lt.s32.totalorder %s34_s19, %s34_s19 }
   0x4   :  { %p7971_p0 = scmp.ne.s32.totalorder %s34_s19, %s7970_s22  ;;  %p7976_p2 = scmp.lt.s32.totalorder %s7970_s22, %s7970_s22 }
   0x6   :  { %p7977_p3 = por %p7976_p2, %p7975_p1 }
   0x8   :  { %p7978_p4 = pnand %p7977_p3, %p7971_p0 }
   0xa   :  { %7981 = shalt.err (!%p7978_p4)
}
   0xb   :  { %s8028_s23 = smov 256   ;;  %s8029_s24 = smov 16  }
   0xc   :  { %39 = dma.hbm_to_vmem [thread:$0]  %s9447_s3, 3072, %s34_s19, [#allocation5], %s8028_s23, %s8028_s23, %s8029_s24  }
   0xd   :  { %s7990_s27 = scalar_lea.vmem %s22_s21, 2048  ;;  %p7995_p6 = scmp.lt.s32.totalorder %s22_s21, %s22_s21 }
   0xe   :  { %p7991_p5 = scmp.ne.s32.totalorder %s22_s21, %s7990_s27  ;;  %p7996_p7 = scmp.lt.s32.totalorder %s7990_s27, %s7990_s27 }
  0x10   :  { %p7997_p8 = por %p7996_p7, %p7995_p6 }
  0x12   :  { %p7998_p9 = pnand %p7997_p8, %p7991_p5 }
  0x14   :  { %8001 = shalt.err (!%p7998_p9)
}
  0x15   :  { %27 = dma.hbm_to_vmem [thread:$0]  %s9446_s2, 2048, %s22_s21, [#allocation3], %s8028_s23, %s8028_s23, %s8029_s24  }
  0x16   :  { %s8030_s30 = smov [#allocation6]  }
  0x17   :  { %s45_s6 = sshll.u32 %s8030_s30, 4  ;;  %s46_s6 = int_to_ptr.vmem [resolvable:$true] %s45_s6 }
  0x18   :  { %s8010_s7 = scalar_lea.vmem %s46_s6, 192  ;;  %p8015_p11 = scmp.lt.s32.totalorder %s46_s6, %s46_s6 }
  0x19   :  { %p8011_p10 = scmp.ne.s32.totalorder %s46_s6, %s8010_s7  ;;  %p8016_p12 = scmp.lt.s32.totalorder %s8010_s7, %s8010_s7 }
  0x1b   :  { %p8017_p13 = por %p8016_p12, %p8015_p11 }
  0x1d   :  { %p8018_p0 = pnand %p8017_p13, %p8011_p10 }
  0x1f   :  { %8021 = shalt.err (!%p8018_p0)
}
  0x20   :  { %s8031_s3 = smov 64   ;;  %s8032_s8 = smov 4  }
  0x21   :  { %51 = dma.hbm_to_vmem [thread:$0]  %s9448_s4, 192, %s46_s6, [#allocation5], %s8031_s3, %s8031_s3, %s8032_s8  }
  0x22   :  { %8022 = dma.done.wait [#allocation3], 2048  }
  0x23   :  { %8023 = vsyncadd [#allocation3], 4294965248 }
  0x24   :  { %8024 = dma.done.wait [#allocation5], 3264  }
  0x25   :  { %8025 = vsyncadd [#allocation5], 4294964032  ;;  %v9450_v0 = vmov 0   ;;  %v8075_v1 = vld [vmem:[#allocation4 + $0x24] ss:$16 sps:$4 sm:$0xff]   ;;  %vm120_vm0 = vcmask 261120   ;;  %v332_v18 = vlaneseq }
  0x26   :  { %156 = vmatprep.mubr.bf16.mxu0 %v9450_v0  ;;  %197 = vmatprep.mubr.bf16.mxu1 %v9450_v0  ;;  %v8077_v2 = vld [vmem:[#allocation4 + $0x20] ss:$16 sps:$4 sm:$0xff]   ;;  %v8080_v3 = vld [vmem:[#allocation4 + $0x4] ss:$16 sps:$4 sm:$0xff]   ;;  %v8091_v6 = vld [vmem:[#allocation4 + $0x2c] ss:$16 sps:$4 sm:$0xff]  }
  0x27   :  { %136 = vmatprep.subr.bf16.mxu0 %v8075_v1  ;;  %v8083_v4 = vld [vmem:[#allocation4] ss:$16 sps:$4 sm:$0xff]   ;;  %v8088_v5 = vld [vmem:[%s9445_s1 + $0x24] ss:$16 sps:$4 sm:$0xff]   ;;  %v8093_v7 = vld [vmem:[#allocation4 + $0x28] ss:$16 sps:$4 sm:$0xff]   ;;  %177 = vmatprep.subr.bf16.mxu1 %v8091_v6 }
  0x28   :  { %137 = vmatpush1.bf16.msra.mxu0 %v8077_v2  ;;  %v8098_v8 = vld [vmem:[%s9445_s1 + $0x20] ss:$16 sps:$4 sm:$0xff]   ;;  %178 = vmatpush1.bf16.msra.mxu1 %v8093_v7  ;;  %v8103_v9 = vld [vmem:[#allocation4 + $0xc] ss:$16 sps:$4 sm:$0xff]   ;;  %v8105_v10 = vld [vmem:[#allocation4 + $0x8] ss:$16 sps:$4 sm:$0xff]  }
  0x29   :  { %138 = vmatprep.subr.bf16.mxu0 %v8080_v3  ;;  %v8111_v11 = vld [vmem:[%s9445_s1 + $0x4] ss:$16 sps:$4 sm:$0xff]   ;;  %v8116_v12 = vld [vmem:[%s9445_s1] ss:$16 sps:$4 sm:$0xff]   ;;  %179 = vmatprep.subr.bf16.mxu1 %v8103_v9  ;;  %v8122_v13 = vld [vmem:[%s9445_s1 + $0x2c] ss:$16 sps:$4 sm:$0xff]  }
  0x2a   :  { %v8128_v14 = vld [vmem:[%s9445_s1 + $0x28] ss:$16 sps:$4 sm:$0xff]   ;;  %v8133_v15 = vld [vmem:[%s9445_s1 + $0xc] ss:$16 sps:$4 sm:$0xff]   ;;  %v62_v16 = vld [vmem:[%s9444_s0] sm:$0xf] }
  0x2b   :  { %v8146_v17 = vld [vmem:[%s9445_s1 + $0x8] ss:$16 sps:$4 sm:$0xff]   ;;  %v333_v19 = vshrl.u32 %v332_v18, 7  ;;  %v79_v24 = vld [vmem:[#allocation6] sm:$0xf] }
  0x2c   :  { %139 = vmatpush1.bf16.msra.mxu0 %v8083_v4  ;;  %180 = vmatpush1.bf16.msra.mxu1 %v8105_v10 }
  0x2d   :  { %261 = vmatprep.subr.bf16.mxu0 %v8088_v5  ;;  %302 = vmatprep.subr.bf16.mxu1 %v8122_v13  ;;  %v8168_v22 = vsub.s32 0, %v333_v19  ;;  %v8173_v32 = vsub.s32 1, %v333_v19  ;;  %v8180_v47 = vsub.s32 3, %v333_v19  ;;  %v8182_v48 = vsub.s32 2, %v333_v19 }
  0x2f   :  { %157 = vmatmul.mubr.bf16.vlgmr.msra.gmra.mxu0 %v9450_v0  ;;  %198 = vmatmul.mubr.bf16.vlgmr.msra.gmra.mxu1 %v9450_v0  ;;  %9489 = vst [vmem:[#allocation9_spill] sm:$0xff] %v8168_v22  ;;  %v8171_v28 = vrot.slane %v79_v24, %v8168_v22  ;;  %9490 = vst [vmem:[#allocation10_spill] sm:$0xff] %v8173_v32  ;;  %v8177_v40 = vrot.slane %v79_v24, %v8173_v32 }
  0x30   :  { %262 = vmatpush1.bf16.msra.mxu0 %v8098_v8  ;;  %281 = vmatprep.mubr.bf16.mxu0 %v9450_v0  ;;  %v8185_v50 = vrot.slane %v79_v24, %v8180_v47  ;;  %v8188_v53 = vrot.slane %v79_v24, %v8182_v48  ;;  %v8204_v24 = vld [vmem:[#allocation4 + $0x6c] ss:$16 sps:$4 sm:$0xff]  }
  0x31   :  { %263 = vmatprep.subr.bf16.mxu0 %v8111_v11  ;;  %303 = vmatpush1.bf16.msra.mxu1 %v8128_v14 }
  0x32   :  { %304 = vmatprep.subr.bf16.mxu1 %v8133_v15  ;;  %322 = vmatprep.mubr.bf16.mxu1 %v9450_v0 }
  0x34   :  { %264 = vmatpush1.bf16.msra.mxu0 %v8116_v12 }
  0x35   :  { %389 = vmatprep.subr.bf16.mxu0 %v8075_v1  ;;  %305 = vmatpush1.bf16.msra.mxu1 %v8146_v17 }
  0x36   :  { %430 = vmatprep.subr.bf16.mxu1 %v8091_v6 }
  0x37   :  { %7109 = vmatmul.mubr.msk.bf16.vlgmr.msra.gmra.mxu0 %vm120_vm0, %v62_v16 }
  0x38   :  { %390 = vmatpush1.bf16.msra.mxu0 %v8077_v2  ;;  %409 = vmatprep.mubr.bf16.mxu0 %v9450_v0 }
  0x39   :  { %391 = vmatprep.subr.bf16.mxu0 %v8080_v3  ;;  %7110 = vmatmul.mubr.msk.bf16.vlgmr.msra.gmra.mxu1 %vm120_vm0, %v62_v16 }
  0x3a   :  { %431 = vmatpush1.bf16.msra.mxu1 %v8093_v7  ;;  %450 = vmatprep.mubr.bf16.mxu1 %v9450_v0 }
  0x3b   :  { %432 = vmatprep.subr.bf16.mxu1 %v8103_v9 }
  0x3c   :  { %392 = vmatpush1.bf16.msra.mxu0 %v8083_v4 }
  0x3d   :  { %474 = vmatprep.subr.bf16.mxu0 %v8088_v5 }
  0x3e   :  { %433 = vmatpush1.bf16.msra.mxu1 %v8105_v10 }
  0x3f   :  { %515 = vmatprep.subr.bf16.mxu1 %v8122_v13 }
  0xef   :  { %v158_v20 = vpop.f32.mrf.mxu0  ;;  %v199_v25 = vpop.f32.mrf.mxu1 }
  0xf1   :  { %v160_v21 = vpop.f32.mrf.mxu0  ;;  %v201_v27 = vpop.f32.mrf.mxu1 }
  0xf3   :  { %v162_v23 = vpop.f32.mrf.mxu0  ;;  %v203_v30 = vpop.f32.mrf.mxu1 }
  0xf4   :  { %v8202_v23 = vld [vmem:[#allocation4 + $0x64] ss:$16 sps:$4 sm:$0xff]   ;;  %v8221_v30 = vld [vmem:[#allocation4 + $0x4c] ss:$16 sps:$4 sm:$0xff]  }
  0xf5   :  { %v163_v26 = vpop.f32.mrf.mxu0  ;;  %v204_v34 = vpop.f32.mrf.mxu1 }
  0xf6   :  { %v8213_v26 = vld [vmem:[#allocation4 + $0x60] ss:$16 sps:$4 sm:$0xff]   ;;  %v8233_v34 = vld [vmem:[#allocation2 + $0x24] ss:$16 sps:$4 sm:$0xff]  }
  0xf7   :  { %v283_v29 = vpop.f32.mrf.mxu0 }
  0xf8   :  { %v284_v31 = vadd.f32 %v283_v29, %v158_v20  ;;  %v8219_v29 = vld [vmem:[#allocation4 + $0x44] ss:$16 sps:$4 sm:$0xff]  }
  0xf9   :  { %v285_v33 = vpop.f32.mrf.mxu0  ;;  %v324_v37 = vpop.f32.mrf.mxu1 }
  0xfa   :  { %v352_v35 = vadd.f32 %v8171_v28, %v284_v31  ;;  %v286_v39 = vadd.f32 %v285_v33, %v160_v21  ;;  %v325_v52 = vadd.f32 %v324_v37, %v199_v25  ;;  %v7111_v25 = vld [vmem:[%s9444_s0 + $0x4] sm:$0xf]  ;;  %v8227_v31 = vld [vmem:[#allocation4 + $0x40] ss:$16 sps:$4 sm:$0xff]   ;;  %v8229_v33 = vld [vmem:[#allocation4 + $0x48] ss:$16 sps:$4 sm:$0xff]  }
  0xfb   :  { %v287_v36 = vpop.f32.mrf.mxu0  ;;  %v326_v42 = vpop.f32.mrf.mxu1  ;;  %v8243_v37 = vld [vmem:[#allocation2 + $0x28] ss:$16 sps:$4 sm:$0xff]  }
  0xfc   :  { %v356_v38 = vmul.f32 0.5, %v352_v35  ;;  %v353_v44 = vadd.f32 %v8177_v40, %v286_v39  ;;  %v327_v49 = vadd.f32 %v326_v42, %v201_v27  ;;  %v354_v57 = vadd.f32 %v8188_v53, %v325_v52  ;;  %v8215_v27 = vld [vmem:[#allocation4 + $0x68] ss:$16 sps:$4 sm:$0xff]   ;;  %v8235_v35 = vld [vmem:[#allocation2 + $0x2c] ss:$16 sps:$4 sm:$0xff]  }
  0xfd   :  { %v288_v41 = vpop.f32.mrf.mxu0  ;;  %v328_v43 = vpop.f32.mrf.mxu1  ;;  %v8241_v36 = vld [vmem:[#allocation2 + $0x20] ss:$16 sps:$4 sm:$0xff]   ;;  %v8249_v39 = vld [vmem:[#allocation2 + $0xc] ss:$16 sps:$4 sm:$0xff]   ;;  %v8257_v42 = vld [vmem:[#allocation2 + $0x8] ss:$16 sps:$4 sm:$0xff]  }
  0xfe   :  { %7811 = vtanh.f32 %v356_v38  ;;  %v357_v46 = vmul.f32 0.5, %v353_v44  ;;  %v355_v55 = vadd.f32 %v8185_v50, %v327_v49  ;;  %v8247_v38 = vld [vmem:[#allocation2 + $0x4] ss:$16 sps:$4 sm:$0xff]   ;;  %v8255_v41 = vld [vmem:[#allocation2] ss:$16 sps:$4 sm:$0xff]  }
  0xff   :  { %v329_v45 = vpop.f32.mrf.mxu1 }
 0x100   :  { %7813 = vtanh.f32 %v357_v46 }
 0x10b   :  { %v7812_v51 = vpop.eup %7811 }
 0x10c   :  { %v360_v54 = vmul.f32 0.5, %v7812_v51 }
 0x10d   :  { %v7814_v60 = vpop.eup %7813 }
 0x10e   :  { %v362_v56 = vadd.f32 0.5, %v360_v54  ;;  %v361_v61 = vmul.f32 0.5, %v7814_v60 }
 0x110   :  { %v364_v58 = vmul.f32 %v362_v56, %v355_v55  ;;  %v363_v62 = vadd.f32 0.5, %v361_v61 }
 0x112   :  { %v365_v59 = vadd.f32 %v364_v58, %v354_v57  ;;  %v367_v63 = vsub.f32 1.0, %v363_v62  ;;  %v369_v18 = vmul.f32 0.0, %v363_v62 }
 0x114   :  { %7815 = vtanh.f32 %v365_v59 }
 0x121   :  { %v7816_v16 = vpop.eup %7815 }
 0x122   :  { %v368_v19 = vmul.f32 %v7816_v16, %v367_v63 }
 0x124   :  { %v8192_v20 = vadd.f32 %v369_v18, %v368_v19 }
 0x126   :  { %v373_v21 = vpack.c.bf16 %v8192_v20, %v8192_v20 }
 0x128   :  { %7112 = vmatmul.mubr.msk.bf16.vlgmr.msra.gmra.mxu0 %vm120_vm0, %v373_v21  ;;  %7113 = vmatmul.mubr.msk.bf16.vlgmr.msra.gmra.mxu1 %vm120_vm0, %v373_v21 }
 0x129   :  { %475 = vmatpush1.bf16.msra.mxu0 %v8098_v8  ;;  %516 = vmatpush1.bf16.msra.mxu1 %v8128_v14 }
 0x12a   :  { %476 = vmatprep.subr.bf16.mxu0 %v8111_v11  ;;  %517 = vmatprep.subr.bf16.mxu1 %v8133_v15 }
 0x12b   :  { %494 = vmatprep.mubr.bf16.mxu0 %v9450_v0  ;;  %535 = vmatprep.mubr.bf16.mxu1 %v9450_v0 }
 0x12d   :  { %477 = vmatpush1.bf16.msra.mxu0 %v8116_v12  ;;  %518 = vmatpush1.bf16.msra.mxu1 %v8146_v17 }
 0x12e   :  { %634 = vmatprep.subr.bf16.mxu0 %v8202_v23  ;;  %675 = vmatprep.subr.bf16.mxu1 %v8204_v24 }
 0x130   :  { %7114 = vmatmul.mubr.msk.bf16.vlgmr.msra.gmra.mxu0 %vm120_vm0, %v7111_v25  ;;  %7115 = vmatmul.mubr.msk.bf16.vlgmr.msra.gmra.mxu1 %vm120_vm0, %v7111_v25 }
 0x131   :  { %635 = vmatpush1.bf16.msra.mxu0 %v8213_v26  ;;  %676 = vmatpush1.bf16.msra.mxu1 %v8215_v27 }
 0x132   :  { %636 = vmatprep.subr.bf16.mxu0 %v8219_v29  ;;  %677 = vmatprep.subr.bf16.mxu1 %v8221_v30 }
 0x133   :  { %654 = vmatprep.mubr.bf16.mxu0 %v9450_v0  ;;  %695 = vmatprep.mubr.bf16.mxu1 %v9450_v0 }
 0x135   :  { %637 = vmatpush1.bf16.msra.mxu0 %v8227_v31  ;;  %678 = vmatpush1.bf16.msra.mxu1 %v8229_v33 }
 0x136   :  { %756 = vmatprep.subr.bf16.mxu0 %v8233_v34  ;;  %797 = vmatprep.subr.bf16.mxu1 %v8235_v35 }
 0x138   :  { %655 = vmatmul.mubr.bf16.vlgmr.msra.gmra.mxu0 %v9450_v0  ;;  %696 = vmatmul.mubr.bf16.vlgmr.msra.gmra.mxu1 %v9450_v0 }
 0x139   :  { %757 = vmatpush1.bf16.msra.mxu0 %v8241_v36  ;;  %798 = vmatpush1.bf16.msra.mxu1 %v8243_v37 }
 0x13a   :  { %758 = vmatprep.subr.bf16.mxu0 %v8247_v38  ;;  %799 = vmatprep.subr.bf16.mxu1 %v8249_v39 }
 0x13b   :  { %776 = vmatprep.mubr.bf16.mxu0 %v9450_v0  ;;  %817 = vmatprep.mubr.bf16.mxu1 %v9450_v0 }
 0x13d   :  { %759 = vmatpush1.bf16.msra.mxu0 %v8255_v41  ;;  %800 = vmatpush1.bf16.msra.mxu1 %v8257_v42 }
 0x13e   :  { %884 = vmatprep.subr.bf16.mxu0 %v8075_v1  ;;  %925 = vmatprep.subr.bf16.mxu1 %v8091_v6 }
 0x140   :  { %7132 = vmatmul.mubr.msk.bf16.vlgmr.msra.gmra.mxu0 %vm120_vm0, %v373_v21  ;;  %7133 = vmatmul.mubr.msk.bf16.vlgmr.msra.gmra.mxu1 %vm120_vm0, %v373_v21 }
 0x141   :  { %885 = vmatpush1.bf16.msra.mxu0 %v8077_v2  ;;  %926 = vmatpush1.bf16.msra.mxu1 %v8093_v7 }
 0x142   :  { %886 = vmatprep.subr.bf16.mxu0 %v8080_v3  ;;  %927 = vmatprep.subr.bf16.mxu1 %v8103_v9 }
 0x143   :  { %904 = vmatprep.mubr.bf16.mxu0 %v9450_v0  ;;  %945 = vmatprep.mubr.bf16.mxu1 %v9450_v0 }
 0x145   :  { %887 = vmatpush1.bf16.msra.mxu0 %v8083_v4  ;;  %928 = vmatpush1.bf16.msra.mxu1 %v8105_v10 }
 0x146   :  { %969 = vmatprep.subr.bf16.mxu0 %v8088_v5  ;;  %1010 = vmatprep.subr.bf16.mxu1 %v8122_v13 }
 0x1e8   :  { %v411_v1 = vpop.f32.mrf.mxu0  ;;  %v452_v2 = vpop.f32.mrf.mxu1 }
 0x1ea   :  { %v413_v43 = vpop.f32.mrf.mxu0  ;;  %v454_v44 = vpop.f32.mrf.mxu1 }
 0x1ec   :  { %v415_v45 = vpop.f32.mrf.mxu0  ;;  %v456_v3 = vpop.f32.mrf.mxu1 }
 0x1ee   :  { %v416_v46 = vpop.f32.mrf.mxu0  ;;  %v457_v49 = vpop.f32.mrf.mxu1 }
 0x1f0   :  { %v496_v51 = vpop.f32.mrf.mxu0  ;;  %v537_v52 = vpop.f32.mrf.mxu1 }
 0x1f1   :  { %v497_v54 = vadd.f32 %v496_v51, %v411_v1  ;;  %v581_v1 = vld [vmem:[#allocation6 + $0x4] sm:$0xf] }
 0x1f2   :  { %v498_v55 = vpop.f32.mrf.mxu0  ;;  %v539_v56 = vpop.f32.mrf.mxu1  ;;  %v8282_v49 = vrot.slane %v581_v1, %v8168_v22 }
 0x1f3   :  { %v544_v4 = vadd.f32 %v497_v54, %v8171_v28  ;;  %v499_v59 = vadd.f32 %v498_v55, %v413_v43 }
 0x1f4   :  { %v500_v57 = vpop.f32.mrf.mxu0  ;;  %v541_v58 = vpop.f32.mrf.mxu1 }
 0x1f5   :  { %v548_v5 = vmul.f32 0.5, %v544_v4  ;;  %v545_v16 = vadd.f32 %v499_v59, %v8177_v40  ;;  %v540_v57 = vadd.f32 %v539_v56, %v454_v44  ;;  %v8286_v59 = vrot.slane %v581_v1, %v8173_v32 }
 0x1f6   :  { %v501_v60 = vpop.f32.mrf.mxu0  ;;  %v542_v61 = vpop.f32.mrf.mxu1 }
 0x1f7   :  { %7817 = vtanh.f32 %v548_v5  ;;  %v549_v45 = vmul.f32 0.5, %v545_v16  ;;  %v538_v16 = vadd.f32 %v537_v52, %v452_v2  ;;  %v8292_v52 = vrot.slane %v581_v1, %v8180_v47 }
 0x1f8   :  { %v656_v62 = vpop.f32.mrf.mxu0  ;;  %v697_v63 = vpop.f32.mrf.mxu1 }
 0x1f9   :  { %7819 = vtanh.f32 %v549_v45  ;;  %v547_v45 = vadd.f32 %v540_v57, %v8185_v50  ;;  %v546_v44 = vadd.f32 %v538_v16, %v8188_v53  ;;  %v8295_v57 = vrot.slane %v581_v1, %v8182_v48 }
 0x1fa   :  { %v658_v18 = vpop.f32.mrf.mxu0  ;;  %v699_v19 = vpop.f32.mrf.mxu1 }
 0x1fc   :  { %v660_v21 = vpop.f32.mrf.mxu0  ;;  %v701_v25 = vpop.f32.mrf.mxu1 }
 0x1fe   :  { %v661_v3 = vpop.f32.mrf.mxu0  ;;  %v702_v46 = vpop.f32.mrf.mxu1 }
 0x200   :  { %v778_v51 = vpop.f32.mrf.mxu0  ;;  %v819_v43 = vpop.f32.mrf.mxu1 }
 0x201   :  { %v779_v54 = vadd.f32 %v778_v51, %v656_v62 }
 0x202   :  { %v780_v55 = vpop.f32.mrf.mxu0  ;;  %v821_v4 = vpop.f32.mrf.mxu1 }
 0x203   :  { %v847_v58 = vadd.f32 %v8282_v49, %v779_v54  ;;  %v781_v3 = vadd.f32 %v780_v55, %v658_v18  ;;  %v822_v2 = vadd.f32 %v821_v4, %v699_v19  ;;  %v820_v55 = vadd.f32 %v819_v43, %v697_v63 }
 0x204   :  { %v7818_v5 = vpop.eup %7817  ;;  %v782_v60 = vpop.f32.mrf.mxu0 }
 0x205   :  { %v823_v61 = vpop.f32.mrf.mxu1  ;;  %v552_v21 = vmul.f32 0.5, %v7818_v5  ;;  %v851_v25 = vmul.f32 0.5, %v847_v58  ;;  %v848_v51 = vadd.f32 %v8286_v59, %v781_v3  ;;  %v850_v5 = vadd.f32 %v8292_v52, %v822_v2  ;;  %v8357_v2 = vld [vmem:[#allocation4 + $0x8c] ss:$16 sps:$4 sm:$0xff]  }
 0x206   :  { %v783_v46 = vpop.f32.mrf.mxu0  ;;  %v7820_v60 = vpop.eup %7819 }
 0x207   :  { %v824_v0 = vpop.f32.mrf.mxu1  ;;  %v554_v62 = vadd.f32 0.5, %v552_v21  ;;  %7821 = vtanh.f32 %v851_v25  ;;  %v852_v32 = vmul.f32 0.5, %v848_v51  ;;  %v553_v61 = vmul.f32 0.5, %v7820_v60  ;;  %v8343_v51 = vld [vmem:[#allocation4 + $0xac] ss:$16 sps:$4 sm:$0xff]  }
 0x208   :  { %v849_v25 = vadd.f32 %v8295_v57, %v820_v55  ;;  %v8351_v60 = vld [vmem:[#allocation4 + $0xa8] ss:$16 sps:$4 sm:$0xff]   ;;  %v8369_v55 = vld [vmem:[#allocation2 + $0x64] ss:$16 sps:$4 sm:$0xff]  }
 0x209   :  { %v556_v56 = vmul.f32 %v554_v62, %v547_v45  ;;  %v555_v18 = vadd.f32 0.5, %v553_v61  ;;  %v8355_v61 = vld [vmem:[#allocation4 + $0x84] ss:$16 sps:$4 sm:$0xff]  }
 0x20b   :  { %v557_v54 = vadd.f32 %v556_v56, %v546_v44  ;;  %v559_v21 = vsub.f32 1.0, %v555_v18  ;;  %v7134_v44 = vld [vmem:[%s9444_s0 + $0x8] sm:$0xf]  ;;  %v8341_v56 = vld [vmem:[#allocation4 + $0xa4] ss:$16 sps:$4 sm:$0xff]  }
 0x20d   :  { %7823 = vtanh.f32 %v557_v54  ;;  %v8349_v54 = vld [vmem:[#allocation4 + $0xa0] ss:$16 sps:$4 sm:$0xff]  }
 0x20e   :  { %7825 = vtanh.f32 %v852_v32  ;;  %v561_v32 = vmul.f32 %v555_v18, %v8192_v20  ;;  %v9491_v20 = vmov 0   ;;  %v8365_v18 = vld [vmem:[#allocation4 + $0x88] ss:$16 sps:$4 sm:$0xff]  }
 0x214   :  { %v7822_v0 = vpop.eup %7821 }
 0x215   :  { %v855_v58 = vmul.f32 0.5, %v7822_v0  ;;  %v8363_v0 = vld [vmem:[#allocation4 + $0x80] ss:$16 sps:$4 sm:$0xff]  }
 0x217   :  { %v857_v16 = vadd.f32 0.5, %v855_v58  ;;  %v8371_v58 = vld [vmem:[#allocation2 + $0x6c] ss:$16 sps:$4 sm:$0xff]  }
 0x218   :  { %9492 = vst [vmem:[#allocation11_spill] sm:$0xff] %v8371_v58 }
 0x219   :  { %v859_v3 = vmul.f32 %v857_v16, %v850_v5  ;;  %v8377_v5 = vld [vmem:[#allocation2 + $0x60] ss:$16 sps:$4 sm:$0xff]   ;;  %v8379_v16 = vld [vmem:[#allocation2 + $0x68] ss:$16 sps:$4 sm:$0xff]  }
 0x21a   :  { %v7824_v46 = vpop.eup %7823  ;;  %9493 = vst [vmem:[#allocation12_spill] sm:$0xff] %v8377_v5  ;;  %9494 = vst [vmem:[#allocation13_spill] sm:$0xff] %v8379_v16 }
 0x21b   :  { %v860_v19 = vadd.f32 %v859_v3, %v849_v25  ;;  %v560_v4 = vmul.f32 %v7824_v46, %v559_v21  ;;  %v7826_v63 = vpop.eup %7825  ;;  %v8383_v21 = vld [vmem:[#allocation2 + $0x44] ss:$16 sps:$4 sm:$0xff]   ;;  %v8385_v25 = vld [vmem:[#allocation2 + $0x4c] ss:$16 sps:$4 sm:$0xff]   ;;  %v8391_v3 = vld [vmem:[#allocation2 + $0x40] ss:$16 sps:$4 sm:$0xff]  }
 0x21c   :  { %v856_v43 = vmul.f32 0.5, %v7826_v63  ;;  %9495 = vst [vmem:[#allocation14_spill] sm:$0xff] %v8383_v21  ;;  %9496 = vst [vmem:[#allocation15_spill] sm:$0xff] %v8385_v25  ;;  %v8393_v46 = vld [vmem:[#allocation2 + $0x48] ss:$16 sps:$4 sm:$0xff]  }
 0x21d   :  { %7827 = vtanh.f32 %v860_v19  ;;  %v8300_v45 = vadd.f32 %v561_v32, %v560_v4  ;;  %9497 = vst [vmem:[#allocation16_spill] sm:$0xff] %v8391_v3  ;;  %9498 = vst [vmem:[#allocation17_spill] sm:$0xff] %v8393_v46  ;;  %v7955_v32 = vld [vmem:[#allocation4 + $0x24] ss:$16 sps:$4 sm:$0xff]   ;;  %v7956_v19 = vld [vmem:[#allocation4 + $0x20] ss:$16 sps:$4 sm:$0xff]  }
 0x21e   :  { %v858_v62 = vadd.f32 0.5, %v856_v43  ;;  %v7957_v4 = vld [vmem:[#allocation4 + $0x4] ss:$16 sps:$4 sm:$0xff]   ;;  %v7958_v63 = vld [vmem:[#allocation4] ss:$16 sps:$4 sm:$0xff]  }
 0x21f   :  { %v868_v1 = vpack.c.bf16 %v8300_v45, %v8300_v45 }
 0x221   :  { %7135 = vmatmul.mubr.msk.bf16.vlgmr.msra.gmra.mxu0 %vm120_vm0, %v868_v1  ;;  %7136 = vmatmul.mubr.msk.bf16.vlgmr.msra.gmra.mxu1 %vm120_vm0, %v868_v1 }
 0x222   :  { %970 = vmatpush1.bf16.msra.mxu0 %v8098_v8  ;;  %1011 = vmatpush1.bf16.msra.mxu1 %v8128_v14  ;;  %v862_v8 = vsub.f32 1.0, %v858_v62 }
 0x223   :  { %971 = vmatprep.subr.bf16.mxu0 %v8111_v11  ;;  %1012 = vmatprep.subr.bf16.mxu1 %v8133_v15 }
 0x224   :  { %989 = vmatprep.mubr.bf16.mxu0 %v9491_v20  ;;  %1030 = vmatprep.mubr.bf16.mxu1 %v9491_v20 }
 0x226   :  { %972 = vmatpush1.bf16.msra.mxu0 %v8116_v12  ;;  %1013 = vmatpush1.bf16.msra.mxu1 %v8146_v17  ;;  %v864_v12 = vmul.f32 0.0, %v858_v62 }
 0x227   :  { %1074 = vmatprep.subr.bf16.mxu0 %v8202_v23  ;;  %1115 = vmatprep.subr.bf16.mxu1 %v8204_v24 }
 0x229   :  { %7137 = vmatmul.mubr.msk.bf16.vlgmr.msra.gmra.mxu0 %vm120_vm0, %v7134_v44  ;;  %7138 = vmatmul.mubr.msk.bf16.vlgmr.msra.gmra.mxu1 %vm120_vm0, %v7134_v44 }
 0x22a   :  { %v7828_v11 = vpop.eup %7827  ;;  %1075 = vmatpush1.bf16.msra.mxu0 %v8213_v26  ;;  %1116 = vmatpush1.bf16.msra.mxu1 %v8215_v27 }
 0x22b   :  { %1076 = vmatprep.subr.bf16.mxu0 %v8219_v29  ;;  %1117 = vmatprep.subr.bf16.mxu1 %v8221_v30  ;;  %v863_v14 = vmul.f32 %v7828_v11, %v862_v8 }
 0x22c   :  { %1094 = vmatprep.mubr.bf16.mxu0 %v9491_v20  ;;  %1135 = vmatprep.mubr.bf16.mxu1 %v9491_v20 }
 0x22d   :  { %v8327_v15 = vadd.f32 %v864_v12, %v863_v14 }
 0x22e   :  { %1077 = vmatpush1.bf16.msra.mxu0 %v8227_v31  ;;  %1118 = vmatpush1.bf16.msra.mxu1 %v8229_v33 }
 0x22f   :  { %v1058_v17 = vpack.c.bf16 %v8327_v15, %v8327_v15  ;;  %1156 = vmatprep.subr.bf16.mxu0 %v8233_v34  ;;  %1197 = vmatprep.subr.bf16.mxu1 %v8235_v35 }
 0x231   :  { %7139 = vmatmul.mubr.msk.bf16.vlgmr.msra.gmra.mxu0 %vm120_vm0, %v1058_v17  ;;  %7140 = vmatmul.mubr.msk.bf16.vlgmr.msra.gmra.mxu1 %vm120_vm0, %v1058_v17 }
 0x232   :  { %1157 = vmatpush1.bf16.msra.mxu0 %v8241_v36  ;;  %1198 = vmatpush1.bf16.msra.mxu1 %v8243_v37 }
 0x233   :  { %1158 = vmatprep.subr.bf16.mxu0 %v8247_v38  ;;  %1199 = vmatprep.subr.bf16.mxu1 %v8249_v39 }
 0x234   :  { %1176 = vmatprep.mubr.bf16.mxu0 %v9491_v20  ;;  %1217 = vmatprep.mubr.bf16.mxu1 %v9491_v20 }
 0x236   :  { %1159 = vmatpush1.bf16.msra.mxu0 %v8255_v41  ;;  %1200 = vmatpush1.bf16.msra.mxu1 %v8257_v42 }
 0x237   :  { %1317 = vmatprep.subr.bf16.mxu0 %v8341_v56  ;;  %1358 = vmatprep.subr.bf16.mxu1 %v8343_v51 }
 0x239   :  { %7141 = vmatmul.mubr.msk.bf16.vlgmr.msra.gmra.mxu0 %vm120_vm0, %v868_v1  ;;  %7142 = vmatmul.mubr.msk.bf16.vlgmr.msra.gmra.mxu1 %vm120_vm0, %v868_v1 }
 0x23a   :  { %1318 = vmatpush1.bf16.msra.mxu0 %v8349_v54  ;;  %1359 = vmatpush1.bf16.msra.mxu1 %v8351_v60 }
 0x23b   :  { %1319 = vmatprep.subr.bf16.mxu0 %v8355_v61  ;;  %1360 = vmatprep.subr.bf16.mxu1 %v8357_v2 }
 0x23c   :  { %1337 = vmatprep.mubr.bf16.mxu0 %v9491_v20  ;;  %1378 = vmatprep.mubr.bf16.mxu1 %v9491_v20 }
 0x23e   :  { %1320 = vmatpush1.bf16.msra.mxu0 %v8363_v0  ;;  %1361 = vmatpush1.bf16.msra.mxu1 %v8365_v18 }
 0x23f   :  { %1439 = vmatprep.subr.bf16.mxu0 %v8369_v55  ;;  %1480 = vmatprep.subr.bf16.mxu1 %v8371_v58 }
 0x241   :  { %1338 = vmatmul.mubr.bf16.vlgmr.msra.gmra.mxu0 %v9491_v20  ;;  %1379 = vmatmul.mubr.bf16.vlgmr.msra.gmra.mxu1 %v9491_v20 }
 0x242   :  { %1440 = vmatpush1.bf16.msra.mxu0 %v8377_v5  ;;  %1481 = vmatpush1.bf16.msra.mxu1 %v8379_v16 }
 0x243   :  { %1441 = vmatprep.subr.bf16.mxu0 %v8383_v21  ;;  %1482 = vmatprep.subr.bf16.mxu1 %v8385_v25 }
 0x244   :  { %1459 = vmatprep.mubr.bf16.mxu0 %v9491_v20  ;;  %1500 = vmatprep.mubr.bf16.mxu1 %v9491_v20 }
 0x246   :  { %1442 = vmatpush1.bf16.msra.mxu0 %v8391_v3  ;;  %1483 = vmatpush1.bf16.msra.mxu1 %v8393_v46 }
 0x247   :  { %1625 = vmatprep.subr.bf16.mxu0 %v7955_v32  ;;  %1666 = vmatprep.subr.bf16.mxu1 %v8091_v6  ;;  %v8413_v6 = vld [vmem:[%s9445_s1 + $0x24] ss:$16 sps:$4 sm:$0xff]  }
 0x248   :  { %9499 = vst [vmem:[#allocation18_spill] sm:$0xff] %v8413_v6 }
 0x249   :  { %7159 = vmatmul.mubr.msk.bf16.vlgmr.msra.gmra.mxu0 %vm120_vm0, %v1058_v17  ;;  %7160 = vmatmul.mubr.msk.bf16.vlgmr.msra.gmra.mxu1 %vm120_vm0, %v1058_v17 }
 0x24a   :  { %1626 = vmatpush1.bf16.msra.mxu0 %v7956_v19  ;;  %1667 = vmatpush1.bf16.msra.mxu1 %v8093_v7 }
 0x24b   :  { %1627 = vmatprep.subr.bf16.mxu0 %v7957_v4  ;;  %1668 = vmatprep.subr.bf16.mxu1 %v8103_v9 }
 0x24c   :  { %1645 = vmatprep.mubr.bf16.mxu0 %v9491_v20  ;;  %1686 = vmatprep.mubr.bf16.mxu1 %v9491_v20 }
 0x24e   :  { %1628 = vmatpush1.bf16.msra.mxu0 %v7958_v63  ;;  %1669 = vmatpush1.bf16.msra.mxu1 %v8105_v10 }
 0x24f   :  { %1791 = vmatprep.subr.bf16.mxu1 %v8122_v13  ;;  %1750 = vmatprep.subr.bf16.mxu0 %v8413_v6 }
 0x2e1   :  { %v906_v7 = vpop.f32.mrf.mxu0  ;;  %v947_v1 = vpop.f32.mrf.mxu1 }
 0x2e3   :  { %v908_v9 = vpop.f32.mrf.mxu0  ;;  %v949_v43 = vpop.f32.mrf.mxu1 }
 0x2e5   :  { %v910_v62 = vpop.f32.mrf.mxu0  ;;  %v951_v44 = vpop.f32.mrf.mxu1 }
 0x2e7   :  { %v911_v8 = vpop.f32.mrf.mxu0  ;;  %v952_v11 = vpop.f32.mrf.mxu1 }
 0x2e9   :  { %v991_v12 = vpop.f32.mrf.mxu0  ;;  %v1032_v14 = vpop.f32.mrf.mxu1 }
 0x2ea   :  { %v992_v10 = vadd.f32 %v991_v12, %v906_v7 }
 0x2eb   :  { %v993_v17 = vpop.f32.mrf.mxu0  ;;  %v1034_v13 = vpop.f32.mrf.mxu1 }
 0x2ec   :  { %v1039_v32 = vadd.f32 %v992_v10, %v8171_v28  ;;  %v994_v46 = vadd.f32 %v993_v17, %v908_v9 }
 0x2ed   :  { %v995_v19 = vpop.f32.mrf.mxu0  ;;  %v1036_v4 = vpop.f32.mrf.mxu1 }
 0x2ee   :  { %v1043_v63 = vmul.f32 0.5, %v1039_v32  ;;  %v1040_v62 = vadd.f32 %v994_v46, %v8177_v40  ;;  %v1033_v40 = vadd.f32 %v1032_v14, %v947_v1 }
 0x2ef   :  { %v996_v6 = vpop.f32.mrf.mxu0  ;;  %v1037_v3 = vpop.f32.mrf.mxu1 }
 0x2f0   :  { %7829 = vtanh.f32 %v1043_v63  ;;  %v1044_v7 = vmul.f32 0.5, %v1040_v62  ;;  %v1035_v6 = vadd.f32 %v1034_v13, %v949_v43 }
 0x2f1   :  { %v1096_v25 = vpop.f32.mrf.mxu0  ;;  %v1137_v21 = vpop.f32.mrf.mxu1 }
 0x2f2   :  { %7831 = vtanh.f32 %v1044_v7 }
 0x2f3   :  { %v1098_v44 = vpop.f32.mrf.mxu0  ;;  %v1139_v8 = vpop.f32.mrf.mxu1 }
 0x2f5   :  { %v1100_v11 = vpop.f32.mrf.mxu0  ;;  %v1141_v16 = vpop.f32.mrf.mxu1 }
 0x2f7   :  { %v1101_v12 = vpop.f32.mrf.mxu0  ;;  %v1142_v5 = vpop.f32.mrf.mxu1 }
 0x2f8   :  { %v1042_v5 = vadd.f32 %v1035_v6, %v8185_v50 }
 0x2f9   :  { %v1178_v58 = vpop.f32.mrf.mxu0  ;;  %v1219_v28 = vpop.f32.mrf.mxu1 }
 0x2fa   :  { %v1179_v10 = vadd.f32 %v1178_v58, %v1096_v25  ;;  %v1041_v25 = vadd.f32 %v1033_v40, %v8188_v53 }
 0x2fb   :  { %v1180_v32 = vpop.f32.mrf.mxu0  ;;  %v1221_v9 = vpop.f32.mrf.mxu1 }
 0x2fc   :  { %v1226_v3 = vadd.f32 %v1179_v10, %v8282_v49  ;;  %v1181_v11 = vadd.f32 %v1180_v32, %v1098_v44  ;;  %v8424_v44 = vld [vmem:[#allocation6 + $0x8] sm:$0xf] }
 0x2fd   :  { %v7830_v17 = vpop.eup %7829  ;;  %v1182_v19 = vpop.f32.mrf.mxu0 }
 0x2fe   :  { %v1223_v4 = vpop.f32.mrf.mxu1  ;;  %v1047_v46 = vmul.f32 0.5, %v7830_v17  ;;  %v1230_v63 = vmul.f32 0.5, %v1226_v3  ;;  %v1227_v49 = vadd.f32 %v1181_v11, %v8286_v59  ;;  %v1513_v19 = vrot.slane %v8424_v44, %v8168_v22 }
 0x2ff   :  { %v1183_v16 = vpop.f32.mrf.mxu0  ;;  %v7832_v50 = vpop.eup %7831  ;;  %v1222_v11 = vadd.f32 %v1221_v9, %v1139_v8 }
 0x300   :  { %v1224_v62 = vpop.f32.mrf.mxu1  ;;  %v1049_v12 = vadd.f32 0.5, %v1047_v46  ;;  %7833 = vtanh.f32 %v1230_v63  ;;  %v1231_v32 = vmul.f32 0.5, %v1227_v49  ;;  %v1048_v40 = vmul.f32 0.5, %v7832_v50 }
 0x301   :  { %v1339_v7 = vpop.f32.mrf.mxu0 }
 0x302   :  { %v8420_v58 = vpop.f32.mrf.mxu1  ;;  %v1051_v43 = vmul.f32 %v1049_v12, %v1042_v5  ;;  %v1220_v5 = vadd.f32 %v1219_v28, %v1137_v21  ;;  %v9500_v12 = vld [vmem:[#allocation10_spill] sm:$0xff] }
 0x303   :  { %v1341_v13 = vpop.f32.mrf.mxu0 }
 0x304   :  { %v1382_v10 = vpop.f32.mrf.mxu1  ;;  %v1052_v1 = vadd.f32 %v1051_v43, %v1041_v25  ;;  %v1517_v25 = vrot.slane %v8424_v44, %v9500_v12  ;;  %v1228_v8 = vadd.f32 %v1220_v5, %v8295_v57  ;;  %v8447_v57 = vld [vmem:[%s9445_s1 + $0x4] ss:$16 sps:$4 sm:$0xff]   ;;  %v1525_v5 = vrot.slane %v8424_v44, %v8180_v47 }
 0x305   :  { %v1343_v14 = vpop.f32.mrf.mxu0 }
 0x306   :  { %v1384_v3 = vpop.f32.mrf.mxu1  ;;  %7835 = vtanh.f32 %v1052_v1  ;;  %v1050_v1 = vadd.f32 0.5, %v1048_v40 }
 0x307   :  { %v1344_v6 = vpop.f32.mrf.mxu0  ;;  %7837 = vtanh.f32 %v1231_v32  ;;  %v1229_v32 = vadd.f32 %v1222_v11, %v8292_v52  ;;  %v8460_v11 = vld [vmem:[%s9445_s1] ss:$16 sps:$4 sm:$0xff]  }
 0x308   :  { %v1385_v17 = vpop.f32.mrf.mxu1  ;;  %v1054_v50 = vsub.f32 1.0, %v1050_v1 }
 0x309   :  { %v1461_v4 = vpop.f32.mrf.mxu0 }
 0x30a   :  { %v1502_v53 = vpop.f32.mrf.mxu1  ;;  %v1462_v59 = vadd.f32 %v1461_v4, %v1339_v7 }
 0x30b   :  { %v1463_v46 = vpop.f32.mrf.mxu0 }
 0x30c   :  { %v1504_v63 = vpop.f32.mrf.mxu1  ;;  %v1530_v16 = vadd.f32 %v1513_v19, %v1462_v59  ;;  %v1464_v6 = vadd.f32 %v1463_v46, %v1341_v13  ;;  %v1056_v19 = vmul.f32 %v1050_v1, %v8300_v45  ;;  %v7959_v46 = vld [vmem:[%s9445_s1 + $0x28] ss:$16 sps:$4 sm:$0xff]   ;;  %v1503_v1 = vadd.f32 %v1502_v53, %v8420_v58 }
 0x30d   :  { %v7834_v62 = vpop.eup %7833  ;;  %v1465_v43 = vpop.f32.mrf.mxu0 }
 0x30e   :  { %v1506_v49 = vpop.f32.mrf.mxu1  ;;  %v1234_v14 = vmul.f32 0.5, %v7834_v62  ;;  %v1534_v3 = vmul.f32 0.5, %v1530_v16  ;;  %v1531_v21 = vadd.f32 %v1517_v25, %v1464_v6  ;;  %v1505_v62 = vadd.f32 %v1504_v63, %v1382_v10  ;;  %v7960_v25 = vld [vmem:[%s9445_s1 + $0xc] ss:$16 sps:$4 sm:$0xff]  }
 0x30f   :  { %v1466_v17 = vpop.f32.mrf.mxu0  ;;  %v1521_v10 = vrot.slane %v8424_v44, %v8182_v48 }
 0x310   :  { %v1507_v22 = vpop.f32.mrf.mxu1  ;;  %v1236_v7 = vadd.f32 0.5, %v1234_v14  ;;  %7839 = vtanh.f32 %v1534_v3  ;;  %v1535_v40 = vmul.f32 0.5, %v1531_v21  ;;  %v7961_v14 = vld [vmem:[%s9445_s1 + $0x8] ss:$16 sps:$4 sm:$0xff]   ;;  %v7161_v3 = vld [vmem:[%s9444_s0 + $0xc] sm:$0xf]  ;;  %v1533_v6 = vadd.f32 %v1525_v5, %v1505_v62 }
 0x311   :  { %v8438_v22 = vld [vmem:[%s9445_s1 + $0x20] ss:$16 sps:$4 sm:$0xff]   ;;  %v1532_v44 = vadd.f32 %v1521_v10, %v1503_v1  ;;  %v8576_v21 = vld [vmem:[%s9445_s1 + $0x2c] ss:$16 sps:$4 sm:$0xff]  }
 0x312   :  { %v1238_v9 = vmul.f32 %v1236_v7, %v1229_v32  ;;  %v9509_v62 = vld [vmem:[#allocation9_spill] sm:$0xff] }
 0x313   :  { %v7836_v28 = vpop.eup %7835 }
 0x314   :  { %v1239_v4 = vadd.f32 %v1238_v9, %v1228_v8  ;;  %v1055_v59 = vmul.f32 %v7836_v28, %v1054_v50  ;;  %v7838_v13 = vpop.eup %7837  ;;  %v9508_v9 = vld [vmem:[#allocation18_spill] sm:$0xff] }
 0x315   :  { %v1235_v45 = vmul.f32 0.5, %v7838_v13 }
 0x316   :  { %7841 = vtanh.f32 %v1239_v4  ;;  %v8433_v16 = vadd.f32 %v1056_v19, %v1055_v59 }
 0x317   :  { %7843 = vtanh.f32 %v1535_v40  ;;  %v1237_v49 = vadd.f32 0.5, %v1235_v45 }
 0x318   :  { %v8442_v52 = vpack.c.bf16 %v8433_v16, %v8433_v16 }
 0x319   :  { %v1241_v58 = vsub.f32 1.0, %v1237_v49  ;;  %v1243_v7 = vmul.f32 %v1237_v49, %v8327_v15  ;;  %v9506_v15 = vld [vmem:[#allocation16_spill] sm:$0xff] }
 0x31a   :  { %7170 = vmatmul.mubr.msk.bf16.vlgmr.msra.gmra.mxu0 %vm120_vm0, %v8442_v52  ;;  %7171 = vmatmul.mubr.msk.bf16.vlgmr.msra.gmra.mxu1 %vm120_vm0, %v8442_v52 }
 0x31b   :  { %1751 = vmatpush1.bf16.msra.mxu0 %v8438_v22  ;;  %1792 = vmatpush1.bf16.msra.mxu1 %v7959_v46 }
 0x31c   :  { %1752 = vmatprep.subr.bf16.mxu0 %v8447_v57  ;;  %1793 = vmatprep.subr.bf16.mxu1 %v7960_v25 }
 0x31d   :  { %v7840_v43 = vpop.eup %7839  ;;  %1770 = vmatprep.mubr.bf16.mxu0 %v9491_v20  ;;  %1811 = vmatprep.mubr.bf16.mxu1 %v9491_v20 }
 0x31e   :  { %v1538_v63 = vmul.f32 0.5, %v7840_v43 }
 0x31f   :  { %1753 = vmatpush1.bf16.msra.mxu0 %v8460_v11  ;;  %1794 = vmatpush1.bf16.msra.mxu1 %v7961_v14 }
 0x320   :  { %v1540_v17 = vadd.f32 0.5, %v1538_v63  ;;  %1933 = vmatprep.subr.bf16.mxu0 %v8202_v23  ;;  %1974 = vmatprep.subr.bf16.mxu1 %v8204_v24 }
 0x322   :  { %v1542_v53 = vmul.f32 %v1540_v17, %v1533_v6  ;;  %7180 = vmatmul.mubr.msk.bf16.vlgmr.msra.gmra.mxu0 %vm120_vm0, %v7161_v3  ;;  %7181 = vmatmul.mubr.msk.bf16.vlgmr.msra.gmra.mxu1 %vm120_vm0, %v7161_v3 }
 0x323   :  { %v7842_v32 = vpop.eup %7841  ;;  %1934 = vmatpush1.bf16.msra.mxu0 %v8213_v26  ;;  %1975 = vmatpush1.bf16.msra.mxu1 %v8215_v27 }
 0x324   :  { %v1543_v50 = vadd.f32 %v1542_v53, %v1532_v44  ;;  %1935 = vmatprep.subr.bf16.mxu0 %v8219_v29  ;;  %1976 = vmatprep.subr.bf16.mxu1 %v8221_v30  ;;  %v1242_v23 = vmul.f32 %v7842_v32, %v1241_v58  ;;  %v7844_v8 = vpop.eup %7843 }
 0x325   :  { %1953 = vmatprep.mubr.bf16.mxu0 %v9491_v20  ;;  %1994 = vmatprep.mubr.bf16.mxu1 %v9491_v20  ;;  %v1539_v27 = vmul.f32 0.5, %v7844_v8 }
 0x326   :  { %7845 = vtanh.f32 %v1543_v50  ;;  %v8491_v24 = vadd.f32 %v1243_v7, %v1242_v23 }
 0x327   :  { %1936 = vmatpush1.bf16.msra.mxu0 %v8227_v31  ;;  %1977 = vmatpush1.bf16.msra.mxu1 %v8229_v33  ;;  %v1541_v29 = vadd.f32 0.5, %v1539_v27 }
 0x328   :  { %v1877_v26 = vpack.c.bf16 %v8491_v24, %v8491_v24  ;;  %2055 = vmatprep.subr.bf16.mxu0 %v8233_v34  ;;  %2096 = vmatprep.subr.bf16.mxu1 %v8235_v35 }
 0x329   :  { %v1545_v30 = vsub.f32 1.0, %v1541_v29  ;;  %v1547_v33 = vmul.f32 0.0, %v1541_v29  ;;  %v8581_v29 = vld [vmem:[#allocation6 + $0x4] sm:$0xf] }
 0x32a   :  { %7190 = vmatmul.mubr.msk.bf16.vlgmr.msra.gmra.mxu0 %vm120_vm0, %v1877_v26  ;;  %7191 = vmatmul.mubr.msk.bf16.vlgmr.msra.gmra.mxu1 %vm120_vm0, %v1877_v26 }
 0x32b   :  { %2056 = vmatpush1.bf16.msra.mxu0 %v8241_v36  ;;  %2097 = vmatpush1.bf16.msra.mxu1 %v8243_v37  ;;  %v9501_v37 = vld [vmem:[#allocation11_spill] sm:$0xff] }
 0x32c   :  { %2057 = vmatprep.subr.bf16.mxu0 %v8247_v38  ;;  %2098 = vmatprep.subr.bf16.mxu1 %v8249_v39  ;;  %v9502_v38 = vld [vmem:[#allocation12_spill] sm:$0xff]  ;;  %v9503_v39 = vld [vmem:[#allocation13_spill] sm:$0xff] }
 0x32d   :  { %2075 = vmatprep.mubr.bf16.mxu0 %v9491_v20  ;;  %2116 = vmatprep.mubr.bf16.mxu1 %v9491_v20 }
 0x32f   :  { %2058 = vmatpush1.bf16.msra.mxu0 %v8255_v41  ;;  %2099 = vmatpush1.bf16.msra.mxu1 %v8257_v42  ;;  %v9504_v41 = vld [vmem:[#allocation14_spill] sm:$0xff]  ;;  %v9505_v42 = vld [vmem:[#allocation15_spill] sm:$0xff] }
 0x330   :  { %2238 = vmatprep.subr.bf16.mxu0 %v8341_v56  ;;  %2279 = vmatprep.subr.bf16.mxu1 %v8343_v51  ;;  %v9507_v56 = vld [vmem:[#allocation17_spill] sm:$0xff]  ;;  %v8548_v51 = vld [vmem:[#allocation4 + $0x24] ss:$16 sps:$4 sm:$0xff]  }
 0x332   :  { %7200 = vmatmul.mubr.msk.bf16.vlgmr.msra.gmra.mxu0 %vm120_vm0, %v8442_v52  ;;  %7201 = vmatmul.mubr.msk.bf16.vlgmr.msra.gmra.mxu1 %vm120_vm0, %v8442_v52  ;;  %v1568_v52 = vld [vmem:[#allocation6] sm:$0xf] }
 0x333   :  { %v7846_v31 = vpop.eup %7845  ;;  %2239 = vmatpush1.bf16.msra.mxu0 %v8349_v54  ;;  %2280 = vmatpush1.bf16.msra.mxu1 %v8351_v60  ;;  %v8550_v54 = vld [vmem:[#allocation4 + $0x2c] ss:$16 sps:$4 sm:$0xff]   ;;  %v8552_v60 = vld [vmem:[#allocation4 + $0x20] ss:$16 sps:$4 sm:$0xff]   ;;  %v1824_v5 = vrot.slane %v1568_v52, %v9509_v62  ;;  %v1828_v58 = vrot.slane %v1568_v52, %v9500_v12 }
 0x334   :  { %2240 = vmatprep.subr.bf16.mxu0 %v8355_v61  ;;  %2281 = vmatprep.subr.bf16.mxu1 %v8357_v2  ;;  %v1546_v34 = vmul.f32 %v7846_v31, %v1545_v30  ;;  %v8554_v61 = vld [vmem:[#allocation4 + $0x28] ss:$16 sps:$4 sm:$0xff]   ;;  %v8560_v2 = vld [vmem:[#allocation4 + $0x4] ss:$16 sps:$4 sm:$0xff]  }
 0x335   :  { %2258 = vmatprep.mubr.bf16.mxu0 %v9491_v20  ;;  %2299 = vmatprep.mubr.bf16.mxu1 %v9491_v20 }
 0x336   :  { %v8521_v35 = vadd.f32 %v1547_v33, %v1546_v34  ;;  %v2129_v34 = vrot.slane %v8581_v29, %v9509_v62 }
 0x337   :  { %2241 = vmatpush1.bf16.msra.mxu0 %v8363_v0  ;;  %2282 = vmatpush1.bf16.msra.mxu1 %v8365_v18  ;;  %v8562_v0 = vld [vmem:[#allocation4 + $0xc] ss:$16 sps:$4 sm:$0xff]   ;;  %v8564_v18 = vld [vmem:[#allocation4] ss:$16 sps:$4 sm:$0xff]  }
 0x338   :  { %1549 = vst.msk [vmem:[%s9449_s5] sm:$0xff] %vm120_vm0, %v8521_v35  ;;  %v2182_v36 = vpack.c.bf16 %v8521_v35, %v8521_v35  ;;  %2360 = vmatprep.subr.bf16.mxu0 %v8369_v55  ;;  %2401 = vmatprep.subr.bf16.mxu1 %v9501_v37  ;;  %v8566_v55 = vld [vmem:[#allocation4 + $0x8] ss:$16 sps:$4 sm:$0xff]  }
 0x33a   :  { %7210 = vmatmul.mubr.msk.bf16.vlgmr.msra.gmra.mxu0 %vm120_vm0, %v2182_v36  ;;  %7211 = vmatmul.mubr.msk.bf16.vlgmr.msra.gmra.mxu1 %vm120_vm0, %v2182_v36 }
 0x33b   :  { %2361 = vmatpush1.bf16.msra.mxu0 %v9502_v38  ;;  %2402 = vmatpush1.bf16.msra.mxu1 %v9503_v39 }
 0x33c   :  { %2362 = vmatprep.subr.bf16.mxu0 %v9504_v41  ;;  %2403 = vmatprep.subr.bf16.mxu1 %v9505_v42 }
 0x33d   :  { %2380 = vmatprep.mubr.bf16.mxu0 %v9491_v20  ;;  %2421 = vmatprep.mubr.bf16.mxu1 %v9491_v20 }
 0x33f   :  { %2363 = vmatpush1.bf16.msra.mxu0 %v9506_v15  ;;  %2404 = vmatpush1.bf16.msra.mxu1 %v9507_v56  ;;  %v1836_v15 = vrot.slane %v1568_v52, %v8180_v47 }
 0x340   :  { %2547 = vmatprep.subr.bf16.mxu0 %v8548_v51  ;;  %2588 = vmatprep.subr.bf16.mxu1 %v8550_v54 }
 0x342   :  { %7220 = vmatmul.mubr.msk.bf16.vlgmr.msra.gmra.mxu0 %vm120_vm0, %v1877_v26  ;;  %7221 = vmatmul.mubr.msk.bf16.vlgmr.msra.gmra.mxu1 %vm120_vm0, %v1877_v26 }
 0x343   :  { %2567 = vmatprep.mubr.bf16.mxu0 %v9491_v20  ;;  %2608 = vmatprep.mubr.bf16.mxu1 %v9491_v20 }
 0x344   :  { %2548 = vmatpush1.bf16.msra.mxu0 %v8552_v60  ;;  %2589 = vmatpush1.bf16.msra.mxu1 %v8554_v61 }
 0x345   :  { %2549 = vmatprep.subr.bf16.mxu0 %v8560_v2  ;;  %2590 = vmatprep.subr.bf16.mxu1 %v8562_v0 }
 0x348   :  { %2550 = vmatpush1.bf16.msra.mxu0 %v8564_v18  ;;  %2591 = vmatpush1.bf16.msra.mxu1 %v8566_v55 }
 0x349   :  { %2672 = vmatprep.subr.bf16.mxu0 %v9508_v9  ;;  %2713 = vmatprep.subr.bf16.mxu1 %v8576_v21 }
 0x3da   :  { %v1647_v28 = vpop.f32.mrf.mxu0  ;;  %v1688_v19 = vpop.f32.mrf.mxu1 }
 0x3dc   :  { %v1649_v4 = vpop.f32.mrf.mxu0  ;;  %v1690_v59 = vpop.f32.mrf.mxu1 }
 0x3de   :  { %v1651_v40 = vpop.f32.mrf.mxu0  ;;  %v1692_v13 = vpop.f32.mrf.mxu1 }
 0x3e0   :  { %v1652_v45 = vpop.f32.mrf.mxu0  ;;  %v1693_v46 = vpop.f32.mrf.mxu1 }
 0x3e2   :  { %v1772_v25 = vpop.f32.mrf.mxu0  ;;  %v1813_v43 = vpop.f32.mrf.mxu1 }
 0x3e3   :  { %v1773_v49 = vadd.f32 %v1772_v25, %v1647_v28  ;;  %v1832_v28 = vrot.slane %v1568_v52, %v8182_v48  ;;  %v1814_v45 = vadd.f32 %v1813_v43, %v1688_v19  ;;  %v8591_v19 = vld [vmem:[#allocation6 + $0x8] sm:$0xf] }
 0x3e4   :  { %v1774_v1 = vpop.f32.mrf.mxu0  ;;  %v1815_v10 = vpop.f32.mrf.mxu1 }
 0x3e5   :  { %v1841_v63 = vadd.f32 %v1824_v5, %v1773_v49  ;;  %v1775_v17 = vadd.f32 %v1774_v1, %v1649_v4  ;;  %v1816_v42 = vadd.f32 %v1815_v10, %v1690_v59  ;;  %v2133_v4 = vrot.slane %v8581_v29, %v9500_v12 }
 0x3e6   :  { %v1776_v14 = vpop.f32.mrf.mxu0  ;;  %v1817_v3 = vpop.f32.mrf.mxu1 }
 0x3e7   :  { %v1845_v6 = vmul.f32 0.5, %v1841_v63  ;;  %v1842_v50 = vadd.f32 %v1828_v58, %v1775_v17  ;;  %v1844_v63 = vadd.f32 %v1836_v15, %v1816_v42  ;;  %v1843_v3 = vadd.f32 %v1832_v28, %v1814_v45 }
 0x3e8   :  { %v1777_v44 = vpop.f32.mrf.mxu0  ;;  %v1818_v53 = vpop.f32.mrf.mxu1  ;;  %v2141_v42 = vrot.slane %v8581_v29, %v8180_v47  ;;  %v2137_v28 = vrot.slane %v8581_v29, %v8182_v48 }
 0x3e9   :  { %7847 = vtanh.f32 %v1845_v6  ;;  %v1846_v30 = vmul.f32 0.5, %v1842_v50 }
 0x3ea   :  { %v1955_v32 = vpop.f32.mrf.mxu0  ;;  %v1996_v7 = vpop.f32.mrf.mxu1 }
 0x3eb   :  { %7849 = vtanh.f32 %v1846_v30 }
 0x3ec   :  { %v1957_v23 = vpop.f32.mrf.mxu0  ;;  %v1998_v8 = vpop.f32.mrf.mxu1 }
 0x3ee   :  { %v1959_v26 = vpop.f32.mrf.mxu0  ;;  %v2000_v27 = vpop.f32.mrf.mxu1 }
 0x3ef   :  { %v2434_v27 = vrot.slane %v8591_v19, %v9509_v62 }
 0x3f0   :  { %v1960_v31 = vpop.f32.mrf.mxu0  ;;  %v2001_v33 = vpop.f32.mrf.mxu1 }
 0x3f2   :  { %v2077_v36 = vpop.f32.mrf.mxu0  ;;  %v2118_v37 = vpop.f32.mrf.mxu1 }
 0x3f3   :  { %v2078_v38 = vadd.f32 %v2077_v36, %v1955_v32 }
 0x3f4   :  { %v2079_v39 = vpop.f32.mrf.mxu0  ;;  %v2120_v41 = vpop.f32.mrf.mxu1 }
 0x3f5   :  { %v2146_v56 = vadd.f32 %v2129_v34, %v2078_v38  ;;  %v2080_v25 = vadd.f32 %v2079_v39, %v1957_v23  ;;  %v2121_v39 = vadd.f32 %v2120_v41, %v1998_v8 }
 0x3f6   :  { %v7848_v9 = vpop.eup %7847  ;;  %v2081_v40 = vpop.f32.mrf.mxu0 }
 0x3f7   :  { %v2122_v13 = vpop.f32.mrf.mxu1  ;;  %v1849_v46 = vmul.f32 0.5, %v7848_v9  ;;  %v2150_v5 = vmul.f32 0.5, %v2146_v56  ;;  %v2147_v52 = vadd.f32 %v2133_v4, %v2080_v25  ;;  %v2119_v9 = vadd.f32 %v2118_v37, %v1996_v7 }
 0x3f8   :  { %v2082_v49 = vpop.f32.mrf.mxu0  ;;  %v7850_v50 = vpop.eup %7849  ;;  %v2438_v4 = vrot.slane %v8591_v19, %v9500_v12  ;;  %v2149_v41 = vadd.f32 %v2141_v42, %v2121_v39  ;;  %v8649_v39 = vld [vmem:[#allocation4 + $0x68] ss:$16 sps:$4 sm:$0xff]  }
 0x3f9   :  { %v2123_v1 = vpop.f32.mrf.mxu1  ;;  %v1851_v14 = vadd.f32 0.5, %v1849_v46  ;;  %7851 = vtanh.f32 %v2150_v5  ;;  %v2151_v43 = vmul.f32 0.5, %v2147_v52  ;;  %v1850_v33 = vmul.f32 0.5, %v7850_v50  ;;  %v8627_v50 = vld [vmem:[%s9445_s1 + $0x8] ss:$16 sps:$4 sm:$0xff]  }
 0x3fa   :  { %v2260_v59 = vpop.f32.mrf.mxu0 }
 0x3fb   :  { %v8589_v10 = vpop.f32.mrf.mxu1  ;;  %v1853_v6 = vmul.f32 %v1851_v14, %v1844_v63  ;;  %v1852_v45 = vadd.f32 0.5, %v1850_v33  ;;  %v2148_v14 = vadd.f32 %v2137_v28, %v2119_v9  ;;  %v8661_v28 = vld [vmem:[#allocation4 + $0x40] ss:$16 sps:$4 sm:$0xff]  }
 0x3fc   :  { %v2262_v17 = vpop.f32.mrf.mxu0 }
 0x3fd   :  { %v2303_v58 = vpop.f32.mrf.mxu1  ;;  %v1854_v44 = vadd.f32 %v1853_v6, %v1843_v3  ;;  %v1856_v63 = vsub.f32 1.0, %v1852_v45  ;;  %v1858_v29 = vmul.f32 %v1852_v45, %v8433_v16  ;;  %v8616_v16 = vld [vmem:[%s9445_s1 + $0xc] ss:$16 sps:$4 sm:$0xff]  }
 0x3fe   :  { %v2264_v53 = vpop.f32.mrf.mxu0 }
 0x3ff   :  { %v2305_v32 = vpop.f32.mrf.mxu1  ;;  %7853 = vtanh.f32 %v1854_v44 }
 0x400   :  { %v2265_v23 = vpop.f32.mrf.mxu0  ;;  %7855 = vtanh.f32 %v2151_v43 }
 0x401   :  { %v2306_v26 = vpop.f32.mrf.mxu1 }
 0x402   :  { %v2382_v30 = vpop.f32.mrf.mxu0  ;;  %v2446_v26 = vrot.slane %v8591_v19, %v8180_v47 }
 0x403   :  { %v2423_v31 = vpop.f32.mrf.mxu1  ;;  %v2383_v34 = vadd.f32 %v2382_v30, %v2260_v59  ;;  %v8635_v30 = vld [vmem:[#allocation4 + $0x6c] ss:$16 sps:$4 sm:$0xff]  }
 0x404   :  { %v2384_v36 = vpop.f32.mrf.mxu0 }
 0x405   :  { %v2425_v38 = vpop.f32.mrf.mxu1  ;;  %v2451_v15 = vadd.f32 %v2434_v27, %v2383_v34  ;;  %v2385_v25 = vadd.f32 %v2384_v36, %v2262_v17  ;;  %v8607_v17 = vld [vmem:[%s9445_s1 + $0x28] ss:$16 sps:$4 sm:$0xff]   ;;  %v8633_v27 = vld [vmem:[#allocation4 + $0x64] ss:$16 sps:$4 sm:$0xff]   ;;  %v2424_v34 = vadd.f32 %v2423_v31, %v8589_v10 }
 0x406   :  { %v7852_v56 = vpop.eup %7851  ;;  %v2386_v40 = vpop.f32.mrf.mxu0  ;;  %v2426_v23 = vadd.f32 %v2425_v38, %v2303_v58  ;;  %v2442_v58 = vrot.slane %v8591_v19, %v8182_v48  ;;  %v8647_v38 = vld [vmem:[#allocation4 + $0x60] ss:$16 sps:$4 sm:$0xff]   ;;  %v8653_v10 = vld [vmem:[#allocation4 + $0x44] ss:$16 sps:$4 sm:$0xff]   ;;  %v8655_v19 = vld [vmem:[#allocation4 + $0x4c] ss:$16 sps:$4 sm:$0xff]  }
 0x407   :  { %v2427_v13 = vpop.f32.mrf.mxu1  ;;  %v2154_v46 = vmul.f32 0.5, %v7852_v56  ;;  %v2455_v5 = vmul.f32 0.5, %v2451_v15  ;;  %v2452_v37 = vadd.f32 %v2438_v4, %v2385_v25  ;;  %v8663_v4 = vld [vmem:[#allocation4 + $0x48] ss:$16 sps:$4 sm:$0xff]  }
 0x408   :  { %v2387_v49 = vpop.f32.mrf.mxu0  ;;  %v2454_v42 = vadd.f32 %v2446_v26, %v2426_v23  ;;  %v2453_v31 = vadd.f32 %v2442_v58, %v2424_v34 }
 0x409   :  { %v2428_v8 = vpop.f32.mrf.mxu1  ;;  %v2156_v1 = vadd.f32 0.5, %v2154_v46  ;;  %7857 = vtanh.f32 %v2455_v5  ;;  %v2456_v52 = vmul.f32 0.5, %v2452_v37  ;;  %v8668_v46 = vld [vmem:[#allocation2 + $0x24] ss:$16 sps:$4 sm:$0xff]   ;;  %v8670_v5 = vld [vmem:[#allocation2 + $0x2c] ss:$16 sps:$4 sm:$0xff]  }
 0x40a   :  { %v8680_v8 = vld [vmem:[#allocation2 + $0x28] ss:$16 sps:$4 sm:$0xff]  }
 0x40b   :  { %v2158_v7 = vmul.f32 %v2156_v1, %v2149_v41  ;;  %v8688_v1 = vld [vmem:[#allocation2 + $0x4] ss:$16 sps:$4 sm:$0xff]   ;;  %v8700_v37 = vld [vmem:[#allocation2 + $0x8] ss:$16 sps:$4 sm:$0xff]  }
 0x40c   :  { %v7854_v59 = vpop.eup %7853 }
 0x40d   :  { %v2159_v3 = vadd.f32 %v2158_v7, %v2148_v14  ;;  %v1857_v6 = vmul.f32 %v7854_v59, %v1856_v63  ;;  %v7856_v53 = vpop.eup %7855  ;;  %v8690_v63 = vld [vmem:[#allocation2 + $0xc] ss:$16 sps:$4 sm:$0xff]   ;;  %v8698_v7 = vld [vmem:[#allocation2] ss:$16 sps:$4 sm:$0xff]   ;;  %v8704_v59 = vld [vmem:[#allocation4 + $0xa4] ss:$16 sps:$4 sm:$0xff]  }
 0x40e   :  { %v2155_v43 = vmul.f32 0.5, %v7856_v53  ;;  %v8718_v53 = vld [vmem:[#allocation4 + $0x84] ss:$16 sps:$4 sm:$0xff]  }
 0x40f   :  { %7859 = vtanh.f32 %v2159_v3  ;;  %v8602_v44 = vadd.f32 %v1858_v29, %v1857_v6  ;;  %v8706_v29 = vld [vmem:[#allocation4 + $0xac] ss:$16 sps:$4 sm:$0xff]   ;;  %v8712_v6 = vld [vmem:[#allocation4 + $0xa0] ss:$16 sps:$4 sm:$0xff]   ;;  %9510 = vst [vmem:[#allocation10_spill] sm:$0xff] %v8718_v53 }
 0x410   :  { %7861 = vtanh.f32 %v2456_v52  ;;  %v2157_v33 = vadd.f32 0.5, %v2155_v43  ;;  %v8714_v52 = vld [vmem:[#allocation4 + $0xa8] ss:$16 sps:$4 sm:$0xff]   ;;  %v8720_v43 = vld [vmem:[#allocation4 + $0x8c] ss:$16 sps:$4 sm:$0xff]  }
 0x411   :  { %v8611_v32 = vpack.c.bf16 %v8602_v44, %v8602_v44  ;;  %9511 = vst [vmem:[#allocation11_spill] sm:$0xff] %v8720_v43 }
 0x412   :  { %v2163_v40 = vmul.f32 %v2157_v33, %v8491_v24  ;;  %v8678_v24 = vld [vmem:[#allocation2 + $0x20] ss:$16 sps:$4 sm:$0xff]  }
 0x413   :  { %7232 = vmatmul.mubr.msk.bf16.vlgmr.msra.gmra.mxu0 %vm120_vm0, %v8611_v32  ;;  %7233 = vmatmul.mubr.msk.bf16.vlgmr.msra.gmra.mxu1 %vm120_vm0, %v8611_v32 }
 0x414   :  { %2673 = vmatpush1.bf16.msra.mxu0 %v8438_v22  ;;  %2714 = vmatpush1.bf16.msra.mxu1 %v8607_v17 }
 0x415   :  { %2674 = vmatprep.subr.bf16.mxu0 %v8447_v57  ;;  %2715 = vmatprep.subr.bf16.mxu1 %v8616_v16  ;;  %v7223_v57 = vld [vmem:[%s9444_s0 + $0x10] sm:$0xf] }
 0x416   :  { %v7858_v22 = vpop.eup %7857  ;;  %2692 = vmatprep.mubr.bf16.mxu0 %v9491_v20  ;;  %2733 = vmatprep.mubr.bf16.mxu1 %v9491_v20 }
 0x417   :  { %v2459_v36 = vmul.f32 0.5, %v7858_v22  ;;  %v8728_v22 = vld [vmem:[#allocation4 + $0x80] ss:$16 sps:$4 sm:$0xff]  }
 0x418   :  { %2675 = vmatpush1.bf16.msra.mxu0 %v8460_v11  ;;  %2716 = vmatpush1.bf16.msra.mxu1 %v8627_v50  ;;  %v2161_v11 = vsub.f32 1.0, %v2157_v33  ;;  %9512 = vst [vmem:[#allocation12_spill] sm:$0xff] %v8728_v22  ;;  %v8730_v33 = vld [vmem:[#allocation4 + $0x88] ss:$16 sps:$4 sm:$0xff]  }
 0x419   :  { %v2461_v15 = vadd.f32 0.5, %v2459_v36  ;;  %2855 = vmatprep.subr.bf16.mxu0 %v8633_v27  ;;  %2896 = vmatprep.subr.bf16.mxu1 %v8635_v30  ;;  %9513 = vst [vmem:[#allocation13_spill] sm:$0xff] %v8730_v33  ;;  %v8735_v36 = vld [vmem:[#allocation2 + $0x64] ss:$16 sps:$4 sm:$0xff]  }
 0x41a   :  { %9514 = vst [vmem:[#allocation14_spill] sm:$0xff] %v8735_v36 }
 0x41b   :  { %v2463_v56 = vmul.f32 %v2461_v15, %v2454_v42  ;;  %7242 = vmatmul.mubr.msk.bf16.vlgmr.msra.gmra.mxu0 %vm120_vm0, %v7223_v57  ;;  %7243 = vmatmul.mubr.msk.bf16.vlgmr.msra.gmra.mxu1 %vm120_vm0, %v7223_v57  ;;  %v8737_v57 = vld [vmem:[#allocation2 + $0x6c] ss:$16 sps:$4 sm:$0xff]   ;;  %v8747_v42 = vld [vmem:[#allocation2 + $0x68] ss:$16 sps:$4 sm:$0xff]  }
 0x41c   :  { %v7860_v9 = vpop.eup %7859  ;;  %2856 = vmatpush1.bf16.msra.mxu0 %v8647_v38  ;;  %2897 = vmatpush1.bf16.msra.mxu1 %v8649_v39  ;;  %9515 = vst [vmem:[#allocation15_spill] sm:$0xff] %v8737_v57  ;;  %9517 = vst [vmem:[#allocation17_spill] sm:$0xff] %v8747_v42 }
 0x41d   :  { %v2464_v13 = vadd.f32 %v2463_v56, %v2453_v31  ;;  %2857 = vmatprep.subr.bf16.mxu0 %v8653_v10  ;;  %2898 = vmatprep.subr.bf16.mxu1 %v8655_v19  ;;  %v2162_v45 = vmul.f32 %v7860_v9, %v2161_v11  ;;  %v7862_v49 = vpop.eup %7861  ;;  %v8758_v11 = vld [vmem:[#allocation2 + $0x44] ss:$16 sps:$4 sm:$0xff]   ;;  %v8760_v31 = vld [vmem:[#allocation2 + $0x4c] ss:$16 sps:$4 sm:$0xff]   ;;  %v8766_v56 = vld [vmem:[#allocation2 + $0x40] ss:$16 sps:$4 sm:$0xff]  }
 0x41e   :  { %2875 = vmatprep.mubr.bf16.mxu0 %v9491_v20  ;;  %2916 = vmatprep.mubr.bf16.mxu1 %v9491_v20  ;;  %v2460_v14 = vmul.f32 0.5, %v7862_v49  ;;  %9518 = vst [vmem:[#allocation18_spill] sm:$0xff] %v8758_v11  ;;  %9519 = vst [vmem:[#allocation9_spill] sm:$0xff] %v8760_v31  ;;  %v8768_v9 = vld [vmem:[#allocation2 + $0x48] ss:$16 sps:$4 sm:$0xff]  }
 0x41f   :  { %7863 = vtanh.f32 %v2464_v13  ;;  %v8674_v25 = vadd.f32 %v2163_v40, %v2162_v45  ;;  %9520 = vst [vmem:[#allocation19_spill] sm:$0xff] %v8766_v56  ;;  %9521 = vst [vmem:[#allocation20_spill] sm:$0xff] %v8768_v9  ;;  %v2490_v13 = vld [vmem:[#allocation6] sm:$0xf] }
 0x420   :  { %2858 = vmatpush1.bf16.msra.mxu0 %v8661_v28  ;;  %2899 = vmatpush1.bf16.msra.mxu1 %v8663_v4  ;;  %v2462_v3 = vadd.f32 0.5, %v2460_v14 }
 0x421   :  { %v8684_v41 = vpack.c.bf16 %v8674_v25, %v8674_v25  ;;  %2977 = vmatprep.subr.bf16.mxu0 %v8668_v46  ;;  %3018 = vmatprep.subr.bf16.mxu1 %v8670_v5 }
 0x422   :  { %v2466_v23 = vsub.f32 1.0, %v2462_v3  ;;  %v2468_v34 = vmul.f32 %v2462_v3, %v8521_v35  ;;  %v8745_v35 = vld [vmem:[#allocation2 + $0x60] ss:$16 sps:$4 sm:$0xff]  }
 0x423   :  { %7252 = vmatmul.mubr.msk.bf16.vlgmr.msra.gmra.mxu0 %vm120_vm0, %v8684_v41  ;;  %7253 = vmatmul.mubr.msk.bf16.vlgmr.msra.gmra.mxu1 %vm120_vm0, %v8684_v41  ;;  %9516 = vst [vmem:[#allocation16_spill] sm:$0xff] %v8745_v35 }
 0x424   :  { %2978 = vmatpush1.bf16.msra.mxu0 %v8678_v24  ;;  %3019 = vmatpush1.bf16.msra.mxu1 %v8680_v8 }
 0x425   :  { %2979 = vmatprep.subr.bf16.mxu0 %v8688_v1  ;;  %3020 = vmatprep.subr.bf16.mxu1 %v8690_v63 }
 0x426   :  { %2997 = vmatprep.mubr.bf16.mxu0 %v9491_v20  ;;  %3038 = vmatprep.mubr.bf16.mxu1 %v9491_v20 }
 0x428   :  { %2980 = vmatpush1.bf16.msra.mxu0 %v8698_v7  ;;  %3021 = vmatpush1.bf16.msra.mxu1 %v8700_v37 }
 0x429   :  { %3160 = vmatprep.subr.bf16.mxu0 %v8704_v59  ;;  %3201 = vmatprep.subr.bf16.mxu1 %v8706_v29 }
 0x42b   :  { %7262 = vmatmul.mubr.msk.bf16.vlgmr.msra.gmra.mxu0 %vm120_vm0, %v8611_v32  ;;  %7263 = vmatmul.mubr.msk.bf16.vlgmr.msra.gmra.mxu1 %vm120_vm0, %v8611_v32 }
 0x42c   :  { %v7864_v26 = vpop.eup %7863  ;;  %3161 = vmatpush1.bf16.msra.mxu0 %v8712_v6  ;;  %3202 = vmatpush1.bf16.msra.mxu1 %v8714_v52 }
 0x42d   :  { %3162 = vmatprep.subr.bf16.mxu0 %v8718_v53  ;;  %3203 = vmatprep.subr.bf16.mxu1 %v8720_v43  ;;  %v2467_v58 = vmul.f32 %v7864_v26, %v2466_v23 }
 0x42e   :  { %3180 = vmatprep.mubr.bf16.mxu0 %v9491_v20  ;;  %3221 = vmatprep.mubr.bf16.mxu1 %v9491_v20 }
 0x42f   :  { %v8741_v32 = vadd.f32 %v2468_v34, %v2467_v58 }
 0x430   :  { %3163 = vmatpush1.bf16.msra.mxu0 %v8728_v22  ;;  %3204 = vmatpush1.bf16.msra.mxu1 %v8730_v33 }
 0x431   :  { %7222 = vst.msk [vmem:[%s9449_s5 + $0x8] sm:$0xff] %vm120_vm0, %v8741_v32  ;;  %v3104_v15 = vpack.c.bf16 %v8741_v32, %v8741_v32  ;;  %3282 = vmatprep.subr.bf16.mxu0 %v8735_v36  ;;  %3323 = vmatprep.subr.bf16.mxu1 %v8737_v57 }
 0x433   :  { %7272 = vmatmul.mubr.msk.bf16.vlgmr.msra.gmra.mxu0 %vm120_vm0, %v3104_v15  ;;  %7273 = vmatmul.mubr.msk.bf16.vlgmr.msra.gmra.mxu1 %vm120_vm0, %v3104_v15 }
 0x434   :  { %3283 = vmatpush1.bf16.msra.mxu0 %v8745_v35  ;;  %3324 = vmatpush1.bf16.msra.mxu1 %v8747_v42 }
 0x435   :  { %3284 = vmatprep.subr.bf16.mxu0 %v8758_v11  ;;  %3325 = vmatprep.subr.bf16.mxu1 %v8760_v31 }
 0x436   :  { %3302 = vmatprep.mubr.bf16.mxu0 %v9491_v20  ;;  %3343 = vmatprep.mubr.bf16.mxu1 %v9491_v20 }
 0x438   :  { %3285 = vmatpush1.bf16.msra.mxu0 %v8766_v56  ;;  %3326 = vmatpush1.bf16.msra.mxu1 %v8768_v9 }
 0x439   :  { %3469 = vmatprep.subr.bf16.mxu0 %v8548_v51  ;;  %3510 = vmatprep.subr.bf16.mxu1 %v8550_v54  ;;  %v8794_v51 = vld [vmem:[%s9445_s1 + $0x24] ss:$16 sps:$4 sm:$0xff]  }
 0x43a   :  { %9522 = vst [vmem:[#allocation21_spill] sm:$0xff] %v8794_v51 }
 0x43b   :  { %7282 = vmatmul.mubr.msk.bf16.vlgmr.msra.gmra.mxu0 %vm120_vm0, %v8684_v41  ;;  %7283 = vmatmul.mubr.msk.bf16.vlgmr.msra.gmra.mxu1 %vm120_vm0, %v8684_v41 }
 0x43c   :  { %3470 = vmatpush1.bf16.msra.mxu0 %v8552_v60  ;;  %3511 = vmatpush1.bf16.msra.mxu1 %v8554_v61 }
 0x43d   :  { %3471 = vmatprep.subr.bf16.mxu0 %v8560_v2  ;;  %3512 = vmatprep.subr.bf16.mxu1 %v8562_v0 }
 0x43e   :  { %3489 = vmatprep.mubr.bf16.mxu0 %v9491_v20  ;;  %3530 = vmatprep.mubr.bf16.mxu1 %v9491_v20 }
 0x440   :  { %3472 = vmatpush1.bf16.msra.mxu0 %v8564_v18  ;;  %3513 = vmatpush1.bf16.msra.mxu1 %v8566_v55  ;;  %v2746_v55 = vrot.slane %v2490_v13, %v9509_v62 }
 0x441   :  { %3635 = vmatprep.subr.bf16.mxu1 %v8576_v21  ;;  %3594 = vmatprep.subr.bf16.mxu0 %v8794_v51  ;;  %v2750_v51 = vrot.slane %v2490_v13, %v9500_v12 }
 0x4d3   :  { %v2569_v54 = vpop.f32.mrf.mxu0  ;;  %v2610_v60 = vpop.f32.mrf.mxu1 }
 0x4d5   :  { %v2571_v61 = vpop.f32.mrf.mxu0  ;;  %v2612_v2 = vpop.f32.mrf.mxu1 }
 0x4d7   :  { %v2573_v0 = vpop.f32.mrf.mxu0  ;;  %v2614_v40 = vpop.f32.mrf.mxu1 }
 0x4d9   :  { %v2574_v45 = vpop.f32.mrf.mxu0  ;;  %v2615_v18 = vpop.f32.mrf.mxu1 }
 0x4db   :  { %v2694_v49 = vpop.f32.mrf.mxu0  ;;  %v2735_v21 = vpop.f32.mrf.mxu1 }
 0x4dc   :  { %v2695_v41 = vadd.f32 %v2694_v49, %v2569_v54  ;;  %v8799_v54 = vld [vmem:[#allocation6 + $0x4] sm:$0xf] }
 0x4dd   :  { %v2696_v14 = vpop.f32.mrf.mxu0  ;;  %v2737_v3 = vpop.f32.mrf.mxu1 }
 0x4de   :  { %v2763_v23 = vadd.f32 %v2746_v55, %v2695_v41  ;;  %v2697_v15 = vadd.f32 %v2696_v14, %v2571_v61  ;;  %v3051_v61 = vrot.slane %v8799_v54, %v9509_v62 }
 0x4df   :  { %v2698_v26 = vpop.f32.mrf.mxu0  ;;  %v2739_v34 = vpop.f32.mrf.mxu1 }
 0x4e0   :  { %v2767_v58 = vmul.f32 0.5, %v2763_v23  ;;  %v2764_v18 = vadd.f32 %v2750_v51, %v2697_v15  ;;  %v2758_v51 = vrot.slane %v2490_v13, %v8180_v47 }
 0x4e1   :  { %v2699_v9 = vpop.f32.mrf.mxu0  ;;  %v2740_v0 = vpop.f32.mrf.mxu1 }
 0x4e2   :  { %7865 = vtanh.f32 %v2767_v58  ;;  %v2768_v49 = vmul.f32 0.5, %v2764_v18  ;;  %v2738_v58 = vadd.f32 %v2737_v3, %v2612_v2  ;;  %v3055_v0 = vrot.slane %v8799_v54, %v9500_v12 }
 0x4e3   :  { %v2877_v40 = vpop.f32.mrf.mxu0  ;;  %v2918_v45 = vpop.f32.mrf.mxu1 }
 0x4e4   :  { %7867 = vtanh.f32 %v2768_v49 }
 0x4e5   :  { %v2879_v56 = vpop.f32.mrf.mxu0  ;;  %v2920_v31 = vpop.f32.mrf.mxu1 }
 0x4e7   :  { %v2881_v11 = vpop.f32.mrf.mxu0  ;;  %v2922_v42 = vpop.f32.mrf.mxu1 }
 0x4e8   :  { %v2754_v42 = vrot.slane %v2490_v13, %v8182_v48 }
 0x4e9   :  { %v2882_v55 = vpop.f32.mrf.mxu0  ;;  %v2923_v41 = vpop.f32.mrf.mxu1 }
 0x4ea   :  { %v2736_v41 = vadd.f32 %v2735_v21, %v2610_v60  ;;  %v8809_v60 = vld [vmem:[#allocation6 + $0x8] sm:$0xf] }
 0x4eb   :  { %v2999_v14 = vpop.f32.mrf.mxu0  ;;  %v3040_v23 = vpop.f32.mrf.mxu1 }
 0x4ec   :  { %v3000_v9 = vadd.f32 %v2999_v14, %v2877_v40  ;;  %v2766_v14 = vadd.f32 %v2758_v51, %v2738_v58 }
 0x4ed   :  { %v3001_v26 = vpop.f32.mrf.mxu0  ;;  %v3042_v34 = vpop.f32.mrf.mxu1 }
 0x4ee   :  { %v3068_v15 = vadd.f32 %v3051_v61, %v3000_v9  ;;  %v3002_v36 = vadd.f32 %v3001_v26, %v2879_v56  ;;  %v2765_v61 = vadd.f32 %v2754_v42, %v2736_v41  ;;  %v3043_v42 = vadd.f32 %v3042_v34, %v2920_v31 }
 0x4ef   :  { %v7866_v11 = vpop.eup %7865  ;;  %v3003_v18 = vpop.f32.mrf.mxu0 }
 0x4f0   :  { %v3044_v55 = vpop.f32.mrf.mxu1  ;;  %v2771_v35 = vmul.f32 0.5, %v7866_v11  ;;  %v3072_v57 = vmul.f32 0.5, %v3068_v15  ;;  %v3069_v13 = vadd.f32 %v3055_v0, %v3002_v36  ;;  %v3063_v0 = vrot.slane %v8799_v54, %v8180_v47 }
 0x4f1   :  { %v3004_v49 = vpop.f32.mrf.mxu0  ;;  %v7868_v21 = vpop.eup %7867 }
 0x4f2   :  { %v3045_v40 = vpop.f32.mrf.mxu1  ;;  %v2773_v33 = vadd.f32 0.5, %v2771_v35  ;;  %7869 = vtanh.f32 %v3072_v57  ;;  %v3073_v56 = vmul.f32 0.5, %v3069_v13  ;;  %v3356_v57 = vrot.slane %v8809_v60, %v9509_v62 }
 0x4f3   :  { %v3182_v2 = vpop.f32.mrf.mxu0  ;;  %v2772_v15 = vmul.f32 0.5, %v7868_v21  ;;  %v3041_v49 = vadd.f32 %v3040_v23, %v2918_v45  ;;  %v3059_v40 = vrot.slane %v8799_v54, %v8182_v48  ;;  %v3071_v34 = vadd.f32 %v3063_v0, %v3043_v42  ;;  %v8845_v0 = vld [vmem:[%s9445_s1] ss:$16 sps:$4 sm:$0xff]  }
 0x4f4   :  { %v8807_v3 = vpop.f32.mrf.mxu1  ;;  %v2775_v9 = vmul.f32 %v2773_v33, %v2766_v14  ;;  %v3360_v14 = vrot.slane %v8809_v60, %v9500_v12 }
 0x4f5   :  { %v3184_v22 = vpop.f32.mrf.mxu0  ;;  %v2774_v13 = vadd.f32 0.5, %v2772_v15 }
 0x4f6   :  { %v3225_v43 = vpop.f32.mrf.mxu1  ;;  %v2776_v53 = vadd.f32 %v2775_v9, %v2765_v61 }
 0x4f7   :  { %v3186_v18 = vpop.f32.mrf.mxu0  ;;  %v2780_v54 = vmul.f32 %v2774_v13, %v8602_v44  ;;  %v8834_v44 = vld [vmem:[%s9445_s1 + $0x4] ss:$16 sps:$4 sm:$0xff]  }
 0x4f8   :  { %v3227_v55 = vpop.f32.mrf.mxu1  ;;  %7871 = vtanh.f32 %v2776_v53 }
 0x4f9   :  { %v3187_v26 = vpop.f32.mrf.mxu0  ;;  %7873 = vtanh.f32 %v3073_v56 }
 0x4fa   :  { %v3228_v58 = vpop.f32.mrf.mxu1  ;;  %v2778_v26 = vsub.f32 1.0, %v2774_v13 }
 0x4fb   :  { %v3304_v35 = vpop.f32.mrf.mxu0  ;;  %v3070_v58 = vadd.f32 %v3059_v40, %v3041_v49  ;;  %v3368_v49 = vrot.slane %v8809_v60, %v8180_v47 }
 0x4fc   :  { %v3345_v51 = vpop.f32.mrf.mxu1  ;;  %v3305_v33 = vadd.f32 %v3304_v35, %v3182_v2 }
 0x4fd   :  { %v3306_v36 = vpop.f32.mrf.mxu0 }
 0x4fe   :  { %v3347_v11 = vpop.f32.mrf.mxu1  ;;  %v3373_v41 = vadd.f32 %v3356_v57, %v3305_v33  ;;  %v3307_v55 = vadd.f32 %v3306_v36, %v3184_v22  ;;  %v8825_v22 = vld [vmem:[%s9445_s1 + $0x20] ss:$16 sps:$4 sm:$0xff]  }
 0x4ff   :  { %v7870_v53 = vpop.eup %7869  ;;  %v3308_v61 = vpop.f32.mrf.mxu0 }
 0x500   :  { %v3349_v9 = vpop.f32.mrf.mxu1  ;;  %v3076_v18 = vmul.f32 0.5, %v7870_v53  ;;  %v3377_v2 = vmul.f32 0.5, %v3373_v41  ;;  %v3374_v23 = vadd.f32 %v3360_v14, %v3307_v55  ;;  %v3348_v53 = vadd.f32 %v3347_v11, %v3225_v43 }
 0x501   :  { %v3309_v56 = vpop.f32.mrf.mxu0  ;;  %v3364_v9 = vrot.slane %v8809_v60, %v8182_v48 }
 0x502   :  { %v3350_v31 = vpop.f32.mrf.mxu1  ;;  %v3078_v21 = vadd.f32 0.5, %v3076_v18  ;;  %7875 = vtanh.f32 %v3377_v2  ;;  %v3378_v61 = vmul.f32 0.5, %v3374_v23  ;;  %v3376_v43 = vadd.f32 %v3368_v49, %v3348_v53  ;;  %v9534_v56 = vld [vmem:[#allocation20_spill] sm:$0xff]  ;;  %v8946_v23 = vld [vmem:[#allocation4] ss:$16 sps:$4 sm:$0xff]  }
 0x503   :  { %v8930_v31 = vld [vmem:[#allocation4 + $0x24] ss:$16 sps:$4 sm:$0xff]   ;;  %v3412_v49 = vld [vmem:[#allocation6] sm:$0xf] }
 0x504   :  { %v3080_v45 = vmul.f32 %v3078_v21, %v3071_v34  ;;  %v8932_v34 = vld [vmem:[#allocation4 + $0x2c] ss:$16 sps:$4 sm:$0xff]   ;;  %v8934_v21 = vld [vmem:[#allocation4 + $0x20] ss:$16 sps:$4 sm:$0xff]  }
 0x505   :  { %v7872_v57 = vpop.eup %7871 }
 0x506   :  { %v3081_v35 = vadd.f32 %v3080_v45, %v3070_v58  ;;  %v2779_v33 = vmul.f32 %v7872_v57, %v2778_v26  ;;  %v7874_v41 = vpop.eup %7873  ;;  %v8936_v26 = vld [vmem:[#allocation4 + $0x28] ss:$16 sps:$4 sm:$0xff]   ;;  %v8942_v58 = vld [vmem:[#allocation4 + $0x4] ss:$16 sps:$4 sm:$0xff]   ;;  %v8944_v45 = vld [vmem:[#allocation4 + $0xc] ss:$16 sps:$4 sm:$0xff]  }
 0x507   :  { %v3077_v42 = vmul.f32 0.5, %v7874_v41  ;;  %v8948_v57 = vld [vmem:[#allocation4 + $0x8] ss:$16 sps:$4 sm:$0xff]  }
 0x508   :  { %7877 = vtanh.f32 %v3081_v35  ;;  %v8820_v15 = vadd.f32 %v2780_v54, %v2779_v33  ;;  %v9535_v54 = vld [vmem:[#allocation21_spill] sm:$0xff] }
 0x509   :  { %7879 = vtanh.f32 %v3378_v61  ;;  %v3079_v14 = vadd.f32 0.5, %v3077_v42  ;;  %v8958_v35 = vld [vmem:[%s9445_s1 + $0x2c] ss:$16 sps:$4 sm:$0xff]  }
 0x50a   :  { %v8829_v36 = vpack.c.bf16 %v8820_v15, %v8820_v15 }
 0x50b   :  { %v3083_v18 = vsub.f32 1.0, %v3079_v14 }
 0x50c   :  { %7294 = vmatmul.mubr.msk.bf16.vlgmr.msra.gmra.mxu0 %vm120_vm0, %v8829_v36  ;;  %7295 = vmatmul.mubr.msk.bf16.vlgmr.msra.gmra.mxu1 %vm120_vm0, %v8829_v36 }
 0x50d   :  { %3595 = vmatpush1.bf16.msra.mxu0 %v8825_v22  ;;  %3636 = vmatpush1.bf16.msra.mxu1 %v8607_v17  ;;  %v3346_v17 = vadd.f32 %v3345_v51, %v8807_v3 }
 0x50e   :  { %3596 = vmatprep.subr.bf16.mxu0 %v8834_v44  ;;  %3637 = vmatprep.subr.bf16.mxu1 %v8616_v16  ;;  %v7285_v16 = vld [vmem:[%s9444_s0 + $0x14] sm:$0xf] }
 0x50f   :  { %v7876_v40 = vpop.eup %7875  ;;  %3614 = vmatprep.mubr.bf16.mxu0 %v9491_v20  ;;  %3655 = vmatprep.mubr.bf16.mxu1 %v9491_v20  ;;  %v3375_v3 = vadd.f32 %v3364_v9, %v3346_v17  ;;  %v3668_v17 = vrot.slane %v3412_v49, %v9509_v62 }
 0x510   :  { %v3381_v13 = vmul.f32 0.5, %v7876_v40 }
 0x511   :  { %3597 = vmatpush1.bf16.msra.mxu0 %v8845_v0  ;;  %3638 = vmatpush1.bf16.msra.mxu1 %v8627_v50  ;;  %v3085_v50 = vmul.f32 %v3079_v14, %v8674_v25  ;;  %v9524_v25 = vld [vmem:[#allocation11_spill] sm:$0xff] }
 0x512   :  { %v3383_v11 = vadd.f32 0.5, %v3381_v13  ;;  %3777 = vmatprep.subr.bf16.mxu0 %v8633_v27  ;;  %3818 = vmatprep.subr.bf16.mxu1 %v8635_v30 }
 0x514   :  { %v3385_v51 = vmul.f32 %v3383_v11, %v3376_v43  ;;  %7304 = vmatmul.mubr.msk.bf16.vlgmr.msra.gmra.mxu0 %vm120_vm0, %v7285_v16  ;;  %7305 = vmatmul.mubr.msk.bf16.vlgmr.msra.gmra.mxu1 %vm120_vm0, %v7285_v16 }
 0x515   :  { %v7878_v60 = vpop.eup %7877  ;;  %3778 = vmatpush1.bf16.msra.mxu0 %v8647_v38  ;;  %3819 = vmatpush1.bf16.msra.mxu1 %v8649_v39 }
 0x516   :  { %v3386_v2 = vadd.f32 %v3385_v51, %v3375_v3  ;;  %3779 = vmatprep.subr.bf16.mxu0 %v8653_v10  ;;  %3820 = vmatprep.subr.bf16.mxu1 %v8655_v19  ;;  %v3084_v27 = vmul.f32 %v7878_v60, %v3083_v18  ;;  %v7880_v55 = vpop.eup %7879 }
 0x517   :  { %3797 = vmatprep.mubr.bf16.mxu0 %v9491_v20  ;;  %3838 = vmatprep.mubr.bf16.mxu1 %v9491_v20  ;;  %v3382_v39 = vmul.f32 0.5, %v7880_v55 }
 0x518   :  { %7881 = vtanh.f32 %v3386_v2  ;;  %v8872_v30 = vadd.f32 %v3085_v50, %v3084_v27  ;;  %v3672_v2 = vrot.slane %v3412_v49, %v9500_v12 }
 0x519   :  { %3780 = vmatpush1.bf16.msra.mxu0 %v8661_v28  ;;  %3821 = vmatpush1.bf16.msra.mxu1 %v8663_v4  ;;  %v3384_v10 = vadd.f32 0.5, %v3382_v39 }
 0x51a   :  { %v3721_v38 = vpack.c.bf16 %v8872_v30, %v8872_v30  ;;  %3899 = vmatprep.subr.bf16.mxu0 %v8668_v46  ;;  %3940 = vmatprep.subr.bf16.mxu1 %v8670_v5  ;;  %v9523_v5 = vld [vmem:[#allocation10_spill] sm:$0xff] }
 0x51b   :  { %v3388_v19 = vsub.f32 1.0, %v3384_v10  ;;  %v3390_v4 = vmul.f32 %v3384_v10, %v8741_v32  ;;  %v9533_v32 = vld [vmem:[#allocation19_spill] sm:$0xff] }
 0x51c   :  { %7314 = vmatmul.mubr.msk.bf16.vlgmr.msra.gmra.mxu0 %vm120_vm0, %v3721_v38  ;;  %7315 = vmatmul.mubr.msk.bf16.vlgmr.msra.gmra.mxu1 %vm120_vm0, %v3721_v38 }
 0x51d   :  { %3900 = vmatpush1.bf16.msra.mxu0 %v8678_v24  ;;  %3941 = vmatpush1.bf16.msra.mxu1 %v8680_v8  ;;  %v9525_v8 = vld [vmem:[#allocation12_spill] sm:$0xff] }
 0x51e   :  { %3901 = vmatprep.subr.bf16.mxu0 %v8688_v1  ;;  %3942 = vmatprep.subr.bf16.mxu1 %v8690_v63  ;;  %v9526_v1 = vld [vmem:[#allocation13_spill] sm:$0xff] }
 0x51f   :  { %3919 = vmatprep.mubr.bf16.mxu0 %v9491_v20  ;;  %3960 = vmatprep.mubr.bf16.mxu1 %v9491_v20 }
 0x521   :  { %3902 = vmatpush1.bf16.msra.mxu0 %v8698_v7  ;;  %3943 = vmatpush1.bf16.msra.mxu1 %v8700_v37  ;;  %v9527_v7 = vld [vmem:[#allocation14_spill] sm:$0xff]  ;;  %v9528_v37 = vld [vmem:[#allocation15_spill] sm:$0xff] }
 0x522   :  { %4082 = vmatprep.subr.bf16.mxu0 %v8704_v59  ;;  %4123 = vmatprep.subr.bf16.mxu1 %v8706_v29  ;;  %v9529_v59 = vld [vmem:[#allocation16_spill] sm:$0xff]  ;;  %v9530_v29 = vld [vmem:[#allocation17_spill] sm:$0xff] }
 0x524   :  { %7324 = vmatmul.mubr.msk.bf16.vlgmr.msra.gmra.mxu0 %vm120_vm0, %v8829_v36  ;;  %7325 = vmatmul.mubr.msk.bf16.vlgmr.msra.gmra.mxu1 %vm120_vm0, %v8829_v36 }
 0x525   :  { %v7882_v28 = vpop.eup %7881  ;;  %4083 = vmatpush1.bf16.msra.mxu0 %v8712_v6  ;;  %4124 = vmatpush1.bf16.msra.mxu1 %v8714_v52  ;;  %v9531_v6 = vld [vmem:[#allocation18_spill] sm:$0xff]  ;;  %v9532_v52 = vld [vmem:[#allocation9_spill] sm:$0xff] }
 0x526   :  { %v3389_v46 = vmul.f32 %v7882_v28, %v3388_v19  ;;  %4084 = vmatprep.subr.bf16.mxu0 %v9523_v5  ;;  %4125 = vmatprep.subr.bf16.mxu1 %v9524_v25  ;;  %v8963_v5 = vld [vmem:[#allocation6 + $0x4] sm:$0xf] }
 0x527   :  { %4102 = vmatprep.mubr.bf16.mxu0 %v9491_v20  ;;  %4143 = vmatprep.mubr.bf16.mxu1 %v9491_v20 }
 0x528   :  { %v8903_v24 = vadd.f32 %v3390_v4, %v3389_v46 }
 0x529   :  { %4085 = vmatpush1.bf16.msra.mxu0 %v9525_v8  ;;  %4126 = vmatpush1.bf16.msra.mxu1 %v9526_v1 }
 0x52a   :  { %7284 = vst.msk [vmem:[%s9449_s5 + $0x10] sm:$0xff] %vm120_vm0, %v8903_v24  ;;  %v4026_v63 = vpack.c.bf16 %v8903_v24, %v8903_v24  ;;  %4204 = vmatprep.subr.bf16.mxu0 %v9527_v7  ;;  %4245 = vmatprep.subr.bf16.mxu1 %v9528_v37 }
 0x52c   :  { %7334 = vmatmul.mubr.msk.bf16.vlgmr.msra.gmra.mxu0 %vm120_vm0, %v4026_v63  ;;  %7335 = vmatmul.mubr.msk.bf16.vlgmr.msra.gmra.mxu1 %vm120_vm0, %v4026_v63  ;;  %v3973_v63 = vrot.slane %v8963_v5, %v9509_v62 }
 0x52d   :  { %4205 = vmatpush1.bf16.msra.mxu0 %v9529_v59  ;;  %4246 = vmatpush1.bf16.msra.mxu1 %v9530_v29 }
 0x52e   :  { %4206 = vmatprep.subr.bf16.mxu0 %v9531_v6  ;;  %4247 = vmatprep.subr.bf16.mxu1 %v9532_v52 }
 0x52f   :  { %4224 = vmatprep.mubr.bf16.mxu0 %v9491_v20  ;;  %4265 = vmatprep.mubr.bf16.mxu1 %v9491_v20 }
 0x531   :  { %4207 = vmatpush1.bf16.msra.mxu0 %v9533_v32  ;;  %4248 = vmatpush1.bf16.msra.mxu1 %v9534_v56  ;;  %v3680_v32 = vrot.slane %v3412_v49, %v8180_v47 }
 0x532   :  { %4391 = vmatprep.subr.bf16.mxu0 %v8930_v31  ;;  %4432 = vmatprep.subr.bf16.mxu1 %v8932_v34 }
 0x534   :  { %7344 = vmatmul.mubr.msk.bf16.vlgmr.msra.gmra.mxu0 %vm120_vm0, %v3721_v38  ;;  %7345 = vmatmul.mubr.msk.bf16.vlgmr.msra.gmra.mxu1 %vm120_vm0, %v3721_v38 }
 0x535   :  { %4411 = vmatprep.mubr.bf16.mxu0 %v9491_v20  ;;  %4452 = vmatprep.mubr.bf16.mxu1 %v9491_v20 }
 0x536   :  { %4392 = vmatpush1.bf16.msra.mxu0 %v8934_v21  ;;  %4433 = vmatpush1.bf16.msra.mxu1 %v8936_v26 }
 0x537   :  { %4393 = vmatprep.subr.bf16.mxu0 %v8942_v58  ;;  %4434 = vmatprep.subr.bf16.mxu1 %v8944_v45 }
 0x53a   :  { %4394 = vmatpush1.bf16.msra.mxu0 %v8946_v23  ;;  %4435 = vmatpush1.bf16.msra.mxu1 %v8948_v57 }
 0x53b   :  { %4516 = vmatprep.subr.bf16.mxu0 %v9535_v54  ;;  %4557 = vmatprep.subr.bf16.mxu1 %v8958_v35 }
 0x5cc   :  { %v3491_v33 = vpop.f32.mrf.mxu0  ;;  %v3532_v61 = vpop.f32.mrf.mxu1 }
 0x5ce   :  { %v3493_v41 = vpop.f32.mrf.mxu0  ;;  %v3534_v36 = vpop.f32.mrf.mxu1 }
 0x5d0   :  { %v3495_v42 = vpop.f32.mrf.mxu0  ;;  %v3536_v53 = vpop.f32.mrf.mxu1 }
 0x5d2   :  { %v3496_v40 = vpop.f32.mrf.mxu0  ;;  %v3537_v14 = vpop.f32.mrf.mxu1 }
 0x5d4   :  { %v3616_v9 = vpop.f32.mrf.mxu0  ;;  %v3657_v13 = vpop.f32.mrf.mxu1 }
 0x5d5   :  { %v3617_v16 = vadd.f32 %v3616_v9, %v3491_v33  ;;  %v3676_v33 = vrot.slane %v3412_v49, %v8182_v48  ;;  %v3658_v40 = vadd.f32 %v3657_v13, %v3532_v61  ;;  %v8973_v61 = vld [vmem:[#allocation6 + $0x8] sm:$0xf] }
 0x5d6   :  { %v3618_v43 = vpop.f32.mrf.mxu0  ;;  %v3659_v11 = vpop.f32.mrf.mxu1 }
 0x5d7   :  { %v3685_v18 = vadd.f32 %v3668_v17, %v3617_v16  ;;  %v3619_v50 = vadd.f32 %v3618_v43, %v3493_v41  ;;  %v3660_v52 = vadd.f32 %v3659_v11, %v3534_v36  ;;  %v3977_v41 = vrot.slane %v8963_v5, %v9500_v12 }
 0x5d8   :  { %v3620_v3 = vpop.f32.mrf.mxu0  ;;  %v3661_v51 = vpop.f32.mrf.mxu1 }
 0x5d9   :  { %v3689_v60 = vmul.f32 0.5, %v3685_v18  ;;  %v3686_v10 = vadd.f32 %v3672_v2, %v3619_v50  ;;  %v3688_v18 = vadd.f32 %v3680_v32, %v3660_v52  ;;  %v3687_v51 = vadd.f32 %v3676_v33, %v3658_v40 }
 0x5da   :  { %v3621_v27 = vpop.f32.mrf.mxu0  ;;  %v3662_v55 = vpop.f32.mrf.mxu1  ;;  %v3985_v52 = vrot.slane %v8963_v5, %v8180_v47  ;;  %v3981_v33 = vrot.slane %v8963_v5, %v8182_v48 }
 0x5db   :  { %7883 = vtanh.f32 %v3689_v60  ;;  %v3690_v25 = vmul.f32 0.5, %v3686_v10 }
 0x5dc   :  { %v3799_v38 = vpop.f32.mrf.mxu0  ;;  %v3840_v39 = vpop.f32.mrf.mxu1 }
 0x5dd   :  { %7885 = vtanh.f32 %v3690_v25 }
 0x5de   :  { %v3801_v19 = vpop.f32.mrf.mxu0  ;;  %v3842_v28 = vpop.f32.mrf.mxu1 }
 0x5e0   :  { %v3803_v4 = vpop.f32.mrf.mxu0  ;;  %v3844_v46 = vpop.f32.mrf.mxu1 }
 0x5e1   :  { %v4278_v46 = vrot.slane %v8973_v61, %v9509_v62 }
 0x5e2   :  { %v3804_v8 = vpop.f32.mrf.mxu0  ;;  %v3845_v1 = vpop.f32.mrf.mxu1 }
 0x5e4   :  { %v3921_v7 = vpop.f32.mrf.mxu0  ;;  %v3962_v37 = vpop.f32.mrf.mxu1 }
 0x5e5   :  { %v3922_v59 = vadd.f32 %v3921_v7, %v3799_v38 }
 0x5e6   :  { %v3923_v29 = vpop.f32.mrf.mxu0  ;;  %v3964_v6 = vpop.f32.mrf.mxu1 }
 0x5e7   :  { %v3990_v56 = vadd.f32 %v3973_v63, %v3922_v59  ;;  %v3924_v9 = vadd.f32 %v3923_v29, %v3801_v19  ;;  %v3965_v29 = vadd.f32 %v3964_v6, %v3842_v28 }
 0x5e8   :  { %v7884_v54 = vpop.eup %7883  ;;  %v3925_v42 = vpop.f32.mrf.mxu0 }
 0x5e9   :  { %v3966_v53 = vpop.f32.mrf.mxu1  ;;  %v3693_v14 = vmul.f32 0.5, %v7884_v54  ;;  %v3994_v17 = vmul.f32 0.5, %v3990_v56  ;;  %v3991_v49 = vadd.f32 %v3977_v41, %v3924_v9  ;;  %v3963_v54 = vadd.f32 %v3962_v37, %v3840_v39 }
 0x5ea   :  { %v3926_v16 = vpop.f32.mrf.mxu0  ;;  %v7886_v10 = vpop.eup %7885  ;;  %v4282_v41 = vrot.slane %v8973_v61, %v9500_v12  ;;  %v3993_v6 = vadd.f32 %v3985_v52, %v3965_v29  ;;  %v9031_v29 = vld [vmem:[#allocation4 + $0x68] ss:$16 sps:$4 sm:$0xff]  }
 0x5eb   :  { %v3967_v43 = vpop.f32.mrf.mxu1  ;;  %v3695_v3 = vadd.f32 0.5, %v3693_v14  ;;  %7887 = vtanh.f32 %v3994_v17  ;;  %v3995_v13 = vmul.f32 0.5, %v3991_v49  ;;  %v3694_v1 = vmul.f32 0.5, %v7886_v10  ;;  %v9009_v10 = vld [vmem:[%s9445_s1 + $0x8] ss:$16 sps:$4 sm:$0xff]  }
 0x5ec   :  { %v4104_v36 = vpop.f32.mrf.mxu0 }
 0x5ed   :  { %v8971_v11 = vpop.f32.mrf.mxu1  ;;  %v3697_v60 = vmul.f32 %v3695_v3, %v3688_v18  ;;  %v3696_v40 = vadd.f32 0.5, %v3694_v1  ;;  %v3992_v3 = vadd.f32 %v3981_v33, %v3963_v54  ;;  %v9043_v33 = vld [vmem:[#allocation4 + $0x40] ss:$16 sps:$4 sm:$0xff]  }
 0x5ee   :  { %v4106_v50 = vpop.f32.mrf.mxu0 }
 0x5ef   :  { %v4147_v2 = vpop.f32.mrf.mxu1  ;;  %v3698_v27 = vadd.f32 %v3697_v60, %v3687_v51  ;;  %v3700_v18 = vsub.f32 1.0, %v3696_v40  ;;  %v3702_v5 = vmul.f32 %v3696_v40, %v8820_v15  ;;  %v8998_v15 = vld [vmem:[%s9445_s1 + $0xc] ss:$16 sps:$4 sm:$0xff]  }
 0x5f0   :  { %v4108_v55 = vpop.f32.mrf.mxu0 }
 0x5f1   :  { %v4149_v38 = vpop.f32.mrf.mxu1  ;;  %7889 = vtanh.f32 %v3698_v27 }
 0x5f2   :  { %v4109_v19 = vpop.f32.mrf.mxu0  ;;  %7891 = vtanh.f32 %v3995_v13 }
 0x5f3   :  { %v4150_v4 = vpop.f32.mrf.mxu1 }
 0x5f4   :  { %v4226_v25 = vpop.f32.mrf.mxu0  ;;  %v4290_v4 = vrot.slane %v8973_v61, %v8180_v47 }
 0x5f5   :  { %v4267_v8 = vpop.f32.mrf.mxu1  ;;  %v4227_v63 = vadd.f32 %v4226_v25, %v4104_v36  ;;  %v9017_v25 = vld [vmem:[#allocation4 + $0x6c] ss:$16 sps:$4 sm:$0xff]  }
 0x5f6   :  { %v4228_v7 = vpop.f32.mrf.mxu0 }
 0x5f7   :  { %v4269_v59 = vpop.f32.mrf.mxu1  ;;  %v4295_v32 = vadd.f32 %v4278_v46, %v4227_v63  ;;  %v4229_v9 = vadd.f32 %v4228_v7, %v4106_v50  ;;  %v8989_v50 = vld [vmem:[%s9445_s1 + $0x28] ss:$16 sps:$4 sm:$0xff]   ;;  %v9015_v46 = vld [vmem:[#allocation4 + $0x64] ss:$16 sps:$4 sm:$0xff]   ;;  %v4268_v63 = vadd.f32 %v4267_v8, %v8971_v11 }
 0x5f8   :  { %v7888_v56 = vpop.eup %7887  ;;  %v4230_v42 = vpop.f32.mrf.mxu0  ;;  %v4270_v19 = vadd.f32 %v4269_v59, %v4147_v2  ;;  %v4286_v2 = vrot.slane %v8973_v61, %v8182_v48  ;;  %v9029_v59 = vld [vmem:[#allocation4 + $0x60] ss:$16 sps:$4 sm:$0xff]   ;;  %v9035_v11 = vld [vmem:[#allocation4 + $0x44] ss:$16 sps:$4 sm:$0xff]   ;;  %v9037_v61 = vld [vmem:[#allocation4 + $0x4c] ss:$16 sps:$4 sm:$0xff]  }
 0x5f9   :  { %v4271_v53 = vpop.f32.mrf.mxu1  ;;  %v3998_v14 = vmul.f32 0.5, %v7888_v56  ;;  %v4299_v17 = vmul.f32 0.5, %v4295_v32  ;;  %v4296_v37 = vadd.f32 %v4282_v41, %v4229_v9  ;;  %v9045_v41 = vld [vmem:[#allocation4 + $0x48] ss:$16 sps:$4 sm:$0xff]  }
 0x5fa   :  { %v4231_v16 = vpop.f32.mrf.mxu0  ;;  %v4298_v52 = vadd.f32 %v4290_v4, %v4270_v19  ;;  %v4297_v8 = vadd.f32 %v4286_v2, %v4268_v63 }
 0x5fb   :  { %v4272_v28 = vpop.f32.mrf.mxu1  ;;  %v4000_v43 = vadd.f32 0.5, %v3998_v14  ;;  %7893 = vtanh.f32 %v4299_v17  ;;  %v4300_v49 = vmul.f32 0.5, %v4296_v37  ;;  %v9050_v14 = vld [vmem:[#allocation2 + $0x24] ss:$16 sps:$4 sm:$0xff]   ;;  %v9052_v17 = vld [vmem:[#allocation2 + $0x2c] ss:$16 sps:$4 sm:$0xff]  }
 0x5fc   :  { %v9062_v28 = vld [vmem:[#allocation2 + $0x28] ss:$16 sps:$4 sm:$0xff]  }
 0x5fd   :  { %v4002_v39 = vmul.f32 %v4000_v43, %v3993_v6  ;;  %v9070_v43 = vld [vmem:[#allocation2 + $0x4] ss:$16 sps:$4 sm:$0xff]   ;;  %v9082_v37 = vld [vmem:[#allocation2 + $0x8] ss:$16 sps:$4 sm:$0xff]  }
 0x5fe   :  { %v7890_v36 = vpop.eup %7889 }
 0x5ff   :  { %v3701_v51 = vmul.f32 %v7890_v36, %v3700_v18  ;;  %v4003_v60 = vadd.f32 %v4002_v39, %v3992_v3  ;;  %v7892_v55 = vpop.eup %7891  ;;  %v9072_v18 = vld [vmem:[#allocation2 + $0xc] ss:$16 sps:$4 sm:$0xff]   ;;  %v9080_v39 = vld [vmem:[#allocation2] ss:$16 sps:$4 sm:$0xff]   ;;  %v9086_v36 = vld [vmem:[#allocation4 + $0xa4] ss:$16 sps:$4 sm:$0xff]  }
 0x600   :  { %v3999_v13 = vmul.f32 0.5, %v7892_v55  ;;  %v9100_v55 = vld [vmem:[#allocation4 + $0x84] ss:$16 sps:$4 sm:$0xff]  }
 0x601   :  { %7895 = vtanh.f32 %v4003_v60  ;;  %v8984_v27 = vadd.f32 %v3702_v5, %v3701_v51  ;;  %v9088_v5 = vld [vmem:[#allocation4 + $0xac] ss:$16 sps:$4 sm:$0xff]   ;;  %v9094_v60 = vld [vmem:[#allocation4 + $0xa0] ss:$16 sps:$4 sm:$0xff]   ;;  %9536 = vst [vmem:[#allocation10_spill] sm:$0xff] %v9100_v55 }
 0x602   :  { %7897 = vtanh.f32 %v4300_v49  ;;  %v4001_v1 = vadd.f32 0.5, %v3999_v13  ;;  %v9096_v49 = vld [vmem:[#allocation4 + $0xa8] ss:$16 sps:$4 sm:$0xff]   ;;  %v9102_v13 = vld [vmem:[#allocation4 + $0x8c] ss:$16 sps:$4 sm:$0xff]  }
 0x603   :  { %v8993_v38 = vpack.c.bf16 %v8984_v27, %v8984_v27  ;;  %9537 = vst [vmem:[#allocation11_spill] sm:$0xff] %v9102_v13 }
 0x604   :  { %v4007_v42 = vmul.f32 %v4001_v1, %v8872_v30  ;;  %v9060_v30 = vld [vmem:[#allocation2 + $0x20] ss:$16 sps:$4 sm:$0xff]  }
 0x605   :  { %7356 = vmatmul.mubr.msk.bf16.vlgmr.msra.gmra.mxu0 %vm120_vm0, %v8993_v38  ;;  %7357 = vmatmul.mubr.msk.bf16.vlgmr.msra.gmra.mxu1 %vm120_vm0, %v8993_v38 }
 0x606   :  { %4517 = vmatpush1.bf16.msra.mxu0 %v8825_v22  ;;  %4558 = vmatpush1.bf16.msra.mxu1 %v8989_v50 }
 0x607   :  { %4518 = vmatprep.subr.bf16.mxu0 %v8834_v44  ;;  %4559 = vmatprep.subr.bf16.mxu1 %v8998_v15  ;;  %v7347_v44 = vld [vmem:[%s9444_s0 + $0x18] sm:$0xf] }
 0x608   :  { %v7894_v22 = vpop.eup %7893  ;;  %4536 = vmatprep.mubr.bf16.mxu0 %v9491_v20  ;;  %4577 = vmatprep.mubr.bf16.mxu1 %v9491_v20 }
 0x609   :  { %v4303_v7 = vmul.f32 0.5, %v7894_v22  ;;  %v9110_v22 = vld [vmem:[#allocation4 + $0x80] ss:$16 sps:$4 sm:$0xff]  }
 0x60a   :  { %4519 = vmatpush1.bf16.msra.mxu0 %v8845_v0  ;;  %4560 = vmatpush1.bf16.msra.mxu1 %v9009_v10  ;;  %v4005_v0 = vsub.f32 1.0, %v4001_v1  ;;  %9538 = vst [vmem:[#allocation12_spill] sm:$0xff] %v9110_v22  ;;  %v9112_v1 = vld [vmem:[#allocation4 + $0x88] ss:$16 sps:$4 sm:$0xff]  }
 0x60b   :  { %v4305_v32 = vadd.f32 0.5, %v4303_v7  ;;  %4699 = vmatprep.subr.bf16.mxu0 %v9015_v46  ;;  %4740 = vmatprep.subr.bf16.mxu1 %v9017_v25  ;;  %9539 = vst [vmem:[#allocation13_spill] sm:$0xff] %v9112_v1  ;;  %v9117_v7 = vld [vmem:[#allocation2 + $0x64] ss:$16 sps:$4 sm:$0xff]  }
 0x60c   :  { %9540 = vst [vmem:[#allocation14_spill] sm:$0xff] %v9117_v7 }
 0x60d   :  { %v4307_v56 = vmul.f32 %v4305_v32, %v4298_v52  ;;  %7366 = vmatmul.mubr.msk.bf16.vlgmr.msra.gmra.mxu0 %vm120_vm0, %v7347_v44  ;;  %7367 = vmatmul.mubr.msk.bf16.vlgmr.msra.gmra.mxu1 %vm120_vm0, %v7347_v44  ;;  %v9119_v44 = vld [vmem:[#allocation2 + $0x6c] ss:$16 sps:$4 sm:$0xff]   ;;  %v9129_v52 = vld [vmem:[#allocation2 + $0x68] ss:$16 sps:$4 sm:$0xff]  }
 0x60e   :  { %v7896_v54 = vpop.eup %7895  ;;  %4700 = vmatpush1.bf16.msra.mxu0 %v9029_v59  ;;  %4741 = vmatpush1.bf16.msra.mxu1 %v9031_v29  ;;  %9541 = vst [vmem:[#allocation15_spill] sm:$0xff] %v9119_v44  ;;  %9543 = vst [vmem:[#allocation17_spill] sm:$0xff] %v9129_v52 }
 0x60f   :  { %v4006_v53 = vmul.f32 %v7896_v54, %v4005_v0  ;;  %v4308_v40 = vadd.f32 %v4307_v56, %v4297_v8  ;;  %4701 = vmatprep.subr.bf16.mxu0 %v9035_v11  ;;  %4742 = vmatprep.subr.bf16.mxu1 %v9037_v61  ;;  %v7898_v16 = vpop.eup %7897  ;;  %v9140_v0 = vld [vmem:[#allocation2 + $0x44] ss:$16 sps:$4 sm:$0xff]   ;;  %v9142_v8 = vld [vmem:[#allocation2 + $0x4c] ss:$16 sps:$4 sm:$0xff]   ;;  %v9148_v56 = vld [vmem:[#allocation2 + $0x40] ss:$16 sps:$4 sm:$0xff]  }
 0x610   :  { %4719 = vmatprep.mubr.bf16.mxu0 %v9491_v20  ;;  %4760 = vmatprep.mubr.bf16.mxu1 %v9491_v20  ;;  %v4304_v3 = vmul.f32 0.5, %v7898_v16  ;;  %9544 = vst [vmem:[#allocation18_spill] sm:$0xff] %v9140_v0  ;;  %9545 = vst [vmem:[#allocation9_spill] sm:$0xff] %v9142_v8  ;;  %v9150_v54 = vld [vmem:[#allocation2 + $0x48] ss:$16 sps:$4 sm:$0xff]  }
 0x611   :  { %7899 = vtanh.f32 %v4308_v40  ;;  %v9056_v9 = vadd.f32 %v4007_v42, %v4006_v53  ;;  %9546 = vst [vmem:[#allocation19_spill] sm:$0xff] %v9148_v56  ;;  %9547 = vst [vmem:[#allocation20_spill] sm:$0xff] %v9150_v54  ;;  %v4334_v53 = vld [vmem:[#allocation6] sm:$0xf] }
 0x612   :  { %4702 = vmatpush1.bf16.msra.mxu0 %v9043_v33  ;;  %4743 = vmatpush1.bf16.msra.mxu1 %v9045_v41  ;;  %v4306_v51 = vadd.f32 0.5, %v4304_v3 }
 0x613   :  { %v9066_v6 = vpack.c.bf16 %v9056_v9, %v9056_v9  ;;  %4821 = vmatprep.subr.bf16.mxu0 %v9050_v14  ;;  %4862 = vmatprep.subr.bf16.mxu1 %v9052_v17 }
 0x614   :  { %v4310_v19 = vsub.f32 1.0, %v4306_v51  ;;  %v4312_v63 = vmul.f32 %v4306_v51, %v8903_v24  ;;  %v9127_v24 = vld [vmem:[#allocation2 + $0x60] ss:$16 sps:$4 sm:$0xff]  }
 0x615   :  { %7376 = vmatmul.mubr.msk.bf16.vlgmr.msra.gmra.mxu0 %vm120_vm0, %v9066_v6  ;;  %7377 = vmatmul.mubr.msk.bf16.vlgmr.msra.gmra.mxu1 %vm120_vm0, %v9066_v6  ;;  %9542 = vst [vmem:[#allocation16_spill] sm:$0xff] %v9127_v24 }
 0x616   :  { %4822 = vmatpush1.bf16.msra.mxu0 %v9060_v30  ;;  %4863 = vmatpush1.bf16.msra.mxu1 %v9062_v28 }
 0x617   :  { %4823 = vmatprep.subr.bf16.mxu0 %v9070_v43  ;;  %4864 = vmatprep.subr.bf16.mxu1 %v9072_v18 }
 0x618   :  { %4841 = vmatprep.mubr.bf16.mxu0 %v9491_v20  ;;  %4882 = vmatprep.mubr.bf16.mxu1 %v9491_v20 }
 0x61a   :  { %4824 = vmatpush1.bf16.msra.mxu0 %v9080_v39  ;;  %4865 = vmatpush1.bf16.msra.mxu1 %v9082_v37 }
 0x61b   :  { %5004 = vmatprep.subr.bf16.mxu0 %v9086_v36  ;;  %5045 = vmatprep.subr.bf16.mxu1 %v9088_v5 }
 0x61d   :  { %7386 = vmatmul.mubr.msk.bf16.vlgmr.msra.gmra.mxu0 %vm120_vm0, %v8993_v38  ;;  %7387 = vmatmul.mubr.msk.bf16.vlgmr.msra.gmra.mxu1 %vm120_vm0, %v8993_v38 }
 0x61e   :  { %v7900_v4 = vpop.eup %7899  ;;  %5005 = vmatpush1.bf16.msra.mxu0 %v9094_v60  ;;  %5046 = vmatpush1.bf16.msra.mxu1 %v9096_v49 }
 0x61f   :  { %v4311_v2 = vmul.f32 %v7900_v4, %v4310_v19  ;;  %5006 = vmatprep.subr.bf16.mxu0 %v9100_v55  ;;  %5047 = vmatprep.subr.bf16.mxu1 %v9102_v13 }
 0x620   :  { %5024 = vmatprep.mubr.bf16.mxu0 %v9491_v20  ;;  %5065 = vmatprep.mubr.bf16.mxu1 %v9491_v20 }
 0x621   :  { %v9123_v38 = vadd.f32 %v4312_v63, %v4311_v2 }
 0x622   :  { %5007 = vmatpush1.bf16.msra.mxu0 %v9110_v22  ;;  %5048 = vmatpush1.bf16.msra.mxu1 %v9112_v1 }
 0x623   :  { %7346 = vst.msk [vmem:[%s9449_s5 + $0x18] sm:$0xff] %vm120_vm0, %v9123_v38  ;;  %v4948_v32 = vpack.c.bf16 %v9123_v38, %v9123_v38  ;;  %5126 = vmatprep.subr.bf16.mxu0 %v9117_v7  ;;  %5167 = vmatprep.subr.bf16.mxu1 %v9119_v44 }
 0x625   :  { %7396 = vmatmul.mubr.msk.bf16.vlgmr.msra.gmra.mxu0 %vm120_vm0, %v4948_v32  ;;  %7397 = vmatmul.mubr.msk.bf16.vlgmr.msra.gmra.mxu1 %vm120_vm0, %v4948_v32 }
 0x626   :  { %5127 = vmatpush1.bf16.msra.mxu0 %v9127_v24  ;;  %5168 = vmatpush1.bf16.msra.mxu1 %v9129_v52 }
 0x627   :  { %5128 = vmatprep.subr.bf16.mxu0 %v9140_v0  ;;  %5169 = vmatprep.subr.bf16.mxu1 %v9142_v8 }
 0x628   :  { %5146 = vmatprep.mubr.bf16.mxu0 %v9491_v20  ;;  %5187 = vmatprep.mubr.bf16.mxu1 %v9491_v20 }
 0x62a   :  { %5129 = vmatpush1.bf16.msra.mxu0 %v9148_v56  ;;  %5170 = vmatpush1.bf16.msra.mxu1 %v9150_v54 }
 0x62b   :  { %5313 = vmatprep.subr.bf16.mxu0 %v8930_v31  ;;  %5354 = vmatprep.subr.bf16.mxu1 %v8932_v34  ;;  %v7759_v31 = vld [vmem:[%s9445_s1 + $0x24] ss:$16 sps:$4 sm:$0xff]  }
 0x62d   :  { %7406 = vmatmul.mubr.msk.bf16.vlgmr.msra.gmra.mxu0 %vm120_vm0, %v9066_v6  ;;  %7407 = vmatmul.mubr.msk.bf16.vlgmr.msra.gmra.mxu1 %vm120_vm0, %v9066_v6 }
 0x62e   :  { %5314 = vmatpush1.bf16.msra.mxu0 %v8934_v21  ;;  %5355 = vmatpush1.bf16.msra.mxu1 %v8936_v26 }
 0x62f   :  { %5315 = vmatprep.subr.bf16.mxu0 %v8942_v58  ;;  %5356 = vmatprep.subr.bf16.mxu1 %v8944_v45 }
 0x630   :  { %5333 = vmatprep.mubr.bf16.mxu0 %v9491_v20  ;;  %5374 = vmatprep.mubr.bf16.mxu1 %v9491_v20 }
 0x632   :  { %5316 = vmatpush1.bf16.msra.mxu0 %v8946_v23  ;;  %5357 = vmatpush1.bf16.msra.mxu1 %v8948_v57  ;;  %v4590_v23 = vrot.slane %v4334_v53, %v9509_v62 }
 0x633   :  { %5479 = vmatprep.subr.bf16.mxu1 %v8958_v35  ;;  %5438 = vmatprep.subr.bf16.mxu0 %v7759_v31  ;;  %v4594_v31 = vrot.slane %v4334_v53, %v9500_v12 }
 0x6c5   :  { %v4413_v34 = vpop.f32.mrf.mxu0  ;;  %v4454_v21 = vpop.f32.mrf.mxu1 }
 0x6c7   :  { %v4415_v26 = vpop.f32.mrf.mxu0  ;;  %v4456_v58 = vpop.f32.mrf.mxu1 }
 0x6c9   :  { %v4417_v45 = vpop.f32.mrf.mxu0  ;;  %v4458_v42 = vpop.f32.mrf.mxu1 }
 0x6cb   :  { %v4418_v40 = vpop.f32.mrf.mxu0  ;;  %v4459_v16 = vpop.f32.mrf.mxu1 }
 0x6cd   :  { %v4538_v6 = vpop.f32.mrf.mxu0  ;;  %v4579_v57 = vpop.f32.mrf.mxu1 }
 0x6ce   :  { %v4539_v3 = vadd.f32 %v4538_v6, %v4413_v34  ;;  %v9178_v34 = vld [vmem:[#allocation6 + $0x4] sm:$0xf] }
 0x6cf   :  { %v4540_v35 = vpop.f32.mrf.mxu0  ;;  %v4581_v51 = vpop.f32.mrf.mxu1 }
 0x6d0   :  { %v4607_v19 = vadd.f32 %v4590_v23, %v4539_v3  ;;  %v4541_v32 = vadd.f32 %v4540_v35, %v4415_v26  ;;  %v4895_v26 = vrot.slane %v9178_v34, %v9509_v62 }
 0x6d1   :  { %v4542_v4 = vpop.f32.mrf.mxu0  ;;  %v4583_v63 = vpop.f32.mrf.mxu1 }
 0x6d2   :  { %v4611_v2 = vmul.f32 0.5, %v4607_v19  ;;  %v4608_v16 = vadd.f32 %v4594_v31, %v4541_v32  ;;  %v4602_v32 = vrot.slane %v4334_v53, %v8180_v47 }
 0x6d3   :  { %v4543_v54 = vpop.f32.mrf.mxu0  ;;  %v4584_v45 = vpop.f32.mrf.mxu1 }
 0x6d4   :  { %7901 = vtanh.f32 %v4611_v2  ;;  %v4612_v6 = vmul.f32 0.5, %v4608_v16  ;;  %v4582_v2 = vadd.f32 %v4581_v51, %v4456_v58  ;;  %v4899_v45 = vrot.slane %v9178_v34, %v9500_v12 }
 0x6d5   :  { %v4721_v42 = vpop.f32.mrf.mxu0  ;;  %v4762_v40 = vpop.f32.mrf.mxu1 }
 0x6d6   :  { %7903 = vtanh.f32 %v4612_v6 }
 0x6d7   :  { %v4723_v56 = vpop.f32.mrf.mxu0  ;;  %v4764_v8 = vpop.f32.mrf.mxu1 }
 0x6d9   :  { %v4725_v0 = vpop.f32.mrf.mxu0  ;;  %v4766_v52 = vpop.f32.mrf.mxu1 }
 0x6da   :  { %v4598_v52 = vrot.slane %v4334_v53, %v8182_v48 }
 0x6db   :  { %v4726_v23 = vpop.f32.mrf.mxu0  ;;  %v4767_v3 = vpop.f32.mrf.mxu1 }
 0x6dc   :  { %v4580_v3 = vadd.f32 %v4579_v57, %v4454_v21  ;;  %v9188_v21 = vld [vmem:[#allocation6 + $0x8] sm:$0xf] }
 0x6dd   :  { %v4843_v35 = vpop.f32.mrf.mxu0  ;;  %v4884_v19 = vpop.f32.mrf.mxu1 }
 0x6de   :  { %v4844_v54 = vadd.f32 %v4843_v35, %v4721_v42  ;;  %v4610_v35 = vadd.f32 %v4602_v32, %v4582_v2 }
 0x6df   :  { %v4845_v4 = vpop.f32.mrf.mxu0  ;;  %v4886_v63 = vpop.f32.mrf.mxu1 }
 0x6e0   :  { %v4912_v31 = vadd.f32 %v4895_v26, %v4844_v54  ;;  %v4846_v7 = vadd.f32 %v4845_v4, %v4723_v56  ;;  %v4609_v26 = vadd.f32 %v4598_v52, %v4580_v3  ;;  %v4887_v52 = vadd.f32 %v4886_v63, %v4764_v8 }
 0x6e1   :  { %v7902_v0 = vpop.eup %7901  ;;  %v4847_v16 = vpop.f32.mrf.mxu0 }
 0x6e2   :  { %v4888_v23 = vpop.f32.mrf.mxu1  ;;  %v4615_v24 = vmul.f32 0.5, %v7902_v0  ;;  %v4916_v44 = vmul.f32 0.5, %v4912_v31  ;;  %v4913_v53 = vadd.f32 %v4899_v45, %v4846_v7  ;;  %v4907_v45 = vrot.slane %v9178_v34, %v8180_v47 }
 0x6e3   :  { %v4848_v6 = vpop.f32.mrf.mxu0  ;;  %v7904_v57 = vpop.eup %7903 }
 0x6e4   :  { %v4889_v42 = vpop.f32.mrf.mxu1  ;;  %v4617_v1 = vadd.f32 0.5, %v4615_v24  ;;  %7905 = vtanh.f32 %v4916_v44  ;;  %v4917_v56 = vmul.f32 0.5, %v4913_v53  ;;  %v5200_v44 = vrot.slane %v9188_v21, %v9509_v62 }
 0x6e5   :  { %v5026_v58 = vpop.f32.mrf.mxu0  ;;  %v4616_v31 = vmul.f32 0.5, %v7904_v57  ;;  %v4885_v6 = vadd.f32 %v4884_v19, %v4762_v40  ;;  %v4903_v42 = vrot.slane %v9178_v34, %v8182_v48  ;;  %v4915_v63 = vadd.f32 %v4907_v45, %v4887_v52  ;;  %v7762_v52 = vld [vmem:[%s9445_s1 + $0x4] ss:$16 sps:$4 sm:$0xff]   ;;  %v7760_v45 = vld [vmem:[%s9445_s1] ss:$16 sps:$4 sm:$0xff]  }
 0x6e6   :  { %v9186_v51 = vpop.f32.mrf.mxu1  ;;  %v4619_v54 = vmul.f32 %v4617_v1, %v4610_v35  ;;  %v5204_v35 = vrot.slane %v9188_v21, %v9500_v12 }
 0x6e7   :  { %v5028_v22 = vpop.f32.mrf.mxu0  ;;  %v4618_v53 = vadd.f32 0.5, %v4616_v31 }
 0x6e8   :  { %v5069_v13 = vpop.f32.mrf.mxu1  ;;  %v4620_v55 = vadd.f32 %v4619_v54, %v4609_v26 }
 0x6e9   :  { %v5030_v16 = vpop.f32.mrf.mxu0  ;;  %v4624_v34 = vmul.f32 %v4618_v53, %v8984_v27 }
 0x6ea   :  { %v5071_v23 = vpop.f32.mrf.mxu1  ;;  %7907 = vtanh.f32 %v4620_v55 }
 0x6eb   :  { %v5031_v4 = vpop.f32.mrf.mxu0  ;;  %7909 = vtanh.f32 %v4917_v56 }
 0x6ec   :  { %v5072_v2 = vpop.f32.mrf.mxu1  ;;  %v4622_v4 = vsub.f32 1.0, %v4618_v53 }
 0x6ed   :  { %v5148_v24 = vpop.f32.mrf.mxu0  ;;  %v4914_v2 = vadd.f32 %v4903_v42, %v4885_v6  ;;  %v5212_v6 = vrot.slane %v9188_v21, %v8180_v47 }
 0x6ee   :  { %v5189_v32 = vpop.f32.mrf.mxu1  ;;  %v5149_v1 = vadd.f32 %v5148_v24, %v5026_v58 }
 0x6ef   :  { %v5150_v7 = vpop.f32.mrf.mxu0 }
 0x6f0   :  { %v5191_v0 = vpop.f32.mrf.mxu1  ;;  %v5217_v3 = vadd.f32 %v5200_v44, %v5149_v1  ;;  %v5151_v23 = vadd.f32 %v5150_v7, %v5028_v22  ;;  %v7757_v22 = vld [vmem:[%s9445_s1 + $0x20] ss:$16 sps:$4 sm:$0xff]  }
 0x6f1   :  { %v7906_v55 = vpop.eup %7905  ;;  %v5152_v26 = vpop.f32.mrf.mxu0 }
 0x6f2   :  { %v5193_v54 = vpop.f32.mrf.mxu1  ;;  %v4920_v16 = vmul.f32 0.5, %v7906_v55  ;;  %v5221_v58 = vmul.f32 0.5, %v5217_v3  ;;  %v5218_v19 = vadd.f32 %v5204_v35, %v5151_v23  ;;  %v5192_v55 = vadd.f32 %v5191_v0, %v5069_v13  ;;  %v7409_v13 = vld [vmem:[%s9444_s0 + $0x1c] sm:$0xf] }
 0x6f3   :  { %v5153_v56 = vpop.f32.mrf.mxu0  ;;  %v5190_v54 = vadd.f32 %v5189_v32, %v9186_v51 }
 0x6f4   :  { %v5194_v8 = vpop.f32.mrf.mxu1  ;;  %v4922_v57 = vadd.f32 0.5, %v4920_v16  ;;  %7911 = vtanh.f32 %v5221_v58  ;;  %v5222_v26 = vmul.f32 0.5, %v5218_v19  ;;  %v9559_v56 = vld [vmem:[#allocation20_spill] sm:$0xff]  ;;  %v7769_v19 = vld [vmem:[#allocation4 + $0x40] ss:$16 sps:$4 sm:$0xff]  }
 0x6f5   :  { %v7765_v8 = vld [vmem:[#allocation4 + $0x64] ss:$16 sps:$4 sm:$0xff]  }
 0x6f6   :  { %v4924_v40 = vmul.f32 %v4922_v57, %v4915_v63  ;;  %v7768_v63 = vld [vmem:[#allocation4 + $0x6c] ss:$16 sps:$4 sm:$0xff]   ;;  %v7763_v57 = vld [vmem:[#allocation4 + $0x60] ss:$16 sps:$4 sm:$0xff]  }
 0x6f7   :  { %v7908_v44 = vpop.eup %7907 }
 0x6f8   :  { %v4623_v24 = vmul.f32 %v7908_v44, %v4622_v4  ;;  %v4925_v1 = vadd.f32 %v4924_v40, %v4914_v2  ;;  %v7910_v3 = vpop.eup %7909  ;;  %v7766_v4 = vld [vmem:[#allocation4 + $0x68] ss:$16 sps:$4 sm:$0xff]   ;;  %v7771_v2 = vld [vmem:[#allocation4 + $0x44] ss:$16 sps:$4 sm:$0xff]   ;;  %v7774_v40 = vld [vmem:[#allocation4 + $0x4c] ss:$16 sps:$4 sm:$0xff]  }
 0x6f9   :  { %v4921_v27 = vmul.f32 0.5, %v7910_v3  ;;  %v7772_v44 = vld [vmem:[#allocation4 + $0x48] ss:$16 sps:$4 sm:$0xff]  }
 0x6fa   :  { %7913 = vtanh.f32 %v4925_v1  ;;  %v9199_v31 = vadd.f32 %v4624_v34, %v4623_v24  ;;  %v7777_v34 = vld [vmem:[#allocation2 + $0x24] ss:$16 sps:$4 sm:$0xff]   ;;  %v7780_v24 = vld [vmem:[#allocation2 + $0x2c] ss:$16 sps:$4 sm:$0xff]  }
 0x6fb   :  { %7915 = vtanh.f32 %v5222_v26  ;;  %v4923_v35 = vadd.f32 0.5, %v4921_v27 }
 0x6fc   :  { %v9206_v7 = vpack.c.bf16 %v9199_v31, %v9199_v31 }
 0x6fd   :  { %v4927_v16 = vsub.f32 1.0, %v4923_v35 }
 0x6fe   :  { %7418 = vmatmul.mubr.msk.bf16.vlgmr.msra.gmra.mxu0 %vm120_vm0, %v9206_v7  ;;  %7419 = vmatmul.mubr.msk.bf16.vlgmr.msra.gmra.mxu1 %vm120_vm0, %v9206_v7 }
 0x6ff   :  { %5439 = vmatpush1.bf16.msra.mxu0 %v7757_v22  ;;  %5480 = vmatpush1.bf16.msra.mxu1 %v8989_v50  ;;  %v5208_v50 = vrot.slane %v9188_v21, %v8182_v48 }
 0x700   :  { %5440 = vmatprep.subr.bf16.mxu0 %v7762_v52  ;;  %5481 = vmatprep.subr.bf16.mxu1 %v8998_v15  ;;  %v5220_v15 = vadd.f32 %v5212_v6, %v5192_v55  ;;  %v9302_v55 = vld [vmem:[#allocation6] sm:$0xf] }
 0x701   :  { %v7912_v42 = vpop.eup %7911  ;;  %5458 = vmatprep.mubr.bf16.mxu0 %v9491_v20  ;;  %5499 = vmatprep.mubr.bf16.mxu1 %v9491_v20  ;;  %v5219_v58 = vadd.f32 %v5208_v50, %v5190_v54 }
 0x702   :  { %v5225_v53 = vmul.f32 0.5, %v7912_v42 }
 0x703   :  { %5441 = vmatpush1.bf16.msra.mxu0 %v7760_v45  ;;  %5482 = vmatpush1.bf16.msra.mxu1 %v9009_v10  ;;  %v4929_v10 = vmul.f32 %v4923_v35, %v9056_v9  ;;  %v9549_v9 = vld [vmem:[#allocation11_spill] sm:$0xff] }
 0x704   :  { %v5227_v0 = vadd.f32 0.5, %v5225_v53  ;;  %5621 = vmatprep.subr.bf16.mxu0 %v9015_v46  ;;  %5662 = vmatprep.subr.bf16.mxu1 %v9017_v25  ;;  %v5512_v53 = vrot.slane %v9302_v55, %v9509_v62 }
 0x706   :  { %v5229_v51 = vmul.f32 %v5227_v0, %v5220_v15  ;;  %7428 = vmatmul.mubr.msk.bf16.vlgmr.msra.gmra.mxu0 %vm120_vm0, %v7409_v13  ;;  %7429 = vmatmul.mubr.msk.bf16.vlgmr.msra.gmra.mxu1 %vm120_vm0, %v7409_v13 }
 0x707   :  { %v7914_v21 = vpop.eup %7913  ;;  %5622 = vmatpush1.bf16.msra.mxu0 %v9029_v59  ;;  %5663 = vmatpush1.bf16.msra.mxu1 %v9031_v29 }
 0x708   :  { %v4928_v32 = vmul.f32 %v7914_v21, %v4927_v16  ;;  %v5230_v23 = vadd.f32 %v5229_v51, %v5219_v58  ;;  %5623 = vmatprep.subr.bf16.mxu0 %v9035_v11  ;;  %5664 = vmatprep.subr.bf16.mxu1 %v9037_v61  ;;  %v7916_v25 = vpop.eup %7915 }
 0x709   :  { %5641 = vmatprep.mubr.bf16.mxu0 %v9491_v20  ;;  %5682 = vmatprep.mubr.bf16.mxu1 %v9491_v20  ;;  %v5226_v29 = vmul.f32 0.5, %v7916_v25 }
 0x70a   :  { %7917 = vtanh.f32 %v5230_v23  ;;  %v9242_v46 = vadd.f32 %v4929_v10, %v4928_v32 }
 0x70b   :  { %5624 = vmatpush1.bf16.msra.mxu0 %v9043_v33  ;;  %5665 = vmatpush1.bf16.msra.mxu1 %v9045_v41  ;;  %v5228_v11 = vadd.f32 0.5, %v5226_v29  ;;  %v9310_v29 = vld [vmem:[#allocation6 + $0x4] sm:$0xf] }
 0x70c   :  { %v5565_v59 = vpack.c.bf16 %v9242_v46, %v9242_v46  ;;  %5743 = vmatprep.subr.bf16.mxu0 %v9050_v14  ;;  %5784 = vmatprep.subr.bf16.mxu1 %v9052_v17  ;;  %v9548_v17 = vld [vmem:[#allocation10_spill] sm:$0xff] }
 0x70d   :  { %v5232_v61 = vsub.f32 1.0, %v5228_v11  ;;  %v5234_v41 = vmul.f32 %v5228_v11, %v9123_v38  ;;  %v9558_v38 = vld [vmem:[#allocation19_spill] sm:$0xff] }
 0x70e   :  { %7438 = vmatmul.mubr.msk.bf16.vlgmr.msra.gmra.mxu0 %vm120_vm0, %v5565_v59  ;;  %7439 = vmatmul.mubr.msk.bf16.vlgmr.msra.gmra.mxu1 %vm120_vm0, %v5565_v59 }
 0x70f   :  { %5744 = vmatpush1.bf16.msra.mxu0 %v9060_v30  ;;  %5785 = vmatpush1.bf16.msra.mxu1 %v9062_v28  ;;  %v9550_v28 = vld [vmem:[#allocation12_spill] sm:$0xff] }
 0x710   :  { %5745 = vmatprep.subr.bf16.mxu0 %v9070_v43  ;;  %5786 = vmatprep.subr.bf16.mxu1 %v9072_v18  ;;  %v9551_v43 = vld [vmem:[#allocation13_spill] sm:$0xff] }
 0x711   :  { %5763 = vmatprep.mubr.bf16.mxu0 %v9491_v20  ;;  %5804 = vmatprep.mubr.bf16.mxu1 %v9491_v20 }
 0x713   :  { %5746 = vmatpush1.bf16.msra.mxu0 %v9080_v39  ;;  %5787 = vmatpush1.bf16.msra.mxu1 %v9082_v37  ;;  %v9552_v39 = vld [vmem:[#allocation14_spill] sm:$0xff]  ;;  %v9553_v37 = vld [vmem:[#allocation15_spill] sm:$0xff] }
 0x714   :  { %5926 = vmatprep.subr.bf16.mxu0 %v9086_v36  ;;  %5967 = vmatprep.subr.bf16.mxu1 %v9088_v5  ;;  %v9554_v36 = vld [vmem:[#allocation16_spill] sm:$0xff]  ;;  %v9555_v5 = vld [vmem:[#allocation17_spill] sm:$0xff] }
 0x716   :  { %7448 = vmatmul.mubr.msk.bf16.vlgmr.msra.gmra.mxu0 %vm120_vm0, %v9206_v7  ;;  %7449 = vmatmul.mubr.msk.bf16.vlgmr.msra.gmra.mxu1 %vm120_vm0, %v9206_v7 }
 0x717   :  { %v7918_v33 = vpop.eup %7917  ;;  %5927 = vmatpush1.bf16.msra.mxu0 %v9094_v60  ;;  %5968 = vmatpush1.bf16.msra.mxu1 %v9096_v49  ;;  %v9556_v60 = vld [vmem:[#allocation18_spill] sm:$0xff]  ;;  %v9557_v49 = vld [vmem:[#allocation9_spill] sm:$0xff] }
 0x718   :  { %v5233_v14 = vmul.f32 %v7918_v33, %v5232_v61  ;;  %5928 = vmatprep.subr.bf16.mxu0 %v9548_v17  ;;  %5969 = vmatprep.subr.bf16.mxu1 %v9549_v9  ;;  %v5817_v33 = vrot.slane %v9310_v29, %v9509_v62 }
 0x719   :  { %5946 = vmatprep.mubr.bf16.mxu0 %v9491_v20  ;;  %5987 = vmatprep.mubr.bf16.mxu1 %v9491_v20 }
 0x71a   :  { %v9273_v30 = vadd.f32 %v5234_v41, %v5233_v14 }
 0x71b   :  { %5929 = vmatpush1.bf16.msra.mxu0 %v9550_v28  ;;  %5970 = vmatpush1.bf16.msra.mxu1 %v9551_v43 }
 0x71c   :  { %7408 = vst.msk [vmem:[%s9449_s5 + $0x20] sm:$0xff] %vm120_vm0, %v9273_v30  ;;  %v5870_v18 = vpack.c.bf16 %v9273_v30, %v9273_v30  ;;  %6048 = vmatprep.subr.bf16.mxu0 %v9552_v39  ;;  %6089 = vmatprep.subr.bf16.mxu1 %v9553_v37 }
 0x71e   :  { %7458 = vmatmul.mubr.msk.bf16.vlgmr.msra.gmra.mxu0 %vm120_vm0, %v5870_v18  ;;  %7459 = vmatmul.mubr.msk.bf16.vlgmr.msra.gmra.mxu1 %vm120_vm0, %v5870_v18 }
 0x71f   :  { %6049 = vmatpush1.bf16.msra.mxu0 %v9554_v36  ;;  %6090 = vmatpush1.bf16.msra.mxu1 %v9555_v5  ;;  %v5821_v5 = vrot.slane %v9310_v29, %v9500_v12 }
 0x720   :  { %6050 = vmatprep.subr.bf16.mxu0 %v9556_v60  ;;  %6091 = vmatprep.subr.bf16.mxu1 %v9557_v49 }
 0x721   :  { %6068 = vmatprep.mubr.bf16.mxu0 %v9491_v20  ;;  %6109 = vmatprep.mubr.bf16.mxu1 %v9491_v20 }
 0x723   :  { %6051 = vmatpush1.bf16.msra.mxu0 %v9558_v38  ;;  %6092 = vmatpush1.bf16.msra.mxu1 %v9559_v56  ;;  %v5516_v56 = vrot.slane %v9302_v55, %v9500_v12 }
 0x724   :  { %6234 = vmatprep.subr.bf16.mxu0 %v7765_v8  ;;  %6275 = vmatprep.subr.bf16.mxu1 %v7768_v63 }
 0x726   :  { %7468 = vmatmul.mubr.msk.bf16.vlgmr.msra.gmra.mxu0 %vm120_vm0, %v5565_v59  ;;  %7469 = vmatmul.mubr.msk.bf16.vlgmr.msra.gmra.mxu1 %vm120_vm0, %v5565_v59 }
 0x727   :  { %6254 = vmatprep.mubr.bf16.mxu0 %v9491_v20  ;;  %6295 = vmatprep.mubr.bf16.mxu1 %v9491_v20 }
 0x728   :  { %6235 = vmatpush1.bf16.msra.mxu0 %v7763_v57  ;;  %6276 = vmatpush1.bf16.msra.mxu1 %v7766_v4 }
 0x729   :  { %6236 = vmatprep.subr.bf16.mxu0 %v7771_v2  ;;  %6277 = vmatprep.subr.bf16.mxu1 %v7774_v40 }
 0x72c   :  { %6237 = vmatpush1.bf16.msra.mxu0 %v7769_v19  ;;  %6278 = vmatpush1.bf16.msra.mxu1 %v7772_v44 }
 0x72d   :  { %6359 = vmatprep.subr.bf16.mxu0 %v7777_v34  ;;  %6400 = vmatprep.subr.bf16.mxu1 %v7780_v24  ;;  %v9320_v24 = vld [vmem:[#allocation6 + $0x8] sm:$0xf] }
 0x7be   :  { %v5335_v1 = vpop.f32.mrf.mxu0  ;;  %v9300_v26 = vpop.f32.mrf.mxu1 }
 0x7c0   :  { %v5337_v3 = vpop.f32.mrf.mxu0  ;;  %v5378_v22 = vpop.f32.mrf.mxu1 }
 0x7c2   :  { %v5339_v7 = vpop.f32.mrf.mxu0  ;;  %v5380_v52 = vpop.f32.mrf.mxu1 }
 0x7c4   :  { %v5340_v27 = vpop.f32.mrf.mxu0  ;;  %v5381_v45 = vpop.f32.mrf.mxu1 }
 0x7c6   :  { %v5460_v6 = vpop.f32.mrf.mxu0  ;;  %v9304_v42 = vpop.f32.mrf.mxu1 }
 0x7c7   :  { %v5461_v50 = vadd.f32 %v5460_v6, %v5335_v1 }
 0x7c8   :  { %v5462_v35 = vpop.f32.mrf.mxu0  ;;  %v5503_v54 = vpop.f32.mrf.mxu1 }
 0x7c9   :  { %v5529_v58 = vadd.f32 %v5512_v53, %v5461_v50  ;;  %v5463_v38 = vadd.f32 %v5462_v35, %v5337_v3  ;;  %v6122_v3 = vrot.slane %v9320_v24, %v9509_v62  ;;  %v5504_v6 = vadd.f32 %v5503_v54, %v5378_v22 }
 0x7ca   :  { %v5464_v13 = vpop.f32.mrf.mxu0  ;;  %v5505_v15 = vpop.f32.mrf.mxu1  ;;  %v5524_v35 = vrot.slane %v9302_v55, %v8180_v47  ;;  %v5829_v22 = vrot.slane %v9310_v29, %v8180_v47 }
 0x7cb   :  { %v5533_v23 = vmul.f32 0.5, %v5529_v58  ;;  %v5530_v19 = vadd.f32 %v5516_v56, %v5463_v38  ;;  %v5520_v15 = vrot.slane %v9302_v55, %v8182_v48  ;;  %v6126_v55 = vrot.slane %v9320_v24, %v9500_v12 }
 0x7cc   :  { %v5465_v0 = vpop.f32.mrf.mxu0  ;;  %v5506_v16 = vpop.f32.mrf.mxu1  ;;  %v6134_v56 = vrot.slane %v9320_v24, %v8180_v47 }
 0x7cd   :  { %7919 = vtanh.f32 %v5533_v23  ;;  %v5534_v45 = vmul.f32 0.5, %v5530_v19  ;;  %v5825_v0 = vrot.slane %v9310_v29, %v8182_v48 }
 0x7ce   :  { %v5643_v51 = vpop.f32.mrf.mxu0  ;;  %v9308_v21 = vpop.f32.mrf.mxu1 }
 0x7d0   :  { %v5645_v10 = vpop.f32.mrf.mxu0  ;;  %v5686_v32 = vpop.f32.mrf.mxu1 }
 0x7d2   :  { %v5647_v25 = vpop.f32.mrf.mxu0  ;;  %v5688_v59 = vpop.f32.mrf.mxu1 }
 0x7d3   :  { %v5502_v25 = vadd.f32 %v9304_v42, %v9300_v26  ;;  %v5532_v59 = vadd.f32 %v5524_v35, %v5504_v6 }
 0x7d4   :  { %v5648_v11 = vpop.f32.mrf.mxu0  ;;  %v5689_v61 = vpop.f32.mrf.mxu1 }
 0x7d6   :  { %v5765_v41 = vpop.f32.mrf.mxu0  ;;  %v5806_v14 = vpop.f32.mrf.mxu1 }
 0x7d7   :  { %v5766_v17 = vadd.f32 %v5765_v41, %v5643_v51 }
 0x7d8   :  { %v5767_v9 = vpop.f32.mrf.mxu0  ;;  %v5808_v28 = vpop.f32.mrf.mxu1 }
 0x7d9   :  { %v5834_v43 = vadd.f32 %v5817_v33, %v5766_v17  ;;  %v5768_v36 = vadd.f32 %v5767_v9, %v5645_v10  ;;  %v5809_v10 = vadd.f32 %v5808_v28, %v5686_v32  ;;  %v5807_v33 = vadd.f32 %v5806_v14, %v9308_v21 }
 0x7da   :  { %v5769_v18 = vpop.f32.mrf.mxu0  ;;  %v5810_v39 = vpop.f32.mrf.mxu1 }
 0x7db   :  { %v5838_v37 = vmul.f32 0.5, %v5834_v43  ;;  %v5835_v57 = vadd.f32 %v5821_v5, %v5768_v36  ;;  %v7920_v40 = vpop.eup %7919  ;;  %v5837_v43 = vadd.f32 %v5829_v22, %v5809_v10  ;;  %v5531_v39 = vadd.f32 %v5520_v15, %v5502_v25  ;;  %v7781_v22 = vld [vmem:[#allocation2] ss:$16 sps:$4 sm:$0xff]   ;;  %v7789_v25 = vld [vmem:[#allocation4 + $0xa4] ss:$16 sps:$4 sm:$0xff]  }
 0x7dc   :  { %v5770_v60 = vpop.f32.mrf.mxu0  ;;  %v5811_v49 = vpop.f32.mrf.mxu1  ;;  %v5537_v27 = vmul.f32 0.5, %v7920_v40  ;;  %v5836_v26 = vadd.f32 %v5825_v0, %v5807_v33  ;;  %v7775_v0 = vld [vmem:[#allocation2 + $0x20] ss:$16 sps:$4 sm:$0xff]   ;;  %v7795_v33 = vld [vmem:[#allocation4 + $0x84] ss:$16 sps:$4 sm:$0xff]  }
 0x7dd   :  { %7921 = vtanh.f32 %v5838_v37  ;;  %v5839_v1 = vmul.f32 0.5, %v5835_v57  ;;  %v6130_v57 = vrot.slane %v9320_v24, %v8182_v48 }
 0x7de   :  { %v5948_v8 = vpop.f32.mrf.mxu0  ;;  %v9318_v63 = vpop.f32.mrf.mxu1  ;;  %v5539_v51 = vadd.f32 0.5, %v5537_v27 }
 0x7df   :  { %7923 = vtanh.f32 %v5839_v1 }
 0x7e0   :  { %v5950_v4 = vpop.f32.mrf.mxu0  ;;  %v5991_v2 = vpop.f32.mrf.mxu1  ;;  %7925 = vtanh.f32 %v5534_v45  ;;  %v5541_v29 = vmul.f32 %v5539_v51, %v5532_v59  ;;  %v7792_v59 = vld [vmem:[#allocation4 + $0xac] ss:$16 sps:$4 sm:$0xff]  }
 0x7e2   :  { %v5952_v44 = vpop.f32.mrf.mxu0  ;;  %v5993_v34 = vpop.f32.mrf.mxu1  ;;  %v5542_v36 = vadd.f32 %v5541_v29, %v5531_v39  ;;  %v7804_v39 = vld [vmem:[#allocation2 + $0x6c] ss:$16 sps:$4 sm:$0xff]  }
 0x7e4   :  { %v5953_v7 = vpop.f32.mrf.mxu0  ;;  %v5994_v52 = vpop.f32.mrf.mxu1 }
 0x7e6   :  { %v6070_v50 = vpop.f32.mrf.mxu0  ;;  %v6111_v53 = vpop.f32.mrf.mxu1 }
 0x7e7   :  { %v6071_v13 = vadd.f32 %v6070_v50, %v5948_v8  ;;  %v6112_v19 = vadd.f32 %v6111_v53, %v9318_v63  ;;  %v7778_v63 = vld [vmem:[#allocation2 + $0x28] ss:$16 sps:$4 sm:$0xff]  }
 0x7e8   :  { %v6072_v16 = vpop.f32.mrf.mxu0  ;;  %v6113_v58 = vpop.f32.mrf.mxu1 }
 0x7e9   :  { %v6139_v54 = vadd.f32 %v6122_v3, %v6071_v13  ;;  %v6073_v32 = vadd.f32 %v6072_v16, %v5950_v4  ;;  %v6114_v38 = vadd.f32 %v6113_v58, %v5991_v2  ;;  %v6141_v27 = vadd.f32 %v6130_v57, %v6112_v19  ;;  %v7783_v16 = vld [vmem:[#allocation2 + $0x4] ss:$16 sps:$4 sm:$0xff]   ;;  %v7786_v58 = vld [vmem:[#allocation2 + $0xc] ss:$16 sps:$4 sm:$0xff]  }
 0x7ea   :  { %v7922_v23 = vpop.eup %7921  ;;  %v6074_v11 = vpop.f32.mrf.mxu0  ;;  %v9398_v19 = vld [vmem:[#allocation6 + $0x4] sm:$0xf] }
 0x7eb   :  { %v6115_v61 = vpop.f32.mrf.mxu1  ;;  %v5842_v41 = vmul.f32 0.5, %v7922_v23  ;;  %v6143_v17 = vmul.f32 0.5, %v6139_v54  ;;  %v6140_v37 = vadd.f32 %v6126_v55, %v6073_v32  ;;  %v6142_v34 = vadd.f32 %v6134_v56, %v6114_v38  ;;  %v7784_v54 = vld [vmem:[#allocation2 + $0x8] ss:$16 sps:$4 sm:$0xff]   ;;  %v7787_v55 = vld [vmem:[#allocation4 + $0xa0] ss:$16 sps:$4 sm:$0xff]  }
 0x7ec   :  { %v6075_v9 = vpop.f32.mrf.mxu0  ;;  %v7924_v49 = vpop.eup %7923  ;;  %v7790_v11 = vld [vmem:[#allocation4 + $0xa8] ss:$16 sps:$4 sm:$0xff]  }
 0x7ed   :  { %v6116_v28 = vpop.f32.mrf.mxu1  ;;  %v5844_v18 = vadd.f32 0.5, %v5842_v41  ;;  %7927 = vtanh.f32 %v6143_v17  ;;  %v6144_v60 = vmul.f32 0.5, %v6140_v37  ;;  %v7926_v21 = vpop.eup %7925  ;;  %v5843_v14 = vmul.f32 0.5, %v7924_v49  ;;  %v7798_v41 = vld [vmem:[#allocation4 + $0x8c] ss:$16 sps:$4 sm:$0xff]  }
 0x7ee   :  { %v5538_v4 = vmul.f32 0.5, %v7926_v21  ;;  %v7793_v9 = vld [vmem:[#allocation4 + $0x80] ss:$16 sps:$4 sm:$0xff]   ;;  %v7796_v28 = vld [vmem:[#allocation4 + $0x88] ss:$16 sps:$4 sm:$0xff]  }
 0x7ef   :  { %v5846_v42 = vmul.f32 %v5844_v18, %v5837_v43  ;;  %v5845_v40 = vadd.f32 0.5, %v5843_v14  ;;  %v7801_v18 = vld [vmem:[#allocation2 + $0x64] ss:$16 sps:$4 sm:$0xff]   ;;  %v9365_v37 = vld [vmem:[#allocation2 + $0x68] ss:$16 sps:$4 sm:$0xff]  }
 0x7f0   :  { %v5540_v7 = vadd.f32 0.5, %v5538_v4  ;;  %v9384_v49 = vld [vmem:[#allocation2 + $0x48] ss:$16 sps:$4 sm:$0xff]  }
 0x7f1   :  { %v5847_v5 = vadd.f32 %v5846_v42, %v5836_v26  ;;  %v5849_v52 = vsub.f32 1.0, %v5845_v40  ;;  %v5851_v2 = vmul.f32 %v5845_v40, %v9242_v46  ;;  %v9363_v42 = vld [vmem:[#allocation2 + $0x60] ss:$16 sps:$4 sm:$0xff]  }
 0x7f2   :  { %v5544_v13 = vsub.f32 1.0, %v5540_v7  ;;  %v5546_v10 = vmul.f32 %v5540_v7, %v9199_v31 }
 0x7f3   :  { %7929 = vtanh.f32 %v5847_v5  ;;  %v9376_v5 = vld [vmem:[#allocation2 + $0x4c] ss:$16 sps:$4 sm:$0xff]  }
 0x7f4   :  { %7931 = vtanh.f32 %v5542_v36  ;;  %v9374_v36 = vld [vmem:[#allocation2 + $0x44] ss:$16 sps:$4 sm:$0xff]  }
 0x7f5   :  { %7933 = vtanh.f32 %v6144_v60  ;;  %v9382_v60 = vld [vmem:[#allocation2 + $0x40] ss:$16 sps:$4 sm:$0xff]  }
 0x7fa   :  { %v7928_v8 = vpop.eup %7927 }
 0x7fb   :  { %v6147_v44 = vmul.f32 0.5, %v7928_v8 }
 0x7fd   :  { %v6149_v1 = vadd.f32 0.5, %v6147_v44 }
 0x7ff   :  { %v6151_v3 = vmul.f32 %v6149_v1, %v6142_v34 }
 0x800   :  { %v7930_v45 = vpop.eup %7929 }
 0x801   :  { %v5850_v6 = vmul.f32 %v7930_v45, %v5849_v52  ;;  %v6152_v35 = vadd.f32 %v6151_v3, %v6141_v27  ;;  %v7932_v50 = vpop.eup %7931  ;;  %v6433_v27 = vrot.slane %v9398_v19, %v9509_v62 }
 0x802   :  { %v7934_v15 = vpop.eup %7933  ;;  %v5545_v51 = vmul.f32 %v7932_v50, %v5544_v13 }
 0x803   :  { %7935 = vtanh.f32 %v6152_v35  ;;  %v9343_v24 = vadd.f32 %v5851_v2, %v5850_v6  ;;  %v6148_v46 = vmul.f32 0.5, %v7934_v15 }
 0x804   :  { %v5547_v23 = vadd.f32 %v5546_v10, %v5545_v51 }
 0x805   :  { %v9347_v53 = vpack.c.bf16 %v9343_v24, %v9343_v24  ;;  %v6150_v31 = vadd.f32 0.5, %v6148_v46 }
 0x806   :  { %v6177_v61 = vpack.c.bf16 %v5547_v23, %v5547_v23 }
 0x807   :  { %7479 = vmatmul.mubr.msk.bf16.vlgmr.msra.gmra.mxu0 %vm120_vm0, %v9347_v53  ;;  %7480 = vmatmul.mubr.msk.bf16.vlgmr.msra.gmra.mxu1 %vm120_vm0, %v9347_v53  ;;  %v6154_v17 = vsub.f32 1.0, %v6150_v31  ;;  %v6156_v29 = vmul.f32 %v6150_v31, %v9273_v30 }
 0x808   :  { %6360 = vmatpush1.bf16.msra.mxu0 %v7775_v0  ;;  %6401 = vmatpush1.bf16.msra.mxu1 %v7778_v63 }
 0x809   :  { %6361 = vmatprep.subr.bf16.mxu0 %v7783_v16  ;;  %6402 = vmatprep.subr.bf16.mxu1 %v7786_v58  ;;  %v6485_v58 = vld [vmem:[#allocation6 + $0x8] sm:$0xf] }
 0x80a   :  { %6379 = vmatprep.mubr.bf16.mxu0 %v9491_v20  ;;  %6420 = vmatprep.mubr.bf16.mxu1 %v9491_v20  ;;  %v6738_v46 = vrot.slane %v6485_v58, %v9509_v62 }
 0x80c   :  { %6362 = vmatpush1.bf16.msra.mxu0 %v7781_v22  ;;  %6403 = vmatpush1.bf16.msra.mxu1 %v7784_v54 }
 0x80d   :  { %6542 = vmatprep.subr.bf16.mxu0 %v7789_v25  ;;  %6583 = vmatprep.subr.bf16.mxu1 %v7792_v59 }
 0x80f   :  { %7489 = vmatmul.mubr.msk.bf16.vlgmr.msra.gmra.mxu0 %vm120_vm0, %v6177_v61  ;;  %7490 = vmatmul.mubr.msk.bf16.vlgmr.msra.gmra.mxu1 %vm120_vm0, %v6177_v61 }
 0x810   :  { %v7936_v32 = vpop.eup %7935  ;;  %6543 = vmatpush1.bf16.msra.mxu0 %v7787_v55  ;;  %6584 = vmatpush1.bf16.msra.mxu1 %v7790_v11 }
 0x811   :  { %v6155_v43 = vmul.f32 %v7936_v32, %v6154_v17  ;;  %6544 = vmatprep.subr.bf16.mxu0 %v7795_v33  ;;  %6585 = vmatprep.subr.bf16.mxu1 %v7798_v41 }
 0x812   :  { %6562 = vmatprep.mubr.bf16.mxu0 %v9491_v20  ;;  %6603 = vmatprep.mubr.bf16.mxu1 %v9491_v20 }
 0x813   :  { %v9361_v26 = vadd.f32 %v6156_v29, %v6155_v43 }
 0x814   :  { %6545 = vmatpush1.bf16.msra.mxu0 %v7793_v9  ;;  %6586 = vmatpush1.bf16.msra.mxu1 %v7796_v28 }
 0x815   :  { %7470 = vst.msk [vmem:[%s9449_s5 + $0x28] sm:$0xff] %vm120_vm0, %v9361_v26  ;;  %v6486_v30 = vpack.c.bf16 %v9361_v26, %v9361_v26  ;;  %6664 = vmatprep.subr.bf16.mxu0 %v7801_v18  ;;  %6705 = vmatprep.subr.bf16.mxu1 %v7804_v39 }
 0x817   :  { %7499 = vmatmul.mubr.msk.bf16.vlgmr.msra.gmra.mxu0 %vm120_vm0, %v6486_v30  ;;  %7500 = vmatmul.mubr.msk.bf16.vlgmr.msra.gmra.mxu1 %vm120_vm0, %v6486_v30 }
 0x818   :  { %6665 = vmatpush1.bf16.msra.mxu0 %v9363_v42  ;;  %6706 = vmatpush1.bf16.msra.mxu1 %v9365_v37 }
 0x819   :  { %6666 = vmatprep.subr.bf16.mxu0 %v9374_v36  ;;  %6707 = vmatprep.subr.bf16.mxu1 %v9376_v5 }
 0x81a   :  { %6684 = vmatprep.mubr.bf16.mxu0 %v9491_v20  ;;  %6725 = vmatprep.mubr.bf16.mxu1 %v9491_v20 }
 0x81c   :  { %6667 = vmatpush1.bf16.msra.mxu0 %v9382_v60  ;;  %6708 = vmatpush1.bf16.msra.mxu1 %v9384_v49 }
 0x81d   :  { %6850 = vmatprep.subr.bf16.mxu0 %v7789_v25  ;;  %6891 = vmatprep.subr.bf16.mxu1 %v7792_v59 }
 0x81f   :  { %7509 = vmatmul.mubr.msk.bf16.vlgmr.msra.gmra.mxu0 %vm120_vm0, %v9347_v53  ;;  %7510 = vmatmul.mubr.msk.bf16.vlgmr.msra.gmra.mxu1 %vm120_vm0, %v9347_v53 }
 0x820   :  { %6851 = vmatpush1.bf16.msra.mxu0 %v7787_v55  ;;  %6892 = vmatpush1.bf16.msra.mxu1 %v7790_v11 }
 0x821   :  { %6852 = vmatprep.subr.bf16.mxu0 %v7795_v33  ;;  %6893 = vmatprep.subr.bf16.mxu1 %v7798_v41  ;;  %v6742_v41 = vrot.slane %v6485_v58, %v9500_v12 }
 0x822   :  { %6870 = vmatprep.mubr.bf16.mxu0 %v9491_v20  ;;  %6911 = vmatprep.mubr.bf16.mxu1 %v9491_v20 }
 0x824   :  { %6853 = vmatpush1.bf16.msra.mxu0 %v7793_v9  ;;  %6894 = vmatpush1.bf16.msra.mxu1 %v7796_v28  ;;  %v6437_v28 = vrot.slane %v9398_v19, %v9500_v12 }
 0x825   :  { %6975 = vmatprep.subr.bf16.mxu0 %v7801_v18  ;;  %7016 = vmatprep.subr.bf16.mxu1 %v7804_v39 }
 0x8c7   :  { %v6256_v21 = vpop.f32.mrf.mxu0  ;;  %v6297_v14 = vpop.f32.mrf.mxu1 }
 0x8c9   :  { %v6258_v38 = vpop.f32.mrf.mxu0  ;;  %v6299_v56 = vpop.f32.mrf.mxu1 }
 0x8cb   :  { %v6260_v8 = vpop.f32.mrf.mxu0  ;;  %v6301_v57 = vpop.f32.mrf.mxu1 }
 0x8cc   :  { %v6445_v57 = vrot.slane %v9398_v19, %v8180_v47 }
 0x8cd   :  { %v6261_v4 = vpop.f32.mrf.mxu0  ;;  %v6302_v40 = vpop.f32.mrf.mxu1 }
 0x8cf   :  { %v6381_v44 = vpop.f32.mrf.mxu0  ;;  %v6422_v34 = vpop.f32.mrf.mxu1 }
 0x8d0   :  { %v6382_v52 = vadd.f32 %v6381_v44, %v6256_v21  ;;  %v6750_v44 = vrot.slane %v6485_v58, %v8180_v47 }
 0x8d1   :  { %v6383_v1 = vpop.f32.mrf.mxu0  ;;  %v6424_v7 = vpop.f32.mrf.mxu1 }
 0x8d2   :  { %v6450_v35 = vadd.f32 %v6433_v27, %v6382_v52  ;;  %v6384_v9 = vadd.f32 %v6383_v1, %v6258_v38  ;;  %v6425_v8 = vadd.f32 %v6424_v7, %v6299_v56  ;;  %v6423_v38 = vadd.f32 %v6422_v34, %v6297_v14 }
 0x8d3   :  { %v6385_v3 = vpop.f32.mrf.mxu0  ;;  %v6426_v45 = vpop.f32.mrf.mxu1  ;;  %v6441_v1 = vrot.slane %v9398_v19, %v8182_v48  ;;  %v6746_v27 = vrot.slane %v6485_v58, %v8182_v48 }
 0x8d4   :  { %v6454_v63 = vmul.f32 0.5, %v6450_v35  ;;  %v6451_v18 = vadd.f32 %v6437_v28, %v6384_v9  ;;  %v6453_v3 = vadd.f32 %v6445_v57, %v6425_v8 }
 0x8d5   :  { %v6386_v2 = vpop.f32.mrf.mxu0  ;;  %v6427_v6 = vpop.f32.mrf.mxu1  ;;  %v6452_v35 = vadd.f32 %v6441_v1, %v6423_v38 }
 0x8d6   :  { %7937 = vtanh.f32 %v6454_v63  ;;  %v6455_v21 = vmul.f32 0.5, %v6451_v18 }
 0x8d7   :  { %v6564_v50 = vpop.f32.mrf.mxu0  ;;  %v6605_v13 = vpop.f32.mrf.mxu1 }
 0x8d9   :  { %v6566_v15 = vpop.f32.mrf.mxu0  ;;  %v6607_v0 = vpop.f32.mrf.mxu1 }
 0x8db   :  { %v6568_v53 = vpop.f32.mrf.mxu0  ;;  %v6609_v16 = vpop.f32.mrf.mxu1 }
 0x8dd   :  { %v6569_v51 = vpop.f32.mrf.mxu0  ;;  %v6610_v10 = vpop.f32.mrf.mxu1 }
 0x8df   :  { %v6686_v22 = vpop.f32.mrf.mxu0  ;;  %v6727_v54 = vpop.f32.mrf.mxu1 }
 0x8e0   :  { %v6687_v23 = vadd.f32 %v6686_v22, %v6564_v50  ;;  %v6728_v45 = vadd.f32 %v6727_v54, %v6605_v13 }
 0x8e1   :  { %v6688_v25 = vpop.f32.mrf.mxu0  ;;  %v6729_v59 = vpop.f32.mrf.mxu1 }
 0x8e2   :  { %v6755_v31 = vadd.f32 %v6738_v46, %v6687_v23  ;;  %v6689_v33 = vadd.f32 %v6688_v25, %v6566_v15  ;;  %v6730_v40 = vadd.f32 %v6729_v59, %v6607_v0  ;;  %v6757_v50 = vadd.f32 %v6746_v27, %v6728_v45 }
 0x8e3   :  { %v6690_v55 = vpop.f32.mrf.mxu0  ;;  %v6731_v11 = vpop.f32.mrf.mxu1 }
 0x8e4   :  { %v6759_v61 = vmul.f32 0.5, %v6755_v31  ;;  %v6756_v29 = vadd.f32 %v6742_v41, %v6689_v33  ;;  %v7938_v43 = vpop.eup %7937  ;;  %v6758_v7 = vadd.f32 %v6750_v44, %v6730_v40 }
 0x8e5   :  { %v6691_v17 = vpop.f32.mrf.mxu0  ;;  %v6732_v32 = vpop.f32.mrf.mxu1  ;;  %v6458_v30 = vmul.f32 0.5, %v7938_v43 }
 0x8e6   :  { %7939 = vtanh.f32 %v6759_v61  ;;  %v6760_v39 = vmul.f32 0.5, %v6756_v29  ;;  %v6792_v61 = vld [vmem:[#allocation6 + $0x8] sm:$0xf] }
 0x8e7   :  { %v6460_v4 = vadd.f32 0.5, %v6458_v30  ;;  %v7053_v30 = vrot.slane %v6792_v61, %v9500_v12  ;;  %v7057_v38 = vrot.slane %v6792_v61, %v8182_v48 }
 0x8e8   :  { %7941 = vtanh.f32 %v6760_v39 }
 0x8e9   :  { %7943 = vtanh.f32 %v6455_v21  ;;  %v6462_v56 = vmul.f32 %v6460_v4, %v6453_v3 }
 0x8eb   :  { %v6463_v0 = vadd.f32 %v6462_v56, %v6452_v35 }
 0x8f3   :  { %v7940_v52 = vpop.eup %7939 }
 0x8f4   :  { %v6763_v2 = vmul.f32 0.5, %v7940_v52 }
 0x8f5   :  { %v7942_v53 = vpop.eup %7941 }
 0x8f6   :  { %v6765_v6 = vadd.f32 0.5, %v6763_v2  ;;  %v6764_v14 = vmul.f32 0.5, %v7942_v53  ;;  %v7944_v34 = vpop.eup %7943 }
 0x8f7   :  { %v6459_v19 = vmul.f32 0.5, %v7944_v34 }
 0x8f8   :  { %v6767_v15 = vmul.f32 %v6765_v6, %v6758_v7  ;;  %v6766_v16 = vadd.f32 0.5, %v6764_v14 }
 0x8f9   :  { %v6461_v58 = vadd.f32 0.5, %v6459_v19 }
 0x8fa   :  { %v6768_v63 = vadd.f32 %v6767_v15, %v6757_v50  ;;  %v6770_v51 = vsub.f32 1.0, %v6766_v16  ;;  %v6772_v13 = vmul.f32 %v6766_v16, %v9361_v26 }
 0x8fb   :  { %v6465_v54 = vsub.f32 1.0, %v6461_v58  ;;  %v6467_v31 = vmul.f32 %v6461_v58, %v9343_v24 }
 0x8fc   :  { %7945 = vtanh.f32 %v6768_v63 }
 0x8fd   :  { %7947 = vtanh.f32 %v6463_v0 }
 0x909   :  { %v7946_v10 = vpop.eup %7945 }
 0x90a   :  { %v6771_v46 = vmul.f32 %v7946_v10, %v6770_v51  ;;  %v7948_v22 = vpop.eup %7947 }
 0x90b   :  { %v6466_v59 = vmul.f32 %v7948_v22, %v6465_v54 }
 0x90c   :  { %v9413_v23 = vadd.f32 %v6772_v13, %v6771_v46 }
 0x90d   :  { %v6468_v26 = vadd.f32 %v6467_v31, %v6466_v59 }
 0x90e   :  { %7511 = vst.msk [vmem:[%s9449_s5 + $0x30] sm:$0xff] %vm120_vm0, %v9413_v23  ;;  %v6794_v25 = vpack.c.bf16 %v9413_v23, %v9413_v23 }
 0x90f   :  { %v6793_v24 = vpack.c.bf16 %v6468_v26, %v6468_v26 }
 0x910   :  { %7520 = vmatmul.mubr.msk.bf16.vlgmr.msra.gmra.mxu0 %vm120_vm0, %v6794_v25  ;;  %7521 = vmatmul.mubr.msk.bf16.vlgmr.msra.gmra.mxu1 %vm120_vm0, %v6794_v25 }
 0x911   :  { %6976 = vmatpush1.bf16.msra.mxu0 %v9363_v42  ;;  %7017 = vmatpush1.bf16.msra.mxu1 %v9365_v37 }
 0x912   :  { %6977 = vmatprep.subr.bf16.mxu0 %v9374_v36  ;;  %7018 = vmatprep.subr.bf16.mxu1 %v9376_v5 }
 0x913   :  { %6995 = vmatprep.mubr.bf16.mxu0 %v9491_v20  ;;  %7036 = vmatprep.mubr.bf16.mxu1 %v9491_v20  ;;  %v7049_v20 = vrot.slane %v6792_v61, %v9509_v62  ;;  %v7061_v62 = vrot.slane %v6792_v61, %v8180_v47 }
 0x915   :  { %6978 = vmatpush1.bf16.msra.mxu0 %v9382_v60  ;;  %7019 = vmatpush1.bf16.msra.mxu1 %v9384_v49 }
 0x918   :  { %7530 = vmatmul.mubr.msk.bf16.vlgmr.msra.gmra.mxu0 %vm120_vm0, %v6793_v24  ;;  %7531 = vmatmul.mubr.msk.bf16.vlgmr.msra.gmra.mxu1 %vm120_vm0, %v6793_v24 }
 0x9d0   :  { %v6872_v42 = vpop.f32.mrf.mxu0  ;;  %v6913_v37 = vpop.f32.mrf.mxu1 }
 0x9d2   :  { %v6874_v55 = vpop.f32.mrf.mxu0  ;;  %v6915_v36 = vpop.f32.mrf.mxu1 }
 0x9d4   :  { %v6876_v11 = vpop.f32.mrf.mxu0  ;;  %v6917_v5 = vpop.f32.mrf.mxu1 }
 0x9d6   :  { %v6877_v33 = vpop.f32.mrf.mxu0  ;;  %v6918_v41 = vpop.f32.mrf.mxu1 }
 0x9d8   :  { %v6997_v17 = vpop.f32.mrf.mxu0  ;;  %v7038_v60 = vpop.f32.mrf.mxu1 }
 0x9d9   :  { %v6998_v32 = vadd.f32 %v6997_v17, %v6872_v42  ;;  %v7039_v52 = vadd.f32 %v7038_v60, %v6913_v37 }
 0x9da   :  { %v6999_v49 = vpop.f32.mrf.mxu0  ;;  %v7040_v9 = vpop.f32.mrf.mxu1 }
 0x9db   :  { %v7066_v28 = vadd.f32 %v7049_v20, %v6998_v32  ;;  %v7000_v39 = vadd.f32 %v6999_v49, %v6874_v55  ;;  %v7041_v40 = vadd.f32 %v7040_v9, %v6915_v36  ;;  %v7068_v45 = vadd.f32 %v7057_v38, %v7039_v52 }
 0x9dc   :  { %v7001_v29 = vpop.f32.mrf.mxu0  ;;  %v7042_v43 = vpop.f32.mrf.mxu1 }
 0x9dd   :  { %v7070_v18 = vmul.f32 0.5, %v7066_v28  ;;  %v7067_v57 = vadd.f32 %v7053_v30, %v7000_v39  ;;  %v7069_v27 = vadd.f32 %v7061_v62, %v7041_v40 }
 0x9de   :  { %v7002_v21 = vpop.f32.mrf.mxu0  ;;  %v7043_v8 = vpop.f32.mrf.mxu1 }
 0x9df   :  { %7949 = vtanh.f32 %v7070_v18  ;;  %v7071_v4 = vmul.f32 0.5, %v7067_v57 }
 0x9e1   :  { %7951 = vtanh.f32 %v7071_v4 }
 0x9ec   :  { %v7950_v44 = vpop.eup %7949 }
 0x9ed   :  { %v7074_v1 = vmul.f32 0.5, %v7950_v44 }
 0x9ee   :  { %v7952_v12 = vpop.eup %7951 }
 0x9ef   :  { %v7076_v3 = vadd.f32 0.5, %v7074_v1  ;;  %v7075_v7 = vmul.f32 0.5, %v7952_v12 }
 0x9f1   :  { %v7078_v2 = vmul.f32 %v7076_v3, %v7069_v27  ;;  %v7077_v6 = vadd.f32 0.5, %v7075_v7 }
 0x9f3   :  { %v7079_v56 = vadd.f32 %v7078_v2, %v7068_v45  ;;  %v7081_v35 = vsub.f32 1.0, %v7077_v6  ;;  %v7083_v15 = vmul.f32 %v7077_v6, %v9413_v23 }
 0x9f5   :  { %7953 = vtanh.f32 %v7079_v56 }
 0xa02   :  { %v7954_v50 = vpop.eup %7953 }
 0xa03   :  { %v7082_v0 = vmul.f32 %v7954_v50, %v7081_v35 }
 0xa05   :  { %v7084_v47 = vadd.f32 %v7083_v15, %v7082_v0 }
 0xa07   :  { %7532 = vst.msk [vmem:[%s9449_s5 + $0x38] sm:$0xff] %vm120_vm0, %v7084_v47 }
 0xa08   :  { %7091 = vsyncpa [#allocation3], 1 }
 0xa09   :  { %7092 = vsyncpa [#allocation5], 1 }

</bundles_post_ra>
